<compile_context>
chip_gen: v7x
topology: tpu7x:2x2x1
jax: 0.10.0
libtpu: 0.0.40
codegen_flags: <defaults>
</compile_context>

<pallas_src>
import numpy as np
import jax
import jax.numpy as jnp
from jax.experimental import pallas as pl
from jax.experimental.pallas import tpu as pltpu

N_NODES = 16            # nodes per graph
FEAT = 16               # input feature dim
HIDDEN = 128            # GCN width in the PyTorch module
OUT_LANES = 128         # lane-dense output width per graph
GRAPHS_PER_TILE = 16    # graphs per grid step -> 256 node rows per tile
TILE_ROWS = GRAPHS_PER_TILE * N_NODES           # 256
DATA_ROWS = 3 * TILE_ROWS + GRAPHS_PER_TILE     # 784 rows per per-tile slab
WSLAB_ROWS = 5 * HIDDEN                         # 640

# bf16 sublane tiling is 16 rows; keep every slice offset/extent full-tile.
assert N_NODES % 16 == 0 and TILE_ROWS % 128 == 0 and DATA_ROWS % 16 == 0
assert FEAT <= HIDDEN and N_NODES + 2 <= OUT_LANES


def _net_kernel(wslab_ref, sel_ref, bias_ref, data_ref, out_ref):
    f32, bf16 = jnp.float32, jnp.bfloat16
    R, G, N, H = TILE_ROWS, GRAPHS_PER_TILE, N_NODES, HIDDEN

    # ---- VMEM-resident parameters (constant index_map -> DMA'd once) ----
    w1 = wslab_ref[0 * H:1 * H, :]           # (128,128); rows >= FEAT are zero
    w2 = wslab_ref[1 * H:2 * H, :]
    w3 = wslab_ref[2 * H:3 * H, :]
    w4 = wslab_ref[3 * H:4 * H, :]
    wh = wslab_ref[4 * H:5 * H, :]           # fused heads: col0=wp col1=wv col2=wd
    sel = sel_ref[...].astype(f32)           # (G, R) 0/1 graph-membership matrix
    bias = bias_ref[...]                     # (8, 128) f32 (kept in f32 on purpose)
    b1, b2, b3, b4 = bias[0:1, :], bias[1:2, :], bias[2:3, :], bias[3:4, :]
    bp, bv, bd = bias[4:5, 0:1], bias[4:5, 1:2], bias[4:5, 2:3]

    # ---- per-tile graph slab (one streaming input DMA per grid step) ----
    s_bd = data_ref[0:R, :]                              # (R,R) block-diag S (succ)
    sp_bd = data_ref[R:2 * R, :]                         # (R,R) block-diag S (pred)
    xin = data_ref[2 * R:3 * R, 0:H]                     # (R,128) features, lane-padded
    st = data_ref[2 * R:3 * R, H:2 * H].astype(f32)      # (R,128) per-graph S^T blocks
    mask = data_ref[3 * R:3 * R + G, 0:H].astype(f32)    # (G,128) ready + do-nothing

    def gcn(hb, a, w, b):                   # relu(S @ (h @ W) + b), bf16 MXU / f32 acc
        xw = jnp.dot(hb, w, preferred_element_type=f32).astype(bf16)
        return jnp.maximum(jnp.dot(a, xw, preferred_element_type=f32) + b,
                           0.0).astype(bf16)

    h = gcn(xin, s_bd, w1, b1)      # conv_succ1
    h = gcn(h, s_bd, w2, b2)        # conv_succ2
    h = gcn(h, sp_bd, w3, b3)       # conv_pred1 (default flow)
    h = gcn(h, s_bd, w4, b4)        # conv_succ3

    # fused heads: one lane-dense matmul; col0 = x@wp, col1 = x@wv, col2 = x@wd
    hh = jnp.dot(h, wh, preferred_element_type=f32)                # (R,128) f32
    hp = hh[:, 0:1]                                                # (R,1) conv_probs pre-agg
    # per-graph mean pooling on the MXU (not cross-sublane XLU reductions)
    pooled = jnp.dot(sel, hh, preferred_element_type=f32) * (1.0 / N)   # (G,128)
    # conv_probs aggregation on the MXU: logits[g,j] = sum_i S_g[j,i] * hp_g[i]
    pmat = st * hp                                                 # (R,128) VPU
    logits = jnp.dot(sel, pmat, preferred_element_type=f32) + bp   # (G,128)

    v = pooled[:, 1:2] + bv                                        # value head  (G,1)
    pn = pooled[:, 2:3] + bd                                       # do_nothing  (G,1)

    # masked softmax over [ready node logits, prob_nothing] per graph (lane axis, f32)
    lane = jax.lax.broadcasted_iota(jnp.int32, (G, OUT_LANES), 1)
    full = jnp.where(lane == N, pn, logits)
    masked = jnp.where(mask > 0.5, full, jnp.float32(-1e30))
    m = jnp.max(masked, axis=1, keepdims=True)
    e = jnp.where(mask > 0.5, jnp.exp(masked - m), 0.0)
    denom = jnp.sum(e, axis=1, keepdims=True)
    probs = e * pl.reciprocal(denom, approx=True)
    out_ref[...] = jnp.where(lane == N + 1, v, probs)    # stash value in lane N+1


def build_forward(n_tiles):
    R, G, H = TILE_ROWS, GRAPHS_PER_TILE, HIDDEN
    per_tile_flops = (4 * (2 * R * H * H + 2 * R * R * H)   # 4 GCN layers (xW + S@)
                      + 2 * R * H * H                       # fused head matmul
                      + 2 * 2 * G * R * H)                  # pooling + logits matmuls
    bytes_acc = (WSLAB_ROWS * H * 2 + G * R * 2 + 8 * OUT_LANES * 4
                 + n_tiles * DATA_ROWS * R * 2
                 + n_tiles * G * OUT_LANES * 4)
    grid_spec = pltpu.PrefetchScalarGridSpec(
        num_scalar_prefetch=0,
        grid=(n_tiles,),
        in_specs=[
            pl.BlockSpec((WSLAB_ROWS, H), lambda t: (0, 0)),     # weights: resident
            pl.BlockSpec((G, R), lambda t: (0, 0)),              # selection: resident
            pl.BlockSpec((8, OUT_LANES), lambda t: (0, 0)),      # f32 biases: resident
            pl.BlockSpec((DATA_ROWS, R), lambda t: (t, 0)),      # per-tile graph slab
        ],
        out_specs=pl.BlockSpec((G, OUT_LANES), lambda t: (t, 0)),
    )
    fwd = pl.pallas_call(
        _net_kernel,
        out_shape=jax.ShapeDtypeStruct((n_tiles * G, OUT_LANES), jnp.float32),
        grid_spec=grid_spec,
        compiler_params=pltpu.CompilerParams(
            dimension_semantics=("parallel",),      # v7x: shard tiles over 2 TCs
            vmem_limit_bytes=32 << 20),             # budgeted for v7x's 64 MiB VMEM
        cost_estimate=pl.CostEstimate(
            flops=n_tiles * per_tile_flops,
            transcendentals=n_tiles * G * OUT_LANES,
            bytes_accessed=bytes_acc),
    )
    return jax.jit(fwd)


def pack_weights(params):
    """One-time packing of all static parameters (hoisted out of per-call path)."""
    h = HIDDEN
    w1p = np.zeros((h, h), np.float32)
    w1p[:FEAT, :] = np.asarray(params["w1"], np.float32)
    wh = np.zeros((h, OUT_LANES), np.float32)
    wh[:, 0] = np.asarray(params["wp"], np.float32)[:, 0]
    wh[:, 1] = np.asarray(params["wv"], np.float32)[:, 0]
    wh[:, 2] = np.asarray(params["wd"], np.float32)[:, 0]
    wslab = np.concatenate([w1p,
                            np.asarray(params["w2"], np.float32),
                            np.asarray(params["w3"], np.float32),
                            np.asarray(params["w4"], np.float32),
                            wh], axis=0)                           # (640, 128)
    sel = np.zeros((GRAPHS_PER_TILE, TILE_ROWS), np.float32)       # graph membership
    for g in range(GRAPHS_PER_TILE):
        sel[g, g * N_NODES:(g + 1) * N_NODES] = 1.0
    bias = np.zeros((8, OUT_LANES), np.float32)                    # stays f32
    bias[0] = np.asarray(params["b1"], np.float32)[0]
    bias[1] = np.asarray(params["b2"], np.float32)[0]
    bias[2] = np.asarray(params["b3"], np.float32)[0]
    bias[3] = np.asarray(params["b4"], np.float32)[0]
    bias[4, 0] = float(params["bp"][0, 0])
    bias[4, 1] = float(params["bv"][0, 0])
    bias[4, 2] = float(params["bd"][0, 0])
    return (jnp.asarray(wslab, dtype=jnp.bfloat16),
            jnp.asarray(sel, dtype=jnp.bfloat16),
            jnp.asarray(bias, dtype=jnp.float32))


def pack_graph_batch(s_list, sp_list, x_list, ready_list):
    """Per-call packing of per-graph data (block-diagonal S/S_pred, lane-padded
    features, per-graph S^T blocks, softmax mask) -> one input DMA per tile."""
    b = len(s_list)
    assert b % GRAPHS_PER_TILE == 0
    n_tiles = b // GRAPHS_PER_TILE
    R = TILE_ROWS
    data = np.zeros((n_tiles * DATA_ROWS, R), np.float32)
    for t in range(n_tiles):
        base = t * DATA_ROWS
        for gl in range(GRAPHS_PER_TILE):
            g = t * GRAPHS_PER_TILE + gl
            r0 = gl * N_NODES
            s = np.asarray(s_list[g], np.float32)
            sp = np.asarray(sp_list[g], np.float32)
            x = np.asarray(x_list[g], np.float32)
            rdy = np.asarray(ready_list[g], np.float32).reshape(-1)
            data[base + r0:base + r0 + N_NODES, r0:r0 + N_NODES] = s
            data[base + R + r0:base + R + r0 + N_NODES, r0:r0 + N_NODES] = sp
            data[base + 2 * R + r0:base + 2 * R + r0 + N_NODES, 0:FEAT] = x
            data[base + 2 * R + r0:base + 2 * R + r0 + N_NODES,
                 HIDDEN:HIDDEN + N_NODES] = s.T
            data[base + 3 * R + gl, 0:N_NODES] = rdy
            data[base + 3 * R + gl, N_NODES] = 1.0    # do-nothing lane always live
    return jnp.asarray(data, dtype=jnp.bfloat16), n_tiles


def make_gcn_adjacency(edge_index, num_nodes):
    """Dense S approximating PyG gcn_norm: aggregation at edge_index[0],
    messages from edge_index[1], self-loops, symmetric d^-1/2 normalization.
    # TODO(synk): the sparse edge_index scatter / exact PyG gcn_norm (incl.
    # edge_weight handling) is dense host-side glue, not in-kernel."""
    row, col = edge_index
    a = np.zeros((num_nodes, num_nodes), dtype=np.float32)
    a[row, col] = 1.0
    np.fill_diagonal(a, 1.0)
    deg = a.sum(axis=1)
    dinv = np.where(deg > 0, 1.0 / np.sqrt(deg), 0.0).astype(np.float32)
    return dinv[:, None] * a * dinv[None, :]


def init_params(key, input_dim):
    keys = jax.random.split(key, 7)

    def w(k, i, o, scale=0.1):
        return (scale * jax.random.normal(k, (i, o))).astype(jnp.float32)

    return {
        "w1": w(keys[0], input_dim, HIDDEN), "b1": jnp.zeros((1, HIDDEN), jnp.float32),
        "w2": w(keys[1], HIDDEN, HIDDEN),    "b2": jnp.zeros((1, HIDDEN), jnp.float32),
        "w3": w(keys[2], HIDDEN, HIDDEN),    "b3": jnp.zeros((1, HIDDEN), jnp.float32),
        "w4": w(keys[3], HIDDEN, HIDDEN),    "b4": jnp.zeros((1, HIDDEN), jnp.float32),
        "wp": w(keys[4], HIDDEN, 1),         "bp": jnp.zeros((1, 1), jnp.float32),
        "wv": w(keys[5], HIDDEN, 1),         "bv": jnp.zeros((1, 1), jnp.float32),
        "wd": w(keys[6], HIDDEN, 1),         "bd": jnp.zeros((1, 1), jnp.float32),
    }


def reference_forward(s, sp, x, params, ready_np):
    s = np.asarray(s, np.float32)
    sp = np.asarray(sp, np.float32)
    x = np.asarray(x, np.float32)
    p = {k: np.asarray(v, np.float32) for k, v in params.items()}

    def gcn(hh, a, w, b):
        return np.maximum(a @ (hh @ w) + b, 0.0)

    h = gcn(x, s, p["w1"], p["b1"])       # conv_succ1
    h = gcn(h, s, p["w2"], p["b2"])       # conv_succ2
    h = gcn(h, sp, p["w3"], p["b3"])      # conv_pred1 (default flow)
    h = gcn(h, s, p["w4"], p["b4"])       # conv_succ3
    logits = s @ (h @ p["wp"]) + p["bp"]  # conv_probs (N,1), no relu
    xm = h.mean(axis=0, keepdims=True)
    v = (xm @ p["wv"] + p["bv"]).reshape(-1)
    pn = (xm @ p["wd"] + p["bd"]).reshape(-1)
    full = np.concatenate([logits[ready_np.astype(bool), 0], pn])
    e = np.exp(full - full.max())
    return e / e.sum(), v


if __name__ == "__main__":
    B = 32    # graphs in the batch -> 2 grid tiles of 16 graphs (256 rows each)
    key = jax.random.PRNGKey(0)
    kx, kp = jax.random.split(key)
    params = init_params(kp, FEAT)

    # one-time (hoisted) static weight packing + upload
    wslab, sel, bias = pack_weights(params)

    # deterministic small graphs: directed ring + one graph-dependent chord
    x_all = np.asarray(jax.random.normal(kx, (B, N_NODES, FEAT), dtype=jnp.float32))
    base_edges = np.stack([np.arange(N_NODES), (np.arange(N_NODES) + 1) % N_NODES])
    s_list, sp_list, ready_list = [], [], []
    for g in range(B):
        chord = np.array([[g % N_NODES], [(3 * g + 5) % N_NODES]])
        edge_index = np.concatenate([base_edges, chord], axis=1).astype(np.int32)
        s_list.append(make_gcn_adjacency(edge_index, N_NODES))            # target_to_source
        sp_list.append(make_gcn_adjacency(edge_index[[1, 0]], N_NODES))   # default flow
        ready_list.append(((np.arange(N_NODES) + g) % 3 != 0).astype(np.float32))

    data, n_tiles = pack_graph_batch(s_list, sp_list, list(x_all), ready_list)
    fwd = build_forward(n_tiles)
    out = jax.block_until_ready(fwd(wslab, sel, bias, data))
    out_np = np.asarray(out, dtype=np.float32)            # (B, 128) lane-dense slab

    # TODO(synk): the boolean gather `probs[ready]` has a data-dependent output
    # size; it is done in host glue with statically-known ready indices.
    for g in range(B):
        rdy = ready_list[g]
        ridx = np.where(rdy > 0.5)[0]
        nridx = np.where(rdy < 0.5)[0]
        node_probs = out_np[g, :N_NODES]
        prob_nothing = out_np[g, N_NODES]
        v = out_np[g, N_NODES + 1]
        kern_probs = np.concatenate([node_probs[ridx], [prob_nothing]]).astype(np.float32)
        ref_probs, ref_v = reference_forward(s_list[g], sp_list[g], x_all[g], params, rdy)

        assert np.all(node_probs[nridx] == 0.0)            # non-ready lanes exactly 0
        assert np.isfinite(kern_probs).all() and np.isfinite(v)
        assert abs(kern_probs.sum() - 1.0) < 3e-3
        assert np.allclose(kern_probs, ref_probs, rtol=5e-2, atol=5e-2)
        assert np.allclose(v, ref_v, rtol=5e-2, atol=5e-2)

    print("KERNEL_OK")
</pallas_src>

<mosaic_0001>
module attributes {stable_mosaic.version = 11 : i64} {
  func.func @_net_kernel(%arg0: i32, %arg1: memref<640x128xbf16, #tpu.memory_space<vmem>>, %arg2: memref<16x256xbf16, #tpu.memory_space<vmem>>, %arg3: memref<8x128xf32, #tpu.memory_space<vmem>>, %arg4: memref<784x256xbf16, #tpu.memory_space<vmem>>, %arg5: memref<16x128xf32, #tpu.memory_space<vmem>>) attributes {dimension_semantics = [#tpu.dimension_semantics<parallel>], iteration_bounds = array<i64: 2>, scalar_prefetch = 0 : i64, scratch_operands = 0 : i64, tpu.core_type = #tpu.core_type<tc>, window_params = [{pipeline_mode = #tpu.pipeline_mode<synchronous>, transform_indices = @transform_0, window_bounds = array<i64: 640, 128>}, {pipeline_mode = #tpu.pipeline_mode<synchronous>, transform_indices = @transform_1, window_bounds = array<i64: 16, 256>}, {pipeline_mode = #tpu.pipeline_mode<synchronous>, transform_indices = @transform_2, window_bounds = array<i64: 8, 128>}, {transform_indices = @transform_3, window_bounds = array<i64: 784, 256>}, {transform_indices = @transform_4, window_bounds = array<i64: 16, 128>}]} {
    %c0 = arith.constant 0 : index
    %c0_0 = arith.constant 0 : index
    %0 = vector.load %arg1[%c0, %c0_0] : memref<640x128xbf16, #tpu.memory_space<vmem>>, vector<128x128xbf16>
    %c128 = arith.constant 128 : index
    %c0_1 = arith.constant 0 : index
    %1 = vector.load %arg1[%c128, %c0_1] : memref<640x128xbf16, #tpu.memory_space<vmem>>, vector<128x128xbf16>
    %c256 = arith.constant 256 : index
    %c0_2 = arith.constant 0 : index
    %2 = vector.load %arg1[%c256, %c0_2] : memref<640x128xbf16, #tpu.memory_space<vmem>>, vector<128x128xbf16>
    %c384 = arith.constant 384 : index
    %c0_3 = arith.constant 0 : index
    %3 = vector.load %arg1[%c384, %c0_3] : memref<640x128xbf16, #tpu.memory_space<vmem>>, vector<128x128xbf16>
    %c512 = arith.constant 512 : index
    %c0_4 = arith.constant 0 : index
    %4 = vector.load %arg1[%c512, %c0_4] : memref<640x128xbf16, #tpu.memory_space<vmem>>, vector<128x128xbf16>
    %c0_5 = arith.constant 0 : index
    %c0_6 = arith.constant 0 : index
    %5 = vector.load %arg2[%c0_5, %c0_6] : memref<16x256xbf16, #tpu.memory_space<vmem>>, vector<16x256xbf16>
    %6 = arith.extf %5 : vector<16x256xbf16> to vector<16x256xf32>
    %c0_7 = arith.constant 0 : index
    %c0_8 = arith.constant 0 : index
    %7 = vector.load %arg3[%c0_7, %c0_8] : memref<8x128xf32, #tpu.memory_space<vmem>>, vector<8x128xf32>
    %8 = vector.extract_strided_slice %7 {offsets = [0, 0], sizes = [1, 128], strides = [1, 1]} : vector<8x128xf32> to vector<1x128xf32>
    %9 = vector.extract_strided_slice %7 {offsets = [1, 0], sizes = [1, 128], strides = [1, 1]} : vector<8x128xf32> to vector<1x128xf32>
    %10 = vector.extract_strided_slice %7 {offsets = [2, 0], sizes = [1, 128], strides = [1, 1]} : vector<8x128xf32> to vector<1x128xf32>
    %11 = vector.extract_strided_slice %7 {offsets = [3, 0], sizes = [1, 128], strides = [1, 1]} : vector<8x128xf32> to vector<1x128xf32>
    %12 = vector.extract_strided_slice %7 {offsets = [4, 0], sizes = [1, 1], strides = [1, 1]} : vector<8x128xf32> to vector<1x1xf32>
    %13 = vector.extract_strided_slice %7 {offsets = [4, 1], sizes = [1, 1], strides = [1, 1]} : vector<8x128xf32> to vector<1x1xf32>
    %14 = vector.extract_strided_slice %7 {offsets = [4, 2], sizes = [1, 1], strides = [1, 1]} : vector<8x128xf32> to vector<1x1xf32>
    %c0_9 = arith.constant 0 : index
    %c0_10 = arith.constant 0 : index
    %15 = vector.load %arg4[%c0_9, %c0_10] : memref<784x256xbf16, #tpu.memory_space<vmem>>, vector<256x256xbf16>
    %c256_11 = arith.constant 256 : index
    %c0_12 = arith.constant 0 : index
    %16 = vector.load %arg4[%c256_11, %c0_12] : memref<784x256xbf16, #tpu.memory_space<vmem>>, vector<256x256xbf16>
    %c512_13 = arith.constant 512 : index
    %c0_14 = arith.constant 0 : index
    %17 = vector.load %arg4[%c512_13, %c0_14] : memref<784x256xbf16, #tpu.memory_space<vmem>>, vector<256x128xbf16>
    %c512_15 = arith.constant 512 : index
    %c128_16 = arith.constant 128 : index
    %18 = vector.load %arg4[%c512_15, %c128_16] : memref<784x256xbf16, #tpu.memory_space<vmem>>, vector<256x128xbf16>
    %19 = arith.extf %18 : vector<256x128xbf16> to vector<256x128xf32>
    %c768 = arith.constant 768 : index
    %c0_17 = arith.constant 0 : index
    %20 = vector.load %arg4[%c768, %c0_17] : memref<784x256xbf16, #tpu.memory_space<vmem>>, vector<16x128xbf16>
    %21 = arith.extf %20 : vector<16x128xbf16> to vector<16x128xf32>
    %cst = arith.constant dense<0.000000e+00> : vector<256x128xf32>
    %22 = tpu.matmul %17, %0, %cst {dimension_numbers = #tpu.dot_dimension_numbers<[1], [0], [0], [1], [0, 0, 1, 1], [], []>} : vector<256x128xbf16>, vector<128x128xbf16>, vector<256x128xf32> -> vector<256x128xf32>
    %23 = arith.truncf %22 : vector<256x128xf32> to vector<256x128xbf16>
    %cst_18 = arith.constant dense<0.000000e+00> : vector<256x128xf32>
    %24 = tpu.matmul %15, %23, %cst_18 {dimension_numbers = #tpu.dot_dimension_numbers<[1], [0], [0], [1], [0, 0, 1, 1], [], []>} : vector<256x256xbf16>, vector<256x128xbf16>, vector<256x128xf32> -> vector<256x128xf32>
    %25 = vector.broadcast %8 : vector<1x128xf32> to vector<256x128xf32>
    %26 = arith.addf %24, %25 : vector<256x128xf32>
    %cst_19 = arith.constant 0.000000e+00 : f32
    %27 = vector.broadcast %cst_19 : f32 to vector<256x128xf32>
    %28 = arith.maximumf %26, %27 : vector<256x128xf32>
    %29 = arith.truncf %28 : vector<256x128xf32> to vector<256x128xbf16>
    %cst_20 = arith.constant dense<0.000000e+00> : vector<256x128xf32>
    %30 = tpu.matmul %29, %1, %cst_20 {dimension_numbers = #tpu.dot_dimension_numbers<[1], [0], [0], [1], [0, 0, 1, 1], [], []>} : vector<256x128xbf16>, vector<128x128xbf16>, vector<256x128xf32> -> vector<256x128xf32>
    %31 = arith.truncf %30 : vector<256x128xf32> to vector<256x128xbf16>
    %cst_21 = arith.constant dense<0.000000e+00> : vector<256x128xf32>
    %32 = tpu.matmul %15, %31, %cst_21 {dimension_numbers = #tpu.dot_dimension_numbers<[1], [0], [0], [1], [0, 0, 1, 1], [], []>} : vector<256x256xbf16>, vector<256x128xbf16>, vector<256x128xf32> -> vector<256x128xf32>
    %33 = vector.broadcast %9 : vector<1x128xf32> to vector<256x128xf32>
    %34 = arith.addf %32, %33 : vector<256x128xf32>
    %cst_22 = arith.constant 0.000000e+00 : f32
    %35 = vector.broadcast %cst_22 : f32 to vector<256x128xf32>
    %36 = arith.maximumf %34, %35 : vector<256x128xf32>
    %37 = arith.truncf %36 : vector<256x128xf32> to vector<256x128xbf16>
    %cst_23 = arith.constant dense<0.000000e+00> : vector<256x128xf32>
    %38 = tpu.matmul %37, %2, %cst_23 {dimension_numbers = #tpu.dot_dimension_numbers<[1], [0], [0], [1], [0, 0, 1, 1], [], []>} : vector<256x128xbf16>, vector<128x128xbf16>, vector<256x128xf32> -> vector<256x128xf32>
    %39 = arith.truncf %38 : vector<256x128xf32> to vector<256x128xbf16>
    %cst_24 = arith.constant dense<0.000000e+00> : vector<256x128xf32>
    %40 = tpu.matmul %16, %39, %cst_24 {dimension_numbers = #tpu.dot_dimension_numbers<[1], [0], [0], [1], [0, 0, 1, 1], [], []>} : vector<256x256xbf16>, vector<256x128xbf16>, vector<256x128xf32> -> vector<256x128xf32>
    %41 = vector.broadcast %10 : vector<1x128xf32> to vector<256x128xf32>
    %42 = arith.addf %40, %41 : vector<256x128xf32>
    %cst_25 = arith.constant 0.000000e+00 : f32
    %43 = vector.broadcast %cst_25 : f32 to vector<256x128xf32>
    %44 = arith.maximumf %42, %43 : vector<256x128xf32>
    %45 = arith.truncf %44 : vector<256x128xf32> to vector<256x128xbf16>
    %cst_26 = arith.constant dense<0.000000e+00> : vector<256x128xf32>
    %46 = tpu.matmul %45, %3, %cst_26 {dimension_numbers = #tpu.dot_dimension_numbers<[1], [0], [0], [1], [0, 0, 1, 1], [], []>} : vector<256x128xbf16>, vector<128x128xbf16>, vector<256x128xf32> -> vector<256x128xf32>
    %47 = arith.truncf %46 : vector<256x128xf32> to vector<256x128xbf16>
    %cst_27 = arith.constant dense<0.000000e+00> : vector<256x128xf32>
    %48 = tpu.matmul %15, %47, %cst_27 {dimension_numbers = #tpu.dot_dimension_numbers<[1], [0], [0], [1], [0, 0, 1, 1], [], []>} : vector<256x256xbf16>, vector<256x128xbf16>, vector<256x128xf32> -> vector<256x128xf32>
    %49 = vector.broadcast %11 : vector<1x128xf32> to vector<256x128xf32>
    %50 = arith.addf %48, %49 : vector<256x128xf32>
    %cst_28 = arith.constant 0.000000e+00 : f32
    %51 = vector.broadcast %cst_28 : f32 to vector<256x128xf32>
    %52 = arith.maximumf %50, %51 : vector<256x128xf32>
    %53 = arith.truncf %52 : vector<256x128xf32> to vector<256x128xbf16>
    %cst_29 = arith.constant dense<0.000000e+00> : vector<256x128xf32>
    %54 = tpu.matmul %53, %4, %cst_29 {dimension_numbers = #tpu.dot_dimension_numbers<[1], [0], [0], [1], [0, 0, 1, 1], [], []>} : vector<256x128xbf16>, vector<128x128xbf16>, vector<256x128xf32> -> vector<256x128xf32>
    %55 = vector.extract_strided_slice %54 {offsets = [0, 0], sizes = [256, 1], strides = [1, 1]} : vector<256x128xf32> to vector<256x1xf32>
    %cst_30 = arith.constant dense<0.000000e+00> : vector<16x128xf32>
    %56 = tpu.matmul %6, %54, %cst_30 {dimension_numbers = #tpu.dot_dimension_numbers<[1], [0], [0], [1], [0, 0, 1, 1], [], []>} : vector<16x256xf32>, vector<256x128xf32>, vector<16x128xf32> -> vector<16x128xf32>
    %cst_31 = arith.constant 6.250000e-02 : f32
    %57 = vector.broadcast %cst_31 : f32 to vector<16x128xf32>
    %58 = arith.mulf %56, %57 : vector<16x128xf32>
    %59 = vector.broadcast %55 : vector<256x1xf32> to vector<256x128xf32>
    %60 = arith.mulf %19, %59 : vector<256x128xf32>
    %cst_32 = arith.constant dense<0.000000e+00> : vector<16x128xf32>
    %61 = tpu.matmul %6, %60, %cst_32 {dimension_numbers = #tpu.dot_dimension_numbers<[1], [0], [0], [1], [0, 0, 1, 1], [], []>} : vector<16x256xf32>, vector<256x128xf32>, vector<16x128xf32> -> vector<16x128xf32>
    %62 = vector.broadcast %12 : vector<1x1xf32> to vector<16x128xf32>
    %63 = arith.addf %61, %62 : vector<16x128xf32>
    %64 = vector.extract_strided_slice %58 {offsets = [0, 1], sizes = [16, 1], strides = [1, 1]} : vector<16x128xf32> to vector<16x1xf32>
    %65 = vector.broadcast %13 : vector<1x1xf32> to vector<16x1xf32>
    %66 = arith.addf %64, %65 : vector<16x1xf32>
    %67 = vector.extract_strided_slice %58 {offsets = [0, 2], sizes = [16, 1], strides = [1, 1]} : vector<16x128xf32> to vector<16x1xf32>
    %68 = vector.broadcast %14 : vector<1x1xf32> to vector<16x1xf32>
    %69 = arith.addf %67, %68 : vector<16x1xf32>
    %70 = tpu.iota {dimensions = array<i32: 1>} : vector<16x128xi32>
    %c16_i32 = arith.constant 16 : i32
    %71 = vector.broadcast %c16_i32 : i32 to vector<16x128xi32>
    %72 = arith.cmpi eq, %70, %71 : vector<16x128xi32>
    %73 = vector.shape_cast %69 : vector<16x1xf32> to vector<16x1xf32>
    %74 = vector.broadcast %73 : vector<16x1xf32> to vector<16x128xf32>
    %75 = arith.select %72, %74, %63 : vector<16x128xi1>, vector<16x128xf32>
    %cst_33 = arith.constant 5.000000e-01 : f32
    %76 = vector.broadcast %cst_33 : f32 to vector<16x128xf32>
    %77 = arith.cmpf ogt, %21, %76 : vector<16x128xf32>
    %cst_34 = arith.constant -1.000000e+30 : f32
    %78 = vector.broadcast %cst_34 : f32 to vector<16x128xf32>
    %79 = arith.select %77, %75, %78 : vector<16x128xi1>, vector<16x128xf32>
    %cst_35 = arith.constant dense<0xFF800000> : vector<16xf32>
    %80 = vector.multi_reduction <maximumf>, %79, %cst_35 [1] : vector<16x128xf32> to vector<16xf32>
    %81 = vector.shape_cast %80 : vector<16xf32> to vector<16x1xf32>
    %cst_36 = arith.constant 5.000000e-01 : f32
    %82 = vector.broadcast %cst_36 : f32 to vector<16x128xf32>
    %83 = arith.cmpf ogt, %21, %82 : vector<16x128xf32>
    %84 = vector.broadcast %81 : vector<16x1xf32> to vector<16x128xf32>
    %85 = arith.subf %79, %84 : vector<16x128xf32>
    %86 = math.exp %85 : vector<16x128xf32>
    %cst_37 = arith.constant 0.000000e+00 : f32
    %87 = vector.broadcast %cst_37 : f32 to vector<16x128xf32>
    %88 = arith.select %83, %86, %87 : vector<16x128xi1>, vector<16x128xf32>
    %cst_38 = arith.constant dense<0.000000e+00> : vector<16xf32>
    %89 = vector.multi_reduction <add>, %88, %cst_38 [1] : vector<16x128xf32> to vector<16xf32>
    %90 = vector.shape_cast %89 : vector<16xf32> to vector<16x1xf32>
    %91 = tpu.reciprocal %90 {approx = true} : vector<16x1xf32> -> vector<16x1xf32>
    %92 = vector.broadcast %91 : vector<16x1xf32> to vector<16x128xf32>
    %93 = arith.mulf %88, %92 : vector<16x128xf32>
    %c17_i32 = arith.constant 17 : i32
    %94 = vector.broadcast %c17_i32 : i32 to vector<16x128xi32>
    %95 = arith.cmpi eq, %70, %94 : vector<16x128xi32>
    %96 = vector.shape_cast %66 : vector<16x1xf32> to vector<16x1xf32>
    %97 = vector.broadcast %96 : vector<16x1xf32> to vector<16x128xf32>
    %98 = arith.select %95, %97, %93 : vector<16x128xi1>, vector<16x128xf32>
    %c0_39 = arith.constant 0 : index
    %c0_40 = arith.constant 0 : index
    %99 = vector.load %arg5[%c0_39, %c0_40] : memref<16x128xf32, #tpu.memory_space<vmem>>, vector<16x128xf32>
    tpu.vector_store %arg5[%c0_39, %c0_40], %98 {strides = array<i32>} : memref<16x128xf32, #tpu.memory_space<vmem>>, vector<16x128xf32>,
    return
  }
  func.func @transform_0(%arg0: i32) -> (i32, i32) {
    %c0_i32 = arith.constant 0 : i32
    %c0_i32_0 = arith.constant 0 : i32
    %c0_i32_1 = arith.constant 0 : i32
    return %c0_i32, %c0_i32_0 : i32, i32
  }
  func.func @transform_1(%arg0: i32) -> (i32, i32) {
    %c0_i32 = arith.constant 0 : i32
    %c0_i32_0 = arith.constant 0 : i32
    %c0_i32_1 = arith.constant 0 : i32
    return %c0_i32, %c0_i32_0 : i32, i32
  }
  func.func @transform_2(%arg0: i32) -> (i32, i32) {
    %c0_i32 = arith.constant 0 : i32
    %c0_i32_0 = arith.constant 0 : i32
    %c0_i32_1 = arith.constant 0 : i32
    return %c0_i32, %c0_i32_0 : i32, i32
  }
  func.func @transform_3(%arg0: i32) -> (i32, i32) {
    %c0_i32 = arith.constant 0 : i32
    %c0_i32_0 = arith.constant 0 : i32
    return %arg0, %c0_i32 : i32, i32
  }
  func.func @transform_4(%arg0: i32) -> (i32, i32) {
    %c0_i32 = arith.constant 0 : i32
    %c0_i32_0 = arith.constant 0 : i32
    return %arg0, %c0_i32 : i32, i32
  }
}

</mosaic_0001>

<bundles_post_ra>
// kernel: tpu_custom_call.1
= control target key start
LH: loop header
LB: loop body
LE: loop exit
PB: predicated region body
PF: predicated region fallthrough
CT: control target
= control target key end

     0   :  { %9 = vsyncpa [#allocation3], 0  ;;  %s5770_s0 = inlined_call_operand.hbm [shape: bf16[640,128], index: 0, kind: input, shape index: {}]   ;;  %s5771_s1 = inlined_call_operand.hbm [shape: bf16[16,256], index: 1, kind: input, shape index: {}]   ;;  %s5772_s2 = inlined_call_operand.hbm [shape: f32[8,128], index: 2, kind: input, shape index: {}]   ;;  %s5773_s3 = inlined_call_operand.hbm [shape: bf16[1568,256], index: 3, kind: input, shape index: {}]   ;;  %s5774_s4 = inlined_call_operand.hbm [shape: f32[32,128], index: 4, kind: output, shape index: {}]  }
   0x1   :  { %10 = vsyncpa [#allocation6], 0 }
   0x2   :  { %11 = vsyncpa [#allocation9], 0 }
   0x3   :  { %13 = vsyncpa [#allocation9 + $0x1], 0 }
   0x4   :  { %14 = vsyncpa [#allocation4], 0 }
   0x5   :  { %16 = vsyncpa [#allocation4 + $0x1], 0  ;;  %s5024_s15 = smov 0   ;;  %s5026_s16 = smov 0  }
   0x6   :  { %s5028_s17 = smov 0   ;;  %s5030_s18 = smov 0  }
   0x7 LB: > { %s5045_s19 = sadd.s32 4294967295, %s4983_s18   ;;  %s3415_s20 = sadd.s32 4294967294, %s4983_s18   ;;  %s4983_s18 = sphi %s5030_s18, %s5803_s18   ;;  %s4979_s17 = sphi %s5028_s17, %s5802_s17   ;;  %s4975_s16 = sphi %s5026_s16, %s5801_s16   ;;  %s4971_s15 = sphi %s5024_s15, %s5800_s15  }
   0x8   : > { %p105_p0 = scmp.ne.s32.totalorder %s4975_s16, %s4971_s15  ;;  %p5775_p1 = scmp.eq.s32.totalorder %s5045_s19, 0 }
   0x9   : > { %p135_p3 = scmp.eq.s32.totalorder %s3415_s20, 1  ;;  %p3416_p5 = scmp.ge.s32.totalorder %s4983_s18, 1 }
   0xa   : > { %p5054_p4 = por %p5775_p1, %p105_p0  ;;  %p142_p7 = scmp.lt.s32.totalorder %s4983_s18, 3 }
   0xb   : > { %p5059_p6 = por %p135_p3, %p105_p0  ;;  %s4985_s24 = smov [#allocation5]  }
   0xc   : > { %s5779_s21 = scalar_select %p5054_p4, 1, 0 }
   0xd   : > { %s5780_s22 = scalar_select %p5059_p6, 1, 0 }
   0xe   : > { %p5064_p8 = pnand %p3416_p5, %p142_p7  ;;  %s167_s25 = sshll.u32 %s4985_s24, 4  ;;  %s5068_s25 = int_to_ptr.vmem [resolvable:$true] %s167_s25 }
   0xf   : > { %s4986_s27 = smov [#allocation2]   ;;  %s4795_s5 = scalar_lea.hbm %s5771_s1, 256 }
  0x10   : > { %s5781_s23 = scalar_select %p5064_p8, 1, 0 }
  0x11   : > { %p4525_p9 = pneg %p5064_p8  ;;  %s154_s28 = sshll.u32 %s4986_s27, 4  ;;  %s5079_s28 = int_to_ptr.vmem [resolvable:$true] %s154_s28 }
  0x12   : > { %p4796_p12 = scmp.ne.s32.totalorder %s5771_s1, %s4795_s5  ;;  %p4802_p5 = scmp.lt.u32.totalorder %s4795_s5, %s5771_s1 }
  0x13   : > { %p5075_p11 = pnand %p4525_p9, %p5775_p1 }
  0x15   : > { %p5089_p13 = pneg %p5075_p11 }
  0x17   : > { %p4798_p0 = pnand %p5089_p13, %p4796_p12 }
  0x19   : > { %p4799_p3 = pneg %p4798_p0 }
  0x1b   : > { %p4804_p7 = pnand %p4802_p5, %p4799_p3 }
  0x1d   : > { %4807 = shalt.err (!%p4804_p7)
}
  0x1e   : > { %s4808_s11 = scalar_lea.vmem %s5068_s25, 256  ;;  %p4816_p2 = scmp.lt.s32.totalorder %s5068_s25, %s5068_s25 }
  0x1f   : > { %p4809_p9 = scmp.ne.s32.totalorder %s5068_s25, %s4808_s11  ;;  %p4817_p6 = scmp.lt.s32.totalorder %s4808_s11, %s4808_s11 }
  0x21   : > { %p4811_p10 = pnand %p4809_p9, %p5089_p13  ;;  %p4818_p12 = por %p4817_p6, %p4816_p2 }
  0x23   : > { %p4812_p1 = pneg %p4811_p10 }
  0x25   : > { %p4819_p0 = pnand %p4818_p12, %p4812_p1 }
  0x27   : > { %4822 = shalt.err (!%p4819_p0)
}
  0x28   : > { %s5776_s12 = smov 128   ;;  %s4988_s13 = smov 8  }
  0x29   : > { %4531 = dma.hbm_to_vmem [thread:$0]  (!%p5075_p11), %s5771_s1, 256, %s5068_s25, [#allocation6], %s5776_s12, %s5776_s12, %s4988_s13  }
  0x2a   : > { %s4823_s29 = scalar_lea.hbm %s5770_s0, 5120 }
  0x2b   : > { %p4824_p1 = scmp.ne.s32.totalorder %s5770_s0, %s4823_s29  ;;  %p4830_p10 = scmp.lt.u32.totalorder %s4823_s29, %s5770_s0 }
  0x2d   : > { %p4826_p2 = pnand %p4824_p1, %p5089_p13 }
  0x2f   : > { %p4827_p6 = pneg %p4826_p2 }
  0x31   : > { %p4832_p3 = pnand %p4830_p10, %p4827_p6 }
  0x33   : > { %4835 = shalt.err (!%p4832_p3)
}
  0x34   : > { %s4836_s25 = scalar_lea.vmem %s5079_s28, 5120  ;;  %p4844_p12 = scmp.lt.s32.totalorder %s5079_s28, %s5079_s28 }
  0x35   : > { %p4837_p5 = scmp.ne.s32.totalorder %s5079_s28, %s4836_s25  ;;  %p4845_p0 = scmp.lt.s32.totalorder %s4836_s25, %s4836_s25 }
  0x37   : > { %p4839_p7 = pnand %p4837_p5, %p5089_p13  ;;  %p4846_p1 = por %p4845_p0, %p4844_p12 }
  0x39   : > { %p4840_p9 = pneg %p4839_p7 }
  0x3b   : > { %p4847_p2 = pnand %p4846_p1, %p4840_p9 }
  0x3d   : > { %4850 = shalt.err (!%p4847_p2)
}
  0x3e   : > { %s4989_s9 = smov 64   ;;  %s4990_s10 = smov 4  }
  0x3f   : > { %4528 = dma.hbm_to_vmem [thread:$0]  (!%p5075_p11), %s5770_s0, 5120, %s5079_s28, [#allocation3], %s4989_s9, %s4989_s9, %s4990_s10  }
  0x40   : > { %s4991_s20 = smov [#allocation7]   ;;  %s5137_s27 = sadd.s32 1, %s4983_s18  }
  0x41   : > { %s181_s24 = sshll.u32 %s4991_s20, 4  ;;  %s4851_s5 = scalar_lea.hbm %s5772_s2, 128  ;;  %s182_s24 = int_to_ptr.vmem [resolvable:$true] %s181_s24 }
  0x42   : > { %p4852_p6 = scmp.ne.s32.totalorder %s5772_s2, %s4851_s5  ;;  %p4858_p5 = scmp.lt.u32.totalorder %s4851_s5, %s5772_s2 }
  0x44   : > { %p4854_p10 = pnand %p4852_p6, %p5089_p13 }
  0x46   : > { %p4855_p3 = pneg %p4854_p10 }
  0x48   : > { %p4860_p7 = pnand %p4858_p5, %p4855_p3 }
  0x4a   : > { %4863 = shalt.err (!%p4860_p7)
}
  0x4b   : > { %s4864_s28 = scalar_lea.vmem %s182_s24, 128  ;;  %p4872_p1 = scmp.lt.s32.totalorder %s182_s24, %s182_s24 }
  0x4c   : > { %p4865_p9 = scmp.ne.s32.totalorder %s182_s24, %s4864_s28  ;;  %p4873_p2 = scmp.lt.s32.totalorder %s4864_s28, %s4864_s28 }
  0x4e   : > { %p4867_p12 = pnand %p4865_p9, %p5089_p13  ;;  %p4874_p4 = por %p4873_p2, %p4872_p1 }
  0x50   : > { %p4868_p0 = pneg %p4867_p12 }
  0x52   : > { %p4875_p8 = pnand %p4874_p4, %p4868_p0 }
  0x54   : > { %4878 = shalt.err (!%p4875_p8)
}
  0x55   : > { %4534 = dma.hbm_to_vmem [thread:$0]  (!%p5075_p11), %s5772_s2, 128, %s182_s24, [#allocation6]  }
  0x56   : > { %s89_s8 = ssub.s32 %s4983_s18, %s5137_s27  ;;  %s92_s12 = sadd.s32 1, %s4979_s17 }
  0x57   : > { %p90_p4 = scmp.eq.s32.totalorder %s89_s8, 0  ;;  %p99_p8 = scmp.ne.s32.totalorder %s4979_s17, %s4975_s16 }
  0x58   : > { %p100_p13 = scmp.eq.s32.totalorder %s4983_s18, 0  ;;  %p4546_p6 = scmp.lt.s32.totalorder %s4983_s18, 2 }
  0x59   : > { %s5165_s26 = scalar_select %p90_p4, %s4979_s17, %s92_s12  }
  0x5a   : > { %p101_p10 = por %p100_p13, %p99_p8  ;;  %p5784_p3 = scmp.eq.s32.totalorder %s5045_s19, 1 }
  0x5b   : > { %s192_s14 = sand.u32 1, %s4979_s17   ;;  %s3556_s20 = smul.u32 12544, %s4983_s18 }
  0x5c   : > { %p5169_p5 = por %p5784_p3, %p99_p8  ;;  %s4505_s29 = smul.u32 784, %s192_s14 }
  0x5d   : > { %p5175_p7 = pnand %p4546_p6, %p101_p10  ;;  %s5182_s6 = scalar_lea.hbm %s5773_s3, %s3556_s20 }
  0x5e   : > { %s196_s7 = scalar_lea.vmem [#allocation8], %s4505_s29  ;;  %s5186_s28 = scalar_lea.sflag [#allocation9], %s192_s14 }
  0x5f   : > { %s204_s25 = sshll.u32 %s196_s7, 4  ;;  %s4879_s9 = scalar_lea.hbm %s5182_s6, 12544  ;;  %s5184_s25 = int_to_ptr.vmem [resolvable:$true] %s204_s25 }
  0x60   : > { %p4880_p11 = scmp.ne.s32.totalorder %s5182_s6, %s4879_s9  ;;  %p4881_p9 = pneg %p5175_p7 }
  0x61   : > { %s4884_s12 = scalar_lea.hbm %s5773_s3, 25088  ;;  %p4885_p1 = scmp.lt.u32.totalorder %s5182_s6, %s5773_s3 }
  0x62   : > { %p4882_p12 = pnand %p4881_p9, %p4880_p11  ;;  %p4886_p2 = scmp.lt.u32.totalorder %s4884_s12, %s4879_s9 }
  0x63   : > { %p4888_p8 = scmp.lt.u32.totalorder %s4879_s9, %s5182_s6 }
  0x64   : > { %p4883_p0 = pneg %p4882_p12  ;;  %p4887_p4 = por %p4886_p2, %p4885_p1 }
  0x66   : > { %p4889_p13 = por %p4888_p8, %p4887_p4 }
  0x68   : > { %p4890_p6 = pnand %p4889_p13, %p4883_p0 }
  0x6a   : > { %4893 = shalt.err (!%p4890_p6)
}
  0x6b   : > { %s4894_s14 = scalar_lea.vmem %s5184_s25, 12544  ;;  %s4992_s29 = smov [#allocation8]  }
  0x6c   : > { %p4895_p10 = scmp.ne.s32.totalorder %s5184_s25, %s4894_s14  ;;  %s4899_s5 = sshll.u32 %s4992_s29, 4  ;;  %s4900_s5 = int_to_ptr.vmem [resolvable:$false] %s4899_s5 }
  0x6d   : > { %s4901_s7 = scalar_lea.vmem %s4900_s5, 25088  ;;  %p4902_p12 = scmp.lt.s32.totalorder %s5184_s25, %s4900_s5 }
  0x6e   : > { %p4897_p3 = pnand %p4895_p10, %p4881_p9  ;;  %p4903_p1 = scmp.lt.s32.totalorder %s4901_s7, %s4894_s14 }
  0x70   : > { %p4898_p11 = pneg %p4897_p3  ;;  %p4904_p2 = por %p4903_p1, %p4902_p12 }
  0x72   : > { %p4905_p4 = pnand %p4904_p2, %p4898_p11 }
  0x74   : > { %4908 = shalt.err (!%p4905_p4)
}
  0x75   : > { %s5787_s9 = smov 128   ;;  %p5788_p9 = scmp.ne.s32.totalorder %s5781_s23, 0 }
  0x76   : > { %4538 = dma.hbm_to_vmem [thread:$0]  (!%p5175_p7), %s5182_s6, 12544, %s5184_s25, %s5186_s28, %s5787_s9, %s5787_s9, %s4988_s13  }
  0x77   : > { %216 = sbr.rel (%p5788_p9) target bundleno = 3406 (0xd4e), region = 36  ;;  %p5789_p0 = scmp.eq.s32.totalorder (!%p5788_p9), %s5045_s19, 0 }
  0x7e   : > { %4954 = dma.done.wait (%p5789_p0), [#allocation3], 5120   ;;  %p5790_p8 = pmov %p5789_p0 }
  0x7f   : > { %p5791_p13 = pmov %p5789_p0 }
  0x80   : > { %4956 = vsyncadd (%p5790_p8), [#allocation3], 4294962176 }
  0x81   : > { %4958 = dma.done.wait (%p5791_p13), [#allocation6], 384   ;;  %p5792_p6 = pmov %p5789_p0 }
  0x82   : > { %s5228_s30 = sand.u32 1, %s4975_s16   ;;  %p5793_p7 = scmp.ne.s32.totalorder %s5779_s21, 0 }
  0x83   : > { %4960 = vsyncadd (%p5792_p6), [#allocation6], 4294966912  ;;  %s4506_s23 = smul.u32 784, %s5228_s30  ;;  %s231_s13 = scalar_lea.sflag [#allocation9], %s5228_s30 }
  0x85   : > { %s5232_s6 = scalar_lea.vmem [#allocation8], %s4506_s23 }
  0x86   : > { %4962 = dma.done.wait (%p5793_p7), %s231_s13, 12544  }
  0x87   : > { %4964 = vsyncadd (%p5793_p7), %s231_s13, 4294954752  ;;  %v4601_v0 = vld [vmem:[#allocation2] sm:$0xff]   ;;  %v4602_v1 = vld [vmem:[#allocation2 + $0x8] sm:$0xff]   ;;  %s3427_s25 = sshll.u32 %s5228_s30, 4  ;;  %s3555_s8 = sshll.u32 %s5045_s19, 8 }
  0x88   : > { %4201 = vmatprep.subr.bf16.mxu0 %v4601_v0  ;;  %v4603_v2 = vld [vmem:[#allocation2 + $0x10] sm:$0xff]   ;;  %v4604_v3 = vld [vmem:[#allocation2 + $0x18] sm:$0xff]   ;;  %v4605_v5 = vld [vmem:[#allocation2 + $0x20] sm:$0xff]   ;;  %s258_s28 = scalar_lea.vmem [#allocation10], %s3427_s25  ;;  %s5726_s24 = scalar_lea.hbm %s5774_s4, %s3555_s8 }
  0x89   : > { %4202 = vmatpush3.bf16.msra.mxu0 %v4601_v0  ;;  %v4609_v4 = vld [vmem:[%s5232_s6 + $0x200] ss:$8 sps:$4 sm:$0xff]   ;;  %v4610_v9 = vld [vmem:[%s5232_s6 + $0x210] ss:$8 sps:$4 sm:$0xff]   ;;  %v5255_v24 = vld [vmem:[%s5232_s6 + $0x4] ss:$8 sps:$4 sm:$0xff]  }
  0x8a   : > { %4203 = vmatprep.subr.bf16.mxu0 %v4602_v1  ;;  %4217 = vmatprep.mubr.bf16.mxu0 %v4609_v4  ;;  %v4606_v6 = vld [vmem:[#allocation2 + $0x28] sm:$0xff]   ;;  %v4607_v7 = vld [vmem:[#allocation2 + $0x30] sm:$0xff]   ;;  %v4608_v8 = vld [vmem:[#allocation2 + $0x38] sm:$0xff]   ;;  %s3311_s10 = sshll.u32 %s258_s28, 4  ;;  %s3298_s14 = scalar_lea.sflag [#allocation4], %s5228_s30  ;;  %s5721_s10 = int_to_ptr.vmem [resolvable:$true] %s3311_s10 }
  0x8b   : > { %v4611_v10 = vld [vmem:[%s5232_s6 + $0x220] ss:$8 sps:$4 sm:$0xff]   ;;  %v4612_v11 = vld [vmem:[%s5232_s6 + $0x230] ss:$8 sps:$4 sm:$0xff]   ;;  %1030 = vmatprep.mubr.bf16.mxu1 %v5255_v24  ;;  %s4909_s29 = scalar_lea.vmem %s5721_s10, 256  ;;  %s4996_s19 = smov [#allocation10]  }
  0x8c   : > { %v4613_v12 = vld [vmem:[%s5232_s6 + $0x240] ss:$8 sps:$4 sm:$0xff]   ;;  %v4614_v13 = vld [vmem:[%s5232_s6 + $0x250] ss:$8 sps:$4 sm:$0xff]   ;;  %p4910_p10 = scmp.ne.s32.totalorder %s5721_s10, %s4909_s29  ;;  %s4913_s5 = sshll.u32 %s4996_s19, 4  ;;  %s4914_s5 = int_to_ptr.vmem [resolvable:$false] %s4913_s5 }
  0x8d   : > { %4204 = vmatpush3.bf16.msra.mxu0 %v4602_v1  ;;  %v4615_v14 = vld [vmem:[%s5232_s6 + $0x260] ss:$8 sps:$4 sm:$0xff]   ;;  %v4616_v15 = vld [vmem:[%s5232_s6 + $0x270] ss:$8 sps:$4 sm:$0xff]   ;;  %s4915_s7 = scalar_lea.vmem %s4914_s5, 512  ;;  %p4916_p12 = scmp.lt.s32.totalorder %s5721_s10, %s4914_s5 }
  0x8e   : > { %4205 = vmatprep.subr.bf16.mxu0 %v4603_v2  ;;  %v4617_v16 = vld [vmem:[%s5232_s6 + $0x280] ss:$8 sps:$4 sm:$0xff]   ;;  %v4618_v17 = vld [vmem:[%s5232_s6 + $0x290] ss:$8 sps:$4 sm:$0xff]   ;;  %p4911_p3 = pnand %p4910_p10, %p5169_p5  ;;  %p4917_p1 = scmp.lt.s32.totalorder %s4915_s7, %s4909_s29 }
  0x8f   : > { %v4619_v18 = vld [vmem:[%s5232_s6 + $0x2a0] ss:$8 sps:$4 sm:$0xff]   ;;  %v4620_v19 = vld [vmem:[%s5232_s6 + $0x2b0] ss:$8 sps:$4 sm:$0xff]  }
  0x90   : > { %v4621_v20 = vld [vmem:[%s5232_s6 + $0x2c0] ss:$8 sps:$4 sm:$0xff]   ;;  %v4622_v21 = vld [vmem:[%s5232_s6 + $0x2d0] ss:$8 sps:$4 sm:$0xff]   ;;  %p4912_p11 = pneg %p4911_p3  ;;  %p4918_p2 = por %p4917_p1, %p4916_p12 }
  0x91   : > { %4206 = vmatpush3.bf16.msra.mxu0 %v4603_v2  ;;  %v4623_v22 = vld [vmem:[%s5232_s6 + $0x2e0] ss:$8 sps:$4 sm:$0xff]   ;;  %v4624_v23 = vld [vmem:[%s5232_s6 + $0x2f0] ss:$8 sps:$4 sm:$0xff]  }
  0x92   : > { %4207 = vmatprep.subr.bf16.mxu0 %v4604_v3  ;;  %p4919_p4 = pnand %p4918_p2, %p4912_p11 }
  0x95   : > { %4208 = vmatpush3.bf16.msra.mxu0 %v4604_v3 }
  0x96   : > { %4209 = vmatprep.subr.bf16.mxu0 %v4605_v5 }
  0x99   : > { %4210 = vmatpush3.bf16.msra.mxu0 %v4605_v5 }
  0x9a   : > { %4211 = vmatprep.subr.bf16.mxu0 %v4606_v6 }
  0x9d   : > { %4212 = vmatpush3.bf16.msra.mxu0 %v4606_v6 }
  0x9e   : > { %4213 = vmatprep.subr.bf16.mxu0 %v4607_v7 }
  0xa1   : > { %4214 = vmatpush3.bf16.msra.mxu0 %v4607_v7 }
  0xa2   : > { %4215 = vmatprep.subr.bf16.mxu0 %v4608_v8 }
  0xa5   : > { %4216 = vmatpush3.bf16.msra.mxu0 %v4608_v8 }
  0xa8   : > { %4218 = vmatmul.mubr.bf16.vlgmr.msra.gmra.mrb[0].mxu0 %v4610_v9  ;;  %v4673_v9 = vld [vmem:[#allocation2 + $0x40] sm:$0xff]  }
  0xa9   : > { %4221 = vmatprep.mubr.bf16.mxu0 %v4611_v10  ;;  %v4674_v10 = vld [vmem:[#allocation2 + $0x48] sm:$0xff]   ;;  %4249 = vmatprep.subr.bf16.mxu0 %v4673_v9 }
  0xaa   : > { %4250 = vmatpush3.bf16.msra.mxu0 %v4673_v9 }
  0xab   : > { %4251 = vmatprep.subr.bf16.mxu0 %v4674_v10 }
  0xae   : > { %4252 = vmatpush3.bf16.msra.mxu0 %v4674_v10 }
  0xb0   : > { %4222 = vmatmul.mubr.bf16.gmra.mrb[4].mxu0 %v4612_v11  ;;  %v5259_v11 = vld [vmem:[%s5232_s6] ss:$8 sps:$4 sm:$0xff]  }
  0xb1   : > { %4225 = vmatprep.mubr.bf16.mxu0 %v4613_v12  ;;  %v4675_v12 = vld [vmem:[#allocation2 + $0x50] sm:$0xff]  }
  0xb2   : > { %4253 = vmatprep.subr.bf16.mxu0 %v4675_v12 }
  0xb3   : > { %4254 = vmatpush3.bf16.msra.mxu0 %v4675_v12 }
  0xb8   : > { %4226 = vmatmul.mubr.bf16.gmra.mrb[8].mxu0 %v4614_v13  ;;  %v5262_v13 = vld [vmem:[%s5232_s6 + $0x14] ss:$8 sps:$4 sm:$0xff]  }
  0xb9   : > { %4229 = vmatprep.mubr.bf16.mxu0 %v4615_v14  ;;  %v5267_v14 = vld [vmem:[%s5232_s6 + $0x10] ss:$8 sps:$4 sm:$0xff]  }
  0xc0   : > { %4230 = vmatmul.mubr.bf16.gmra.mrb[12].mxu0 %v4616_v15  ;;  %v5270_v15 = vld [vmem:[%s5232_s6 + $0x24] ss:$8 sps:$4 sm:$0xff]  }
  0xc1   : > { %4233 = vmatprep.mubr.bf16.mxu0 %v4617_v16  ;;  %v5275_v16 = vld [vmem:[%s5232_s6 + $0x20] ss:$8 sps:$4 sm:$0xff]  }
  0xc8   : > { %4234 = vmatmul.mubr.bf16.gmra.mrb[16].mxu0 %v4618_v17  ;;  %v5278_v17 = vld [vmem:[%s5232_s6 + $0x34] ss:$8 sps:$4 sm:$0xff]  }
  0xc9   : > { %4237 = vmatprep.mubr.bf16.mxu0 %v4619_v18  ;;  %v5283_v18 = vld [vmem:[%s5232_s6 + $0x30] ss:$8 sps:$4 sm:$0xff]  }
  0xd0   : > { %4238 = vmatmul.mubr.bf16.gmra.mrb[20].mxu0 %v4620_v19  ;;  %v5286_v19 = vld [vmem:[%s5232_s6 + $0x44] ss:$8 sps:$4 sm:$0xff]  }
  0xd1   : > { %4241 = vmatprep.mubr.bf16.mxu0 %v4621_v20  ;;  %v5291_v20 = vld [vmem:[%s5232_s6 + $0x40] ss:$8 sps:$4 sm:$0xff]  }
  0xd8   : > { %4242 = vmatmul.mubr.bf16.gmra.mrb[24].mxu0 %v4622_v21  ;;  %v5294_v21 = vld [vmem:[%s5232_s6 + $0x54] ss:$8 sps:$4 sm:$0xff]  }
  0xd9   : > { %4245 = vmatprep.mubr.bf16.mxu0 %v4623_v22  ;;  %v5299_v22 = vld [vmem:[%s5232_s6 + $0x50] ss:$8 sps:$4 sm:$0xff]  }
  0xe0   : > { %4246 = vmatmul.mubr.bf16.gmra.mrb[28].mxu0 %v4624_v23  ;;  %v5302_v23 = vld [vmem:[%s5232_s6 + $0x64] ss:$8 sps:$4 sm:$0xff]  }
 0x17b   : > { %v4219_v25 = vpop.f32.mrb[0].mxu0 }
 0x17c   : > { %v691_v26 = vpop.f32.mrb[1].mxu0 }
 0x17d   : > { %v4220_v27 = vpop.f32.mrb[2].mxu0 }
 0x17e   : > { %v819_v28 = vpack.c.bf16 %v4220_v27, %v4219_v25  ;;  %v694_v29 = vpop.f32.mrb[3].mxu0  ;;  %v5307_v25 = vld [vmem:[%s5232_s6 + $0x60] ss:$8 sps:$4 sm:$0xff]   ;;  %v5315_v27 = vld [vmem:[%s5232_s6 + $0x70] ss:$8 sps:$4 sm:$0xff]  }
 0x17f   : > { %v818_v30 = vpack.c.bf16 %v694_v29, %v691_v26  ;;  %v5310_v26 = vld [vmem:[%s5232_s6 + $0x74] ss:$8 sps:$4 sm:$0xff]   ;;  %v5323_v29 = vld [vmem:[%s5232_s6 + $0x80] ss:$8 sps:$4 sm:$0xff]  }
 0x183   : > { %v4223_v31 = vpop.f32.mrb[4].mxu0 }
 0x184   : > { %v707_v32 = vpop.f32.mrb[5].mxu0 }
 0x185   : > { %v4224_v33 = vpop.f32.mrb[6].mxu0 }
 0x186   : > { %v821_v34 = vpack.c.bf16 %v4224_v33, %v4223_v31  ;;  %v710_v35 = vpop.f32.mrb[7].mxu0  ;;  %v5331_v31 = vld [vmem:[%s5232_s6 + $0x90] ss:$8 sps:$4 sm:$0xff]   ;;  %v5339_v33 = vld [vmem:[%s5232_s6 + $0xa0] ss:$8 sps:$4 sm:$0xff]  }
 0x187   : > { %v820_v36 = vpack.c.bf16 %v710_v35, %v707_v32  ;;  %v5334_v32 = vld [vmem:[%s5232_s6 + $0xa4] ss:$8 sps:$4 sm:$0xff]  }
 0x188   : > { %v4676_v35 = vld [vmem:[#allocation2 + $0x58] sm:$0xff]  }
 0x189   : > { %4255 = vmatprep.subr.bf16.mxu0 %v4676_v35 }
 0x18a   : > { %4256 = vmatpush3.bf16.msra.mxu0 %v4676_v35 }
 0x18b   : > { %v4227_v37 = vpop.f32.mrb[8].mxu0 }
 0x18c   : > { %v723_v38 = vpop.f32.mrb[9].mxu0 }
 0x18d   : > { %v4228_v39 = vpop.f32.mrb[10].mxu0 }
 0x18e   : > { %v823_v40 = vpack.c.bf16 %v4228_v39, %v4227_v37  ;;  %v726_v41 = vpop.f32.mrb[11].mxu0  ;;  %v5350_v37 = vld [vmem:[%s5232_s6 + $0xc4] ss:$8 sps:$4 sm:$0xff]  }
 0x18f   : > { %v822_v42 = vpack.c.bf16 %v726_v41, %v723_v38  ;;  %v4677_v38 = vld [vmem:[#allocation2 + $0x60] sm:$0xff]   ;;  %v4678_v39 = vld [vmem:[#allocation2 + $0x68] sm:$0xff]  }
 0x190   : > { %4257 = vmatprep.subr.bf16.mxu0 %v4677_v38  ;;  %v5358_v41 = vld [vmem:[%s5232_s6 + $0xd4] ss:$8 sps:$4 sm:$0xff]  }
 0x191   : > { %4258 = vmatpush3.bf16.msra.mxu0 %v4677_v38 }
 0x192   : > { %4259 = vmatprep.subr.bf16.mxu0 %v4678_v39 }
 0x193   : > { %v4231_v43 = vpop.f32.mrb[12].mxu0 }
 0x194   : > { %v739_v44 = vpop.f32.mrb[13].mxu0 }
 0x195   : > { %v4232_v45 = vpop.f32.mrb[14].mxu0  ;;  %4260 = vmatpush3.bf16.msra.mxu0 %v4678_v39 }
 0x196   : > { %v825_v46 = vpack.c.bf16 %v4232_v45, %v4231_v43  ;;  %v742_v47 = vpop.f32.mrb[15].mxu0  ;;  %v4680_v43 = vld [vmem:[#allocation2 + $0x78] sm:$0xff]  }
 0x197   : > { %v824_v48 = vpack.c.bf16 %v742_v47, %v739_v44  ;;  %v5363_v44 = vld [vmem:[%s5232_s6 + $0xd0] ss:$8 sps:$4 sm:$0xff]   ;;  %v5366_v45 = vld [vmem:[%s5232_s6 + $0xe4] ss:$8 sps:$4 sm:$0xff]   ;;  %v5374_v47 = vld [vmem:[%s5232_s6 + $0xf4] ss:$8 sps:$4 sm:$0xff]  }
 0x19b   : > { %v4235_v49 = vpop.f32.mrb[16].mxu0 }
 0x19c   : > { %v755_v50 = vpop.f32.mrb[17].mxu0 }
 0x19d   : > { %v4236_v51 = vpop.f32.mrb[18].mxu0 }
 0x19e   : > { %v827_v52 = vpack.c.bf16 %v4236_v51, %v4235_v49  ;;  %v758_v53 = vpop.f32.mrb[19].mxu0  ;;  %v834_v49 = vlaneseq }
 0x19f   : > { %v826_v54 = vpack.c.bf16 %v758_v53, %v755_v50 }
 0x1a0   : > { %v5383_v50 = vshrl.u32 %v834_v49, 7 }
 0x1a1   : > { %3581 = vmatprep.subr.bf16.mxu1 %v826_v54 }
 0x1a2   : > { %3582 = vmatpush3.bf16.msra.mxu1 %v818_v30  ;;  %v5326_v30 = vld [vmem:[%s5232_s6 + $0x94] ss:$8 sps:$4 sm:$0xff]   ;;  %v836_v51 = vsub.s32 0, %v5383_v50 }
 0x1a3   : > { %v4239_v55 = vpop.f32.mrb[20].mxu0  ;;  %3583 = vmatprep.subr.bf16.mxu1 %v827_v52  ;;  %v5386_v52 = vld [vmem:[#allocation7] sm:$0xff] }
 0x1a4   : > { %v771_v56 = vpop.f32.mrb[21].mxu0  ;;  %v5389_v54 = vrot.slane %v5386_v52, %v836_v51 }
 0x1a5   : > { %v4240_v57 = vpop.f32.mrb[22].mxu0 }
 0x1a6   : > { %v829_v58 = vpack.c.bf16 %v4240_v57, %v4239_v55  ;;  %v774_v59 = vpop.f32.mrb[23].mxu0  ;;  %3584 = vmatpush3.bf16.msra.mxu1 %v819_v28  ;;  %v5318_v28 = vld [vmem:[%s5232_s6 + $0x84] ss:$8 sps:$4 sm:$0xff]  }
 0x1a7   : > { %v828_v60 = vpack.c.bf16 %v774_v59, %v771_v56 }
 0x1a9   : > { %3585 = vmatprep.subr.bf16.mxu1 %v828_v60 }
 0x1aa   : > { %3586 = vmatpush3.bf16.msra.mxu1 %v820_v36  ;;  %v5347_v36 = vld [vmem:[%s5232_s6 + $0xb0] ss:$8 sps:$4 sm:$0xff]  }
 0x1ab   : > { %v4243_v61 = vpop.f32.mrb[24].mxu0  ;;  %3587 = vmatprep.subr.bf16.mxu1 %v829_v58 }
 0x1ac   : > { %v787_v62 = vpop.f32.mrb[25].mxu0 }
 0x1ad   : > { %v4244_v63 = vpop.f32.mrb[26].mxu0 }
 0x1ae   : > { %v831_v0 = vpack.c.bf16 %v4244_v63, %v4243_v61  ;;  %v790_v1 = vpop.f32.mrb[27].mxu0  ;;  %3588 = vmatpush3.bf16.msra.mxu1 %v821_v34  ;;  %v5342_v34 = vld [vmem:[%s5232_s6 + $0xb4] ss:$8 sps:$4 sm:$0xff]  }
 0x1af   : > { %v830_v2 = vpack.c.bf16 %v790_v1, %v787_v62 }
 0x1b1   : > { %3589 = vmatprep.subr.bf16.mxu1 %v830_v2 }
 0x1b2   : > { %3590 = vmatpush3.bf16.msra.mxu1 %v822_v42  ;;  %v4679_v42 = vld [vmem:[#allocation2 + $0x70] sm:$0xff]  }
 0x1b3   : > { %v4247_v3 = vpop.f32.mrb[28].mxu0  ;;  %3591 = vmatprep.subr.bf16.mxu1 %v831_v0  ;;  %4261 = vmatprep.subr.bf16.mxu0 %v4679_v42 }
 0x1b4   : > { %v803_v4 = vpop.f32.mrb[29].mxu0  ;;  %4262 = vmatpush3.bf16.msra.mxu0 %v4679_v42 }
 0x1b5   : > { %v4248_v5 = vpop.f32.mrb[30].mxu0  ;;  %4263 = vmatprep.subr.bf16.mxu0 %v4680_v43 }
 0x1b6   : > { %v833_v6 = vpack.c.bf16 %v4248_v5, %v4247_v3  ;;  %v806_v7 = vpop.f32.mrb[31].mxu0  ;;  %3592 = vmatpush3.bf16.msra.mxu1 %v823_v40  ;;  %v5355_v40 = vld [vmem:[%s5232_s6 + $0xc0] ss:$8 sps:$4 sm:$0xff]  }
 0x1b7   : > { %v832_v8 = vpack.c.bf16 %v806_v7, %v803_v4 }
 0x1b8   : > { %4264 = vmatpush3.bf16.msra.mxu0 %v4680_v43 }
 0x1b9   : > { %3593 = vmatprep.subr.bf16.mxu1 %v832_v8 }
 0x1ba   : > { %3594 = vmatpush3.bf16.msra.mxu1 %v824_v48  ;;  %v5379_v48 = vld [vmem:[%s5232_s6 + $0xf0] ss:$8 sps:$4 sm:$0xff]  }
 0x1bb   : > { %3595 = vmatprep.subr.bf16.mxu1 %v833_v6 }
 0x1be   : > { %3596 = vmatpush3.bf16.msra.mxu1 %v825_v46  ;;  %v5371_v46 = vld [vmem:[%s5232_s6 + $0xe0] ss:$8 sps:$4 sm:$0xff]  }
 0x1c1   : > { %1031 = vmatmul.mubr.bf16.vlgmr.msra.gmra.mrb[0].mxu1 %v5259_v11 }
 0x1c2   : > { %1038 = vmatprep.mubr.bf16.mxu1 %v5262_v13 }
 0x1c9   : > { %1039 = vmatmul.mubr.bf16.gmra.mrb[4].mxu1 %v5267_v14 }
 0x1ca   : > { %1046 = vmatprep.mubr.bf16.mxu1 %v5270_v15 }
 0x1d1   : > { %1047 = vmatmul.mubr.bf16.gmra.mrb[8].mxu1 %v5275_v16 }
 0x1d2   : > { %1054 = vmatprep.mubr.bf16.mxu1 %v5278_v17 }
 0x1d9   : > { %1055 = vmatmul.mubr.bf16.gmra.mrb[12].mxu1 %v5283_v18 }
 0x1da   : > { %1062 = vmatprep.mubr.bf16.mxu1 %v5286_v19 }
 0x1e1   : > { %1063 = vmatmul.mubr.bf16.gmra.mrb[16].mxu1 %v5291_v20 }
 0x1e2   : > { %1070 = vmatprep.mubr.bf16.mxu1 %v5294_v21 }
 0x1e9   : > { %1071 = vmatmul.mubr.bf16.gmra.mrb[20].mxu1 %v5299_v22 }
 0x1ea   : > { %1078 = vmatprep.mubr.bf16.mxu1 %v5302_v23 }
 0x1f1   : > { %1079 = vmatmul.mubr.bf16.gmra.mrb[24].mxu1 %v5307_v25 }
 0x1f2   : > { %1086 = vmatprep.mubr.bf16.mxu1 %v5310_v26 }
 0x1f9   : > { %1087 = vmatmul.mubr.bf16.gmra.mrb[28].mxu1 %v5315_v27 }
 0x1fa   : > { %1094 = vmatprep.mubr.bf16.mxu1 %v5318_v28 }
 0x201   : > { %1095 = vmatmul.mubr.bf16.gmra.mrb[32].mxu1 %v5323_v29 }
 0x202   : > { %1102 = vmatprep.mubr.bf16.mxu1 %v5326_v30 }
 0x209   : > { %1103 = vmatmul.mubr.bf16.gmra.mrb[36].mxu1 %v5331_v31 }
 0x20a   : > { %1110 = vmatprep.mubr.bf16.mxu1 %v5334_v32 }
 0x211   : > { %1111 = vmatmul.mubr.bf16.gmra.mrb[40].mxu1 %v5339_v33 }
 0x212   : > { %1118 = vmatprep.mubr.bf16.mxu1 %v5342_v34 }
 0x219   : > { %1119 = vmatmul.mubr.bf16.gmra.mrb[44].mxu1 %v5347_v36 }
 0x21a   : > { %1126 = vmatprep.mubr.bf16.mxu1 %v5350_v37 }
 0x221   : > { %1127 = vmatmul.mubr.bf16.gmra.mrb[48].mxu1 %v5355_v40 }
 0x222   : > { %1134 = vmatprep.mubr.bf16.mxu1 %v5358_v41 }
 0x229   : > { %1135 = vmatmul.mubr.bf16.gmra.mrb[52].mxu1 %v5363_v44 }
 0x22a   : > { %1142 = vmatprep.mubr.bf16.mxu1 %v5366_v45 }
 0x231   : > { %1143 = vmatmul.mubr.bf16.gmra.mrb[56].mxu1 %v5371_v46 }
 0x232   : > { %1150 = vmatprep.mubr.bf16.mxu1 %v5374_v47 }
 0x239   : > { %1151 = vmatmul.mubr.bf16.gmra.mrb[60].mxu1 %v5379_v48 }
 0x294   : > { %v3597_v53 = vpop.f32.mrb[0].mxu1 }
 0x295   : > { %v3598_v55 = vpop.f32.mrb[1].mxu1 }
 0x296   : > { %v3599_v56 = vadd.f32 %v3598_v55, %v3597_v53  ;;  %v3600_v57 = vpop.f32.mrb[2].mxu1 }
 0x297   : > { %v3601_v58 = vpop.f32.mrb[3].mxu1 }
 0x298   : > { %v1033_v59 = vadd.f32 %v3599_v56, %v5389_v54  ;;  %v3602_v60 = vadd.f32 %v3601_v58, %v3600_v57 }
 0x29a   : > { %v1036_v61 = vadd.f32 %v3602_v60, %v5389_v54  ;;  %v1159_v62 = vmax.f32 %v1033_v59, 0.0 }
 0x29c   : > { %v1160_v63 = vmax.f32 %v1036_v61, 0.0  ;;  %v3603_v0 = vpop.f32.mrb[4].mxu1 }
 0x29d   : > { %v3604_v1 = vpop.f32.mrb[5].mxu1 }
 0x29e   : > { %v3605_v2 = vadd.f32 %v3604_v1, %v3603_v0  ;;  %v3606_v3 = vpop.f32.mrb[6].mxu1  ;;  %v1191_v4 = vpack.c.bf16 %v1160_v63, %v1159_v62 }
 0x29f   : > { %v3607_v5 = vpop.f32.mrb[7].mxu1 }
 0x2a0   : > { %v1041_v6 = vadd.f32 %v3605_v2, %v5389_v54  ;;  %v3608_v7 = vadd.f32 %v3607_v5, %v3606_v3  ;;  %4265 = vmatprep.mubr.bf16.mxu0 %v1191_v4 }
 0x2a2   : > { %v1044_v8 = vadd.f32 %v3608_v7, %v5389_v54  ;;  %v1161_v9 = vmax.f32 %v1041_v6, 0.0 }
 0x2a4   : > { %v1162_v10 = vmax.f32 %v1044_v8, 0.0  ;;  %v3609_v12 = vpop.f32.mrb[8].mxu1 }
 0x2a5   : > { %v3610_v35 = vpop.f32.mrb[9].mxu1 }
 0x2a6   : > { %v1192_v38 = vpack.c.bf16 %v1162_v10, %v1161_v9  ;;  %v3611_v39 = vadd.f32 %v3610_v35, %v3609_v12  ;;  %v3612_v42 = vpop.f32.mrb[10].mxu1 }
 0x2a7   : > { %v3613_v43 = vpop.f32.mrb[11].mxu1 }
 0x2a8   : > { %v1049_v51 = vadd.f32 %v3611_v39, %v5389_v54  ;;  %v3614_v53 = vadd.f32 %v3613_v43, %v3612_v42  ;;  %4266 = vmatmul.mubr.bf16.vlgmr.msra.gmra.mrb[32].mxu0 %v1192_v38 }
 0x2aa   : > { %v1052_v55 = vadd.f32 %v3614_v53, %v5389_v54  ;;  %v1163_v56 = vmax.f32 %v1049_v51, 0.0 }
 0x2ac   : > { %v1164_v57 = vmax.f32 %v1052_v55, 0.0  ;;  %v3615_v58 = vpop.f32.mrb[12].mxu1 }
 0x2ad   : > { %v3616_v59 = vpop.f32.mrb[13].mxu1 }
 0x2ae   : > { %v3617_v60 = vadd.f32 %v3616_v59, %v3615_v58  ;;  %v3618_v61 = vpop.f32.mrb[14].mxu1  ;;  %v1193_v62 = vpack.c.bf16 %v1164_v57, %v1163_v56 }
 0x2af   : > { %v3619_v63 = vpop.f32.mrb[15].mxu1 }
 0x2b0   : > { %v1057_v0 = vadd.f32 %v3617_v60, %v5389_v54  ;;  %v3620_v1 = vadd.f32 %v3619_v63, %v3618_v61  ;;  %4269 = vmatprep.mubr.bf16.mxu0 %v1193_v62 }
 0x2b2   : > { %v1060_v2 = vadd.f32 %v3620_v1, %v5389_v54  ;;  %v1165_v3 = vmax.f32 %v1057_v0, 0.0 }
 0x2b4   : > { %v1166_v4 = vmax.f32 %v1060_v2, 0.0  ;;  %v3621_v5 = vpop.f32.mrb[16].mxu1 }
 0x2b5   : > { %v3622_v6 = vpop.f32.mrb[17].mxu1 }
 0x2b6   : > { %v3623_v7 = vadd.f32 %v3622_v6, %v3621_v5  ;;  %v3624_v8 = vpop.f32.mrb[18].mxu1  ;;  %v1194_v9 = vpack.c.bf16 %v1166_v4, %v1165_v3 }
 0x2b7   : > { %v3625_v10 = vpop.f32.mrb[19].mxu1 }
 0x2b8   : > { %v1065_v12 = vadd.f32 %v3623_v7, %v5389_v54  ;;  %v3626_v35 = vadd.f32 %v3625_v10, %v3624_v8  ;;  %4270 = vmatmul.mubr.bf16.gmra.mrb[36].mxu0 %v1194_v9 }
 0x2ba   : > { %v1068_v38 = vadd.f32 %v3626_v35, %v5389_v54  ;;  %v1167_v39 = vmax.f32 %v1065_v12, 0.0 }
 0x2bc   : > { %v1168_v42 = vmax.f32 %v1068_v38, 0.0  ;;  %v3627_v43 = vpop.f32.mrb[20].mxu1 }
 0x2bd   : > { %v3628_v51 = vpop.f32.mrb[21].mxu1 }
 0x2be   : > { %v3629_v53 = vadd.f32 %v3628_v51, %v3627_v43  ;;  %v3630_v55 = vpop.f32.mrb[22].mxu1  ;;  %v1195_v56 = vpack.c.bf16 %v1168_v42, %v1167_v39 }
 0x2bf   : > { %v3631_v57 = vpop.f32.mrb[23].mxu1 }
 0x2c0   : > { %v1073_v58 = vadd.f32 %v3629_v53, %v5389_v54  ;;  %v3632_v59 = vadd.f32 %v3631_v57, %v3630_v55  ;;  %4273 = vmatprep.mubr.bf16.mxu0 %v1195_v56 }
 0x2c2   : > { %v1076_v60 = vadd.f32 %v3632_v59, %v5389_v54  ;;  %v1169_v61 = vmax.f32 %v1073_v58, 0.0 }
 0x2c4   : > { %v1170_v62 = vmax.f32 %v1076_v60, 0.0  ;;  %v3633_v63 = vpop.f32.mrb[24].mxu1 }
 0x2c5   : > { %v3634_v0 = vpop.f32.mrb[25].mxu1 }
 0x2c6   : > { %v3635_v1 = vadd.f32 %v3634_v0, %v3633_v63  ;;  %v3636_v2 = vpop.f32.mrb[26].mxu1  ;;  %v1196_v3 = vpack.c.bf16 %v1170_v62, %v1169_v61 }
 0x2c7   : > { %v3637_v4 = vpop.f32.mrb[27].mxu1 }
 0x2c8   : > { %v1081_v5 = vadd.f32 %v3635_v1, %v5389_v54  ;;  %v3638_v6 = vadd.f32 %v3637_v4, %v3636_v2  ;;  %4274 = vmatmul.mubr.bf16.gmra.mrb[40].mxu0 %v1196_v3 }
 0x2ca   : > { %v1084_v7 = vadd.f32 %v3638_v6, %v5389_v54  ;;  %v1171_v8 = vmax.f32 %v1081_v5, 0.0 }
 0x2cc   : > { %v1172_v9 = vmax.f32 %v1084_v7, 0.0  ;;  %v3639_v10 = vpop.f32.mrb[28].mxu1 }
 0x2cd   : > { %v3640_v12 = vpop.f32.mrb[29].mxu1 }
 0x2ce   : > { %v3641_v35 = vadd.f32 %v3640_v12, %v3639_v10  ;;  %v3642_v38 = vpop.f32.mrb[30].mxu1  ;;  %v1197_v39 = vpack.c.bf16 %v1172_v9, %v1171_v8 }
 0x2cf   : > { %v3643_v42 = vpop.f32.mrb[31].mxu1 }
 0x2d0   : > { %v1089_v43 = vadd.f32 %v3641_v35, %v5389_v54  ;;  %v3644_v51 = vadd.f32 %v3643_v42, %v3642_v38  ;;  %4277 = vmatprep.mubr.bf16.mxu0 %v1197_v39 }
 0x2d2   : > { %v1092_v53 = vadd.f32 %v3644_v51, %v5389_v54  ;;  %v1173_v55 = vmax.f32 %v1089_v43, 0.0 }
 0x2d4   : > { %v1174_v56 = vmax.f32 %v1092_v53, 0.0  ;;  %v3645_v57 = vpop.f32.mrb[32].mxu1 }
 0x2d5   : > { %v3646_v58 = vpop.f32.mrb[33].mxu1 }
 0x2d6   : > { %v3647_v59 = vadd.f32 %v3646_v58, %v3645_v57  ;;  %v3648_v60 = vpop.f32.mrb[34].mxu1  ;;  %v1198_v61 = vpack.c.bf16 %v1174_v56, %v1173_v55 }
 0x2d7   : > { %v3649_v62 = vpop.f32.mrb[35].mxu1 }
 0x2d8   : > { %v1097_v63 = vadd.f32 %v3647_v59, %v5389_v54  ;;  %v3650_v0 = vadd.f32 %v3649_v62, %v3648_v60  ;;  %4278 = vmatmul.mubr.bf16.gmra.mrb[44].mxu0 %v1198_v61 }
 0x2da   : > { %v1100_v1 = vadd.f32 %v3650_v0, %v5389_v54  ;;  %v1175_v2 = vmax.f32 %v1097_v63, 0.0 }
 0x2dc   : > { %v1176_v3 = vmax.f32 %v1100_v1, 0.0  ;;  %v3651_v4 = vpop.f32.mrb[36].mxu1 }
 0x2dd   : > { %v3652_v5 = vpop.f32.mrb[37].mxu1 }
 0x2de   : > { %v3653_v6 = vadd.f32 %v3652_v5, %v3651_v4  ;;  %v3654_v7 = vpop.f32.mrb[38].mxu1  ;;  %v1199_v8 = vpack.c.bf16 %v1176_v3, %v1175_v2 }
 0x2df   : > { %v3655_v9 = vpop.f32.mrb[39].mxu1 }
 0x2e0   : > { %v1105_v10 = vadd.f32 %v3653_v6, %v5389_v54  ;;  %v3656_v12 = vadd.f32 %v3655_v9, %v3654_v7  ;;  %4281 = vmatprep.mubr.bf16.mxu0 %v1199_v8 }
 0x2e2   : > { %v1108_v35 = vadd.f32 %v3656_v12, %v5389_v54  ;;  %v1177_v38 = vmax.f32 %v1105_v10, 0.0 }
 0x2e4   : > { %v1178_v39 = vmax.f32 %v1108_v35, 0.0  ;;  %v3657_v42 = vpop.f32.mrb[40].mxu1 }
 0x2e5   : > { %v3658_v43 = vpop.f32.mrb[41].mxu1 }
 0x2e6   : > { %v3659_v51 = vadd.f32 %v3658_v43, %v3657_v42  ;;  %v3660_v53 = vpop.f32.mrb[42].mxu1  ;;  %v1200_v55 = vpack.c.bf16 %v1178_v39, %v1177_v38 }
 0x2e7   : > { %v3661_v56 = vpop.f32.mrb[43].mxu1 }
 0x2e8   : > { %v1113_v57 = vadd.f32 %v3659_v51, %v5389_v54  ;;  %v3662_v58 = vadd.f32 %v3661_v56, %v3660_v53  ;;  %4282 = vmatmul.mubr.bf16.gmra.mrb[48].mxu0 %v1200_v55 }
 0x2ea   : > { %v1116_v59 = vadd.f32 %v3662_v58, %v5389_v54  ;;  %v1179_v60 = vmax.f32 %v1113_v57, 0.0 }
 0x2ec   : > { %v1180_v61 = vmax.f32 %v1116_v59, 0.0  ;;  %v3663_v62 = vpop.f32.mrb[44].mxu1 }
 0x2ed   : > { %v3664_v63 = vpop.f32.mrb[45].mxu1 }
 0x2ee   : > { %v3665_v0 = vadd.f32 %v3664_v63, %v3663_v62  ;;  %v3666_v1 = vpop.f32.mrb[46].mxu1  ;;  %v1201_v2 = vpack.c.bf16 %v1180_v61, %v1179_v60 }
 0x2ef   : > { %v3667_v3 = vpop.f32.mrb[47].mxu1 }
 0x2f0   : > { %v1121_v4 = vadd.f32 %v3665_v0, %v5389_v54  ;;  %v3668_v5 = vadd.f32 %v3667_v3, %v3666_v1  ;;  %4285 = vmatprep.mubr.bf16.mxu0 %v1201_v2 }
 0x2f2   : > { %v1124_v6 = vadd.f32 %v3668_v5, %v5389_v54  ;;  %v1181_v7 = vmax.f32 %v1121_v4, 0.0 }
 0x2f4   : > { %v1182_v8 = vmax.f32 %v1124_v6, 0.0  ;;  %v3669_v9 = vpop.f32.mrb[48].mxu1 }
 0x2f5   : > { %v3670_v10 = vpop.f32.mrb[49].mxu1 }
 0x2f6   : > { %v3671_v12 = vadd.f32 %v3670_v10, %v3669_v9  ;;  %v3672_v35 = vpop.f32.mrb[50].mxu1  ;;  %v1202_v38 = vpack.c.bf16 %v1182_v8, %v1181_v7 }
 0x2f7   : > { %v3673_v39 = vpop.f32.mrb[51].mxu1 }
 0x2f8   : > { %v1129_v42 = vadd.f32 %v3671_v12, %v5389_v54  ;;  %v3674_v43 = vadd.f32 %v3673_v39, %v3672_v35  ;;  %4286 = vmatmul.mubr.bf16.gmra.mrb[52].mxu0 %v1202_v38 }
 0x2fa   : > { %v1132_v51 = vadd.f32 %v3674_v43, %v5389_v54  ;;  %v1183_v53 = vmax.f32 %v1129_v42, 0.0 }
 0x2fc   : > { %v1184_v55 = vmax.f32 %v1132_v51, 0.0  ;;  %v3675_v56 = vpop.f32.mrb[52].mxu1 }
 0x2fd   : > { %v3676_v57 = vpop.f32.mrb[53].mxu1 }
 0x2fe   : > { %v3677_v58 = vadd.f32 %v3676_v57, %v3675_v56  ;;  %v3678_v59 = vpop.f32.mrb[54].mxu1  ;;  %v1203_v60 = vpack.c.bf16 %v1184_v55, %v1183_v53 }
 0x2ff   : > { %v3679_v61 = vpop.f32.mrb[55].mxu1 }
 0x300   : > { %v1137_v62 = vadd.f32 %v3677_v58, %v5389_v54  ;;  %v3680_v63 = vadd.f32 %v3679_v61, %v3678_v59  ;;  %4289 = vmatprep.mubr.bf16.mxu0 %v1203_v60 }
 0x302   : > { %v1140_v0 = vadd.f32 %v3680_v63, %v5389_v54  ;;  %v1185_v1 = vmax.f32 %v1137_v62, 0.0 }
 0x304   : > { %v1186_v2 = vmax.f32 %v1140_v0, 0.0  ;;  %v3681_v3 = vpop.f32.mrb[56].mxu1 }
 0x305   : > { %v3682_v4 = vpop.f32.mrb[57].mxu1 }
 0x306   : > { %v3683_v5 = vadd.f32 %v3682_v4, %v3681_v3  ;;  %v3684_v6 = vpop.f32.mrb[58].mxu1  ;;  %v1204_v7 = vpack.c.bf16 %v1186_v2, %v1185_v1 }
 0x307   : > { %v3685_v8 = vpop.f32.mrb[59].mxu1 }
 0x308   : > { %v1145_v9 = vadd.f32 %v3683_v5, %v5389_v54  ;;  %v3686_v10 = vadd.f32 %v3685_v8, %v3684_v6  ;;  %4290 = vmatmul.mubr.bf16.gmra.mrb[56].mxu0 %v1204_v7 }
 0x30a   : > { %v1148_v12 = vadd.f32 %v3686_v10, %v5389_v54  ;;  %v1187_v35 = vmax.f32 %v1145_v9, 0.0 }
 0x30c   : > { %v1188_v38 = vmax.f32 %v1148_v12, 0.0  ;;  %v3687_v39 = vpop.f32.mrb[60].mxu1 }
 0x30d   : > { %v3688_v42 = vpop.f32.mrb[61].mxu1 }
 0x30e   : > { %v3689_v43 = vadd.f32 %v3688_v42, %v3687_v39  ;;  %v3690_v51 = vpop.f32.mrb[62].mxu1  ;;  %v1205_v53 = vpack.c.bf16 %v1188_v38, %v1187_v35 }
 0x30f   : > { %v3691_v55 = vpop.f32.mrb[63].mxu1 }
 0x310   : > { %v1153_v56 = vadd.f32 %v3689_v43, %v5389_v54  ;;  %v3692_v57 = vadd.f32 %v3691_v55, %v3690_v51  ;;  %4293 = vmatprep.mubr.bf16.mxu0 %v1205_v53 }
 0x312   : > { %v1156_v58 = vadd.f32 %v3692_v57, %v5389_v54  ;;  %v1189_v59 = vmax.f32 %v1153_v56, 0.0 }
 0x314   : > { %v1190_v60 = vmax.f32 %v1156_v58, 0.0 }
 0x316   : > { %v1206_v61 = vpack.c.bf16 %v1190_v60, %v1189_v59 }
 0x318   : > { %4294 = vmatmul.mubr.bf16.gmra.mrb[60].mxu0 %v1206_v61 }
 0x319   : > { %1468 = vmatprep.mubr.bf16.mxu0 %v5255_v24 }
 0x37b   : > { %v4267_v62 = vpop.f32.mrb[32].mxu0 }
 0x37c   : > { %v1289_v63 = vpop.f32.mrb[33].mxu0 }
 0x37d   : > { %v4268_v0 = vpop.f32.mrb[34].mxu0 }
 0x37e   : > { %v1417_v1 = vpack.c.bf16 %v4268_v0, %v4267_v62  ;;  %v1292_v2 = vpop.f32.mrb[35].mxu0 }
 0x37f   : > { %v1416_v3 = vpack.c.bf16 %v1292_v2, %v1289_v63 }
 0x38b   : > { %v4271_v4 = vpop.f32.mrb[36].mxu0 }
 0x38c   : > { %v1305_v5 = vpop.f32.mrb[37].mxu0 }
 0x38d   : > { %v4272_v6 = vpop.f32.mrb[38].mxu0 }
 0x38e   : > { %v1419_v7 = vpack.c.bf16 %v4272_v6, %v4271_v4  ;;  %v1308_v8 = vpop.f32.mrb[39].mxu0 }
 0x38f   : > { %v1418_v9 = vpack.c.bf16 %v1308_v8, %v1305_v5 }
 0x39b   : > { %v4275_v10 = vpop.f32.mrb[40].mxu0 }
 0x39c   : > { %v1321_v54 = vpop.f32.mrb[41].mxu0 }
 0x39d   : > { %v4276_v12 = vpop.f32.mrb[42].mxu0 }
 0x39e   : > { %v1421_v35 = vpack.c.bf16 %v4276_v12, %v4275_v10  ;;  %v1324_v38 = vpop.f32.mrb[43].mxu0 }
 0x39f   : > { %v1420_v39 = vpack.c.bf16 %v1324_v38, %v1321_v54 }
 0x3ab   : > { %v4279_v42 = vpop.f32.mrb[44].mxu0 }
 0x3ac   : > { %v1337_v24 = vpop.f32.mrb[45].mxu0 }
 0x3ad   : > { %v4280_v43 = vpop.f32.mrb[46].mxu0 }
 0x3ae   : > { %v1423_v51 = vpack.c.bf16 %v4280_v43, %v4279_v42  ;;  %v1340_v53 = vpop.f32.mrb[47].mxu0 }
 0x3af   : > { %v1422_v55 = vpack.c.bf16 %v1340_v53, %v1337_v24 }
 0x3bb   : > { %v4283_v56 = vpop.f32.mrb[48].mxu0 }
 0x3bc   : > { %v1353_v57 = vpop.f32.mrb[49].mxu0 }
 0x3bd   : > { %v4284_v58 = vpop.f32.mrb[50].mxu0 }
 0x3be   : > { %v1425_v59 = vpack.c.bf16 %v4284_v58, %v4283_v56  ;;  %v1356_v60 = vpop.f32.mrb[51].mxu0  ;;  %v4682_v56 = vld [vmem:[#allocation2 + $0x88] sm:$0xff]  }
 0x3bf   : > { %v1424_v61 = vpack.c.bf16 %v1356_v60, %v1353_v57 }
 0x3c1   : > { %3717 = vmatprep.subr.bf16.mxu0 %v1424_v61 }
 0x3c2   : > { %3718 = vmatpush3.bf16.msra.mxu0 %v1416_v3 }
 0x3c3   : > { %3719 = vmatprep.subr.bf16.mxu0 %v1425_v59 }
 0x3c6   : > { %3720 = vmatpush3.bf16.msra.mxu0 %v1417_v1 }
 0x3cb   : > { %v4287_v62 = vpop.f32.mrb[52].mxu0 }
 0x3cc   : > { %v1369_v63 = vpop.f32.mrb[53].mxu0 }
 0x3cd   : > { %v4288_v0 = vpop.f32.mrb[54].mxu0 }
 0x3ce   : > { %v1427_v2 = vpack.c.bf16 %v4288_v0, %v4287_v62  ;;  %v1372_v4 = vpop.f32.mrb[55].mxu0 }
 0x3cf   : > { %v1426_v5 = vpack.c.bf16 %v1372_v4, %v1369_v63 }
 0x3d1   : > { %3721 = vmatprep.subr.bf16.mxu0 %v1426_v5 }
 0x3d2   : > { %3722 = vmatpush3.bf16.msra.mxu0 %v1418_v9  ;;  %v4681_v9 = vld [vmem:[#allocation2 + $0x80] sm:$0xff]  }
 0x3d3   : > { %3723 = vmatprep.subr.bf16.mxu0 %v1427_v2  ;;  %4297 = vmatprep.subr.bf16.mxu1 %v4681_v9 }
 0x3d4   : > { %4298 = vmatpush3.bf16.msra.mxu1 %v4681_v9 }
 0x3d5   : > { %4299 = vmatprep.subr.bf16.mxu1 %v4682_v56 }
 0x3d6   : > { %3724 = vmatpush3.bf16.msra.mxu0 %v1419_v7  ;;  %v4683_v7 = vld [vmem:[#allocation2 + $0x90] sm:$0xff]  }
 0x3d8   : > { %4300 = vmatpush3.bf16.msra.mxu1 %v4682_v56 }
 0x3d9   : > { %4301 = vmatprep.subr.bf16.mxu1 %v4683_v7 }
 0x3db   : > { %v4291_v6 = vpop.f32.mrb[56].mxu0 }
 0x3dc   : > { %v1385_v8 = vpop.f32.mrb[57].mxu0  ;;  %4302 = vmatpush3.bf16.msra.mxu1 %v4683_v7 }
 0x3dd   : > { %v4292_v10 = vpop.f32.mrb[58].mxu0 }
 0x3de   : > { %v1429_v54 = vpack.c.bf16 %v4292_v10, %v4291_v6  ;;  %v1388_v12 = vpop.f32.mrb[59].mxu0 }
 0x3df   : > { %v1428_v38 = vpack.c.bf16 %v1388_v12, %v1385_v8 }
 0x3e1   : > { %3725 = vmatprep.subr.bf16.mxu0 %v1428_v38 }
 0x3e2   : > { %3726 = vmatpush3.bf16.msra.mxu0 %v1420_v39 }
 0x3e3   : > { %3727 = vmatprep.subr.bf16.mxu0 %v1429_v54 }
 0x3e6   : > { %3728 = vmatpush3.bf16.msra.mxu0 %v1421_v35 }
 0x3eb   : > { %v4295_v1 = vpop.f32.mrb[60].mxu0 }
 0x3ec   : > { %v1401_v3 = vpop.f32.mrb[61].mxu0 }
 0x3ed   : > { %v4296_v42 = vpop.f32.mrb[62].mxu0 }
 0x3ee   : > { %v1431_v24 = vpack.c.bf16 %v4296_v42, %v4295_v1  ;;  %v1404_v43 = vpop.f32.mrb[63].mxu0 }
 0x3ef   : > { %v1430_v53 = vpack.c.bf16 %v1404_v43, %v1401_v3 }
 0x3f1   : > { %3729 = vmatprep.subr.bf16.mxu0 %v1430_v53 }
 0x3f2   : > { %3730 = vmatpush3.bf16.msra.mxu0 %v1422_v55 }
 0x3f3   : > { %3731 = vmatprep.subr.bf16.mxu0 %v1431_v24 }
 0x3f6   : > { %3732 = vmatpush3.bf16.msra.mxu0 %v1423_v51 }
 0x3f9   : > { %1469 = vmatmul.mubr.bf16.vlgmr.msra.gmra.mrb[64].mxu0 %v5259_v11  ;;  %v4684_v11 = vld [vmem:[#allocation2 + $0x98] sm:$0xff]  }
 0x3fa   : > { %1476 = vmatprep.mubr.bf16.mxu0 %v5262_v13  ;;  %4303 = vmatprep.subr.bf16.mxu1 %v4684_v11  ;;  %v4685_v13 = vld [vmem:[#allocation2 + $0xa0] sm:$0xff]  }
 0x3fb   : > { %4304 = vmatpush3.bf16.msra.mxu1 %v4684_v11 }
 0x3fc   : > { %4305 = vmatprep.subr.bf16.mxu1 %v4685_v13 }
 0x3ff   : > { %4306 = vmatpush3.bf16.msra.mxu1 %v4685_v13 }
 0x401   : > { %1477 = vmatmul.mubr.bf16.gmra.mrb[68].mxu0 %v5267_v14  ;;  %v4686_v14 = vld [vmem:[#allocation2 + $0xa8] sm:$0xff]  }
 0x402   : > { %1484 = vmatprep.mubr.bf16.mxu0 %v5270_v15  ;;  %4307 = vmatprep.subr.bf16.mxu1 %v4686_v14  ;;  %v4687_v15 = vld [vmem:[#allocation2 + $0xb0] sm:$0xff]  }
 0x403   : > { %4308 = vmatpush3.bf16.msra.mxu1 %v4686_v14 }
 0x404   : > { %4309 = vmatprep.subr.bf16.mxu1 %v4687_v15 }
 0x407   : > { %4310 = vmatpush3.bf16.msra.mxu1 %v4687_v15 }
 0x409   : > { %1485 = vmatmul.mubr.bf16.gmra.mrb[72].mxu0 %v5275_v16  ;;  %v4688_v16 = vld [vmem:[#allocation2 + $0xb8] sm:$0xff]  }
 0x40a   : > { %1492 = vmatprep.mubr.bf16.mxu0 %v5278_v17  ;;  %4311 = vmatprep.subr.bf16.mxu1 %v4688_v16  ;;  %v1434_v17 = vsub.s32 1, %v5383_v50 }
 0x40b   : > { %4312 = vmatpush3.bf16.msra.mxu1 %v4688_v16 }
 0x411   : > { %1493 = vmatmul.mubr.bf16.gmra.mrb[76].mxu0 %v5283_v18 }
 0x412   : > { %1500 = vmatprep.mubr.bf16.mxu0 %v5286_v19  ;;  %v5457_v19 = vrot.slane %v5386_v52, %v1434_v17 }
 0x419   : > { %1501 = vmatmul.mubr.bf16.gmra.mrb[80].mxu0 %v5291_v20 }
 0x41a   : > { %1508 = vmatprep.mubr.bf16.mxu0 %v5294_v21 }
 0x421   : > { %1509 = vmatmul.mubr.bf16.gmra.mrb[84].mxu0 %v5299_v22 }
 0x422   : > { %1516 = vmatprep.mubr.bf16.mxu0 %v5302_v23 }
 0x429   : > { %1517 = vmatmul.mubr.bf16.gmra.mrb[88].mxu0 %v5307_v25 }
 0x42a   : > { %1524 = vmatprep.mubr.bf16.mxu0 %v5310_v26 }
 0x431   : > { %1525 = vmatmul.mubr.bf16.gmra.mrb[92].mxu0 %v5315_v27 }
 0x432   : > { %1532 = vmatprep.mubr.bf16.mxu0 %v5318_v28 }
 0x439   : > { %1533 = vmatmul.mubr.bf16.gmra.mrb[96].mxu0 %v5323_v29 }
 0x43a   : > { %1540 = vmatprep.mubr.bf16.mxu0 %v5326_v30 }
 0x441   : > { %1541 = vmatmul.mubr.bf16.gmra.mrb[100].mxu0 %v5331_v31 }
 0x442   : > { %1548 = vmatprep.mubr.bf16.mxu0 %v5334_v32 }
 0x449   : > { %1549 = vmatmul.mubr.bf16.gmra.mrb[104].mxu0 %v5339_v33 }
 0x44a   : > { %1556 = vmatprep.mubr.bf16.mxu0 %v5342_v34 }
 0x451   : > { %1557 = vmatmul.mubr.bf16.gmra.mrb[108].mxu0 %v5347_v36 }
 0x452   : > { %1564 = vmatprep.mubr.bf16.mxu0 %v5350_v37 }
 0x459   : > { %1565 = vmatmul.mubr.bf16.gmra.mrb[112].mxu0 %v5355_v40 }
 0x45a   : > { %1572 = vmatprep.mubr.bf16.mxu0 %v5358_v41 }
 0x461   : > { %1573 = vmatmul.mubr.bf16.gmra.mrb[116].mxu0 %v5363_v44 }
 0x462   : > { %1580 = vmatprep.mubr.bf16.mxu0 %v5366_v45 }
 0x469   : > { %1581 = vmatmul.mubr.bf16.gmra.mrb[120].mxu0 %v5371_v46 }
 0x46a   : > { %1588 = vmatprep.mubr.bf16.mxu0 %v5374_v47 }
 0x471   : > { %1589 = vmatmul.mubr.bf16.gmra.mrb[124].mxu0 %v5379_v48 }
 0x4cc   : > { %v3733_v18 = vpop.f32.mrb[64].mxu0 }
 0x4cd   : > { %v3734_v20 = vpop.f32.mrb[65].mxu0 }
 0x4ce   : > { %v3735_v21 = vadd.f32 %v3734_v20, %v3733_v18  ;;  %v3736_v22 = vpop.f32.mrb[66].mxu0 }
 0x4cf   : > { %v3737_v23 = vpop.f32.mrb[67].mxu0 }
 0x4d0   : > { %v1471_v25 = vadd.f32 %v3735_v21, %v5457_v19  ;;  %v3738_v26 = vadd.f32 %v3737_v23, %v3736_v22 }
 0x4d2   : > { %v1474_v27 = vadd.f32 %v3738_v26, %v5457_v19  ;;  %v1597_v28 = vmax.f32 %v1471_v25, 0.0 }
 0x4d4   : > { %v1598_v29 = vmax.f32 %v1474_v27, 0.0  ;;  %v3739_v30 = vpop.f32.mrb[68].mxu0 }
 0x4d5   : > { %v3740_v31 = vpop.f32.mrb[69].mxu0 }
 0x4d6   : > { %v3741_v32 = vadd.f32 %v3740_v31, %v3739_v30  ;;  %v3742_v33 = vpop.f32.mrb[70].mxu0  ;;  %v1629_v34 = vpack.c.bf16 %v1598_v29, %v1597_v28 }
 0x4d7   : > { %v3743_v36 = vpop.f32.mrb[71].mxu0 }
 0x4d8   : > { %v1479_v37 = vadd.f32 %v3741_v32, %v5457_v19  ;;  %v3744_v40 = vadd.f32 %v3743_v36, %v3742_v33  ;;  %4313 = vmatprep.mubr.bf16.mxu1 %v1629_v34 }
 0x4da   : > { %v1482_v41 = vadd.f32 %v3744_v40, %v5457_v19  ;;  %v1599_v44 = vmax.f32 %v1479_v37, 0.0 }
 0x4dc   : > { %v1600_v45 = vmax.f32 %v1482_v41, 0.0  ;;  %v3745_v46 = vpop.f32.mrb[72].mxu0 }
 0x4dd   : > { %v3746_v47 = vpop.f32.mrb[73].mxu0 }
 0x4de   : > { %v1630_v48 = vpack.c.bf16 %v1600_v45, %v1599_v44  ;;  %v3747_v52 = vadd.f32 %v3746_v47, %v3745_v46  ;;  %v3748_v35 = vpop.f32.mrb[74].mxu0 }
 0x4df   : > { %v3749_v39 = vpop.f32.mrb[75].mxu0 }
 0x4e0   : > { %v1487_v51 = vadd.f32 %v3747_v52, %v5457_v19  ;;  %v3750_v55 = vadd.f32 %v3749_v39, %v3748_v35  ;;  %4314 = vmatmul.mubr.bf16.vlgmr.msra.gmra.mrb[64].mxu1 %v1630_v48 }
 0x4e2   : > { %v1490_v57 = vadd.f32 %v3750_v55, %v5457_v19  ;;  %v1601_v58 = vmax.f32 %v1487_v51, 0.0 }
 0x4e4   : > { %v1602_v59 = vmax.f32 %v1490_v57, 0.0  ;;  %v3751_v60 = vpop.f32.mrb[76].mxu0 }
 0x4e5   : > { %v3752_v61 = vpop.f32.mrb[77].mxu0 }
 0x4e6   : > { %v3753_v62 = vadd.f32 %v3752_v61, %v3751_v60  ;;  %v3754_v63 = vpop.f32.mrb[78].mxu0  ;;  %v1631_v0 = vpack.c.bf16 %v1602_v59, %v1601_v58 }
 0x4e7   : > { %v3755_v2 = vpop.f32.mrb[79].mxu0 }
 0x4e8   : > { %v1495_v4 = vadd.f32 %v3753_v62, %v5457_v19  ;;  %v3756_v5 = vadd.f32 %v3755_v2, %v3754_v63  ;;  %4317 = vmatprep.mubr.bf16.mxu1 %v1631_v0 }
 0x4ea   : > { %v1498_v6 = vadd.f32 %v3756_v5, %v5457_v19  ;;  %v1603_v8 = vmax.f32 %v1495_v4, 0.0 }
 0x4ec   : > { %v1604_v10 = vmax.f32 %v1498_v6, 0.0  ;;  %v3757_v54 = vpop.f32.mrb[80].mxu0 }
 0x4ed   : > { %v3758_v12 = vpop.f32.mrb[81].mxu0 }
 0x4ee   : > { %v3759_v38 = vadd.f32 %v3758_v12, %v3757_v54  ;;  %v3760_v1 = vpop.f32.mrb[82].mxu0  ;;  %v1632_v3 = vpack.c.bf16 %v1604_v10, %v1603_v8 }
 0x4ef   : > { %v3761_v42 = vpop.f32.mrb[83].mxu0 }
 0x4f0   : > { %v1503_v24 = vadd.f32 %v3759_v38, %v5457_v19  ;;  %v3762_v43 = vadd.f32 %v3761_v42, %v3760_v1  ;;  %4318 = vmatmul.mubr.bf16.gmra.mrb[68].mxu1 %v1632_v3 }
 0x4f2   : > { %v1506_v53 = vadd.f32 %v3762_v43, %v5457_v19  ;;  %v1605_v9 = vmax.f32 %v1503_v24, 0.0 }
 0x4f4   : > { %v1606_v56 = vmax.f32 %v1506_v53, 0.0  ;;  %v3763_v7 = vpop.f32.mrb[84].mxu0 }
 0x4f5   : > { %v3764_v11 = vpop.f32.mrb[85].mxu0 }
 0x4f6   : > { %v3765_v13 = vadd.f32 %v3764_v11, %v3763_v7  ;;  %v3766_v14 = vpop.f32.mrb[86].mxu0  ;;  %v1633_v15 = vpack.c.bf16 %v1606_v56, %v1605_v9 }
 0x4f7   : > { %v3767_v16 = vpop.f32.mrb[87].mxu0 }
 0x4f8   : > { %v1511_v17 = vadd.f32 %v3765_v13, %v5457_v19  ;;  %v3768_v18 = vadd.f32 %v3767_v16, %v3766_v14  ;;  %4321 = vmatprep.mubr.bf16.mxu1 %v1633_v15 }
 0x4fa   : > { %v1514_v20 = vadd.f32 %v3768_v18, %v5457_v19  ;;  %v1607_v21 = vmax.f32 %v1511_v17, 0.0 }
 0x4fc   : > { %v1608_v22 = vmax.f32 %v1514_v20, 0.0  ;;  %v3769_v23 = vpop.f32.mrb[88].mxu0 }
 0x4fd   : > { %v3770_v25 = vpop.f32.mrb[89].mxu0 }
 0x4fe   : > { %v3771_v26 = vadd.f32 %v3770_v25, %v3769_v23  ;;  %v3772_v27 = vpop.f32.mrb[90].mxu0  ;;  %v1634_v28 = vpack.c.bf16 %v1608_v22, %v1607_v21 }
 0x4ff   : > { %v3773_v29 = vpop.f32.mrb[91].mxu0 }
 0x500   : > { %v1519_v30 = vadd.f32 %v3771_v26, %v5457_v19  ;;  %v3774_v31 = vadd.f32 %v3773_v29, %v3772_v27  ;;  %4322 = vmatmul.mubr.bf16.gmra.mrb[72].mxu1 %v1634_v28 }
 0x502   : > { %v1522_v32 = vadd.f32 %v3774_v31, %v5457_v19  ;;  %v1609_v33 = vmax.f32 %v1519_v30, 0.0 }
 0x504   : > { %v1610_v34 = vmax.f32 %v1522_v32, 0.0  ;;  %v3775_v36 = vpop.f32.mrb[92].mxu0 }
 0x505   : > { %v3776_v37 = vpop.f32.mrb[93].mxu0 }
 0x506   : > { %v3777_v40 = vadd.f32 %v3776_v37, %v3775_v36  ;;  %v3778_v41 = vpop.f32.mrb[94].mxu0  ;;  %v1635_v44 = vpack.c.bf16 %v1610_v34, %v1609_v33 }
 0x507   : > { %v3779_v45 = vpop.f32.mrb[95].mxu0 }
 0x508   : > { %v1527_v46 = vadd.f32 %v3777_v40, %v5457_v19  ;;  %v3780_v47 = vadd.f32 %v3779_v45, %v3778_v41  ;;  %4325 = vmatprep.mubr.bf16.mxu1 %v1635_v44 }
 0x50a   : > { %v1530_v48 = vadd.f32 %v3780_v47, %v5457_v19  ;;  %v1611_v52 = vmax.f32 %v1527_v46, 0.0 }
 0x50c   : > { %v1612_v35 = vmax.f32 %v1530_v48, 0.0  ;;  %v3781_v39 = vpop.f32.mrb[96].mxu0 }
 0x50d   : > { %v3782_v51 = vpop.f32.mrb[97].mxu0 }
 0x50e   : > { %v3783_v55 = vadd.f32 %v3782_v51, %v3781_v39  ;;  %v3784_v57 = vpop.f32.mrb[98].mxu0  ;;  %v1636_v58 = vpack.c.bf16 %v1612_v35, %v1611_v52 }
 0x50f   : > { %v3785_v59 = vpop.f32.mrb[99].mxu0 }
 0x510   : > { %v1535_v60 = vadd.f32 %v3783_v55, %v5457_v19  ;;  %v3786_v61 = vadd.f32 %v3785_v59, %v3784_v57  ;;  %4326 = vmatmul.mubr.bf16.gmra.mrb[76].mxu1 %v1636_v58 }
 0x512   : > { %v1538_v62 = vadd.f32 %v3786_v61, %v5457_v19  ;;  %v1613_v63 = vmax.f32 %v1535_v60, 0.0 }
 0x514   : > { %v1614_v0 = vmax.f32 %v1538_v62, 0.0  ;;  %v3787_v2 = vpop.f32.mrb[100].mxu0 }
 0x515   : > { %v3788_v4 = vpop.f32.mrb[101].mxu0 }
 0x516   : > { %v3789_v5 = vadd.f32 %v3788_v4, %v3787_v2  ;;  %v3790_v6 = vpop.f32.mrb[102].mxu0  ;;  %v1637_v8 = vpack.c.bf16 %v1614_v0, %v1613_v63 }
 0x517   : > { %v3791_v10 = vpop.f32.mrb[103].mxu0 }
 0x518   : > { %v1543_v54 = vadd.f32 %v3789_v5, %v5457_v19  ;;  %v3792_v12 = vadd.f32 %v3791_v10, %v3790_v6  ;;  %4329 = vmatprep.mubr.bf16.mxu1 %v1637_v8 }
 0x51a   : > { %v1546_v38 = vadd.f32 %v3792_v12, %v5457_v19  ;;  %v1615_v1 = vmax.f32 %v1543_v54, 0.0 }
 0x51c   : > { %v1616_v3 = vmax.f32 %v1546_v38, 0.0  ;;  %v3793_v42 = vpop.f32.mrb[104].mxu0 }
 0x51d   : > { %v3794_v24 = vpop.f32.mrb[105].mxu0 }
 0x51e   : > { %v3795_v43 = vadd.f32 %v3794_v24, %v3793_v42  ;;  %v3796_v53 = vpop.f32.mrb[106].mxu0  ;;  %v1638_v9 = vpack.c.bf16 %v1616_v3, %v1615_v1 }
 0x51f   : > { %v3797_v56 = vpop.f32.mrb[107].mxu0 }
 0x520   : > { %v1551_v7 = vadd.f32 %v3795_v43, %v5457_v19  ;;  %v3798_v11 = vadd.f32 %v3797_v56, %v3796_v53  ;;  %4330 = vmatmul.mubr.bf16.gmra.mrb[80].mxu1 %v1638_v9 }
 0x522   : > { %v1554_v13 = vadd.f32 %v3798_v11, %v5457_v19  ;;  %v1617_v14 = vmax.f32 %v1551_v7, 0.0  ;;  %v4691_v7 = vld [vmem:[%s5232_s6 + $0x104] ss:$8 sps:$4 sm:$0xff]  }
 0x524   : > { %v1618_v15 = vmax.f32 %v1554_v13, 0.0  ;;  %v3799_v16 = vpop.f32.mrb[108].mxu0 }
 0x525   : > { %v3800_v17 = vpop.f32.mrb[109].mxu0 }
 0x526   : > { %v3801_v18 = vadd.f32 %v3800_v17, %v3799_v16  ;;  %v3802_v20 = vpop.f32.mrb[110].mxu0  ;;  %v1639_v21 = vpack.c.bf16 %v1618_v15, %v1617_v14 }
 0x527   : > { %v3803_v22 = vpop.f32.mrb[111].mxu0 }
 0x528   : > { %v1559_v23 = vadd.f32 %v3801_v18, %v5457_v19  ;;  %v3804_v25 = vadd.f32 %v3803_v22, %v3802_v20  ;;  %4333 = vmatprep.mubr.bf16.mxu1 %v1639_v21 }
 0x52a   : > { %v1562_v26 = vadd.f32 %v3804_v25, %v5457_v19  ;;  %v1619_v27 = vmax.f32 %v1559_v23, 0.0 }
 0x52c   : > { %v1620_v28 = vmax.f32 %v1562_v26, 0.0  ;;  %v3805_v29 = vpop.f32.mrb[112].mxu0 }
 0x52d   : > { %v3806_v30 = vpop.f32.mrb[113].mxu0 }
 0x52e   : > { %v3807_v31 = vadd.f32 %v3806_v30, %v3805_v29  ;;  %v3808_v32 = vpop.f32.mrb[114].mxu0  ;;  %v1640_v33 = vpack.c.bf16 %v1620_v28, %v1619_v27 }
 0x52f   : > { %v3809_v34 = vpop.f32.mrb[115].mxu0 }
 0x530   : > { %v1567_v36 = vadd.f32 %v3807_v31, %v5457_v19  ;;  %v3810_v37 = vadd.f32 %v3809_v34, %v3808_v32  ;;  %4334 = vmatmul.mubr.bf16.gmra.mrb[84].mxu1 %v1640_v33 }
 0x532   : > { %v1570_v40 = vadd.f32 %v3810_v37, %v5457_v19  ;;  %v1621_v41 = vmax.f32 %v1567_v36, 0.0 }
 0x534   : > { %v1622_v44 = vmax.f32 %v1570_v40, 0.0  ;;  %v3811_v45 = vpop.f32.mrb[116].mxu0 }
 0x535   : > { %v3812_v46 = vpop.f32.mrb[117].mxu0 }
 0x536   : > { %v3813_v47 = vadd.f32 %v3812_v46, %v3811_v45  ;;  %v3814_v48 = vpop.f32.mrb[118].mxu0  ;;  %v1641_v52 = vpack.c.bf16 %v1622_v44, %v1621_v41 }
 0x537   : > { %v3815_v35 = vpop.f32.mrb[119].mxu0 }
 0x538   : > { %v1575_v39 = vadd.f32 %v3813_v47, %v5457_v19  ;;  %v3816_v51 = vadd.f32 %v3815_v35, %v3814_v48  ;;  %4337 = vmatprep.mubr.bf16.mxu1 %v1641_v52 }
 0x53a   : > { %v1578_v55 = vadd.f32 %v3816_v51, %v5457_v19  ;;  %v1623_v57 = vmax.f32 %v1575_v39, 0.0 }
 0x53c   : > { %v1624_v58 = vmax.f32 %v1578_v55, 0.0  ;;  %v3817_v59 = vpop.f32.mrb[120].mxu0 }
 0x53d   : > { %v3818_v60 = vpop.f32.mrb[121].mxu0 }
 0x53e   : > { %v3819_v61 = vadd.f32 %v3818_v60, %v3817_v59  ;;  %v3820_v62 = vpop.f32.mrb[122].mxu0  ;;  %v1642_v63 = vpack.c.bf16 %v1624_v58, %v1623_v57 }
 0x53f   : > { %v3821_v0 = vpop.f32.mrb[123].mxu0 }
 0x540   : > { %v1583_v2 = vadd.f32 %v3819_v61, %v5457_v19  ;;  %v3822_v4 = vadd.f32 %v3821_v0, %v3820_v62  ;;  %4338 = vmatmul.mubr.bf16.gmra.mrb[88].mxu1 %v1642_v63 }
 0x542   : > { %v1586_v5 = vadd.f32 %v3822_v4, %v5457_v19  ;;  %v1625_v6 = vmax.f32 %v1583_v2, 0.0 }
 0x544   : > { %v1626_v8 = vmax.f32 %v1586_v5, 0.0  ;;  %v3823_v10 = vpop.f32.mrb[124].mxu0 }
 0x545   : > { %v3824_v54 = vpop.f32.mrb[125].mxu0 }
 0x546   : > { %v3825_v12 = vadd.f32 %v3824_v54, %v3823_v10  ;;  %v3826_v38 = vpop.f32.mrb[126].mxu0  ;;  %v1643_v1 = vpack.c.bf16 %v1626_v8, %v1625_v6  ;;  %v4737_v8 = vld [vmem:[#allocation2 + $0xc0] sm:$0xff]   ;;  %v4738_v10 = vld [vmem:[#allocation2 + $0xc8] sm:$0xff]  }
 0x547   : > { %v3827_v3 = vpop.f32.mrb[127].mxu0  ;;  %4345 = vmatprep.subr.bf16.mxu0 %v4737_v8  ;;  %v4689_v54 = vld [vmem:[%s5232_s6 + $0x100] ss:$8 sps:$4 sm:$0xff]  }
 0x548   : > { %v1591_v42 = vadd.f32 %v3825_v12, %v5457_v19  ;;  %v3828_v24 = vadd.f32 %v3827_v3, %v3826_v38  ;;  %4341 = vmatprep.mubr.bf16.mxu1 %v1643_v1  ;;  %4346 = vmatpush3.bf16.msra.mxu0 %v4737_v8  ;;  %v4739_v12 = vld [vmem:[#allocation2 + $0xd0] sm:$0xff]  }
 0x549   : > { %4347 = vmatprep.subr.bf16.mxu0 %v4738_v10  ;;  %v4692_v38 = vld [vmem:[%s5232_s6 + $0x114] ss:$8 sps:$4 sm:$0xff]   ;;  %v4694_v1 = vld [vmem:[%s5232_s6 + $0x110] ss:$8 sps:$4 sm:$0xff]   ;;  %v4695_v3 = vld [vmem:[%s5232_s6 + $0x124] ss:$8 sps:$4 sm:$0xff]  }
 0x54a   : > { %v1594_v43 = vadd.f32 %v3828_v24, %v5457_v19  ;;  %v1627_v53 = vmax.f32 %v1591_v42, 0.0  ;;  %v4697_v42 = vld [vmem:[%s5232_s6 + $0x120] ss:$8 sps:$4 sm:$0xff]   ;;  %v4698_v24 = vld [vmem:[%s5232_s6 + $0x134] ss:$8 sps:$4 sm:$0xff]  }
 0x54c   : > { %v1628_v9 = vmax.f32 %v1594_v43, 0.0  ;;  %4348 = vmatpush3.bf16.msra.mxu0 %v4738_v10  ;;  %v4700_v43 = vld [vmem:[%s5232_s6 + $0x130] ss:$8 sps:$4 sm:$0xff]  }
 0x54d   : > { %4349 = vmatprep.subr.bf16.mxu0 %v4739_v12 }
 0x54e   : > { %v1644_v56 = vpack.c.bf16 %v1628_v9, %v1627_v53  ;;  %v4701_v53 = vld [vmem:[%s5232_s6 + $0x144] ss:$8 sps:$4 sm:$0xff]   ;;  %v4703_v9 = vld [vmem:[%s5232_s6 + $0x140] ss:$8 sps:$4 sm:$0xff]  }
 0x550   : > { %4342 = vmatmul.mubr.bf16.gmra.mrb[92].mxu1 %v1644_v56  ;;  %4350 = vmatpush3.bf16.msra.mxu0 %v4739_v12  ;;  %v4704_v56 = vld [vmem:[%s5232_s6 + $0x154] ss:$8 sps:$4 sm:$0xff]  }
 0x551   : > { %2066 = vmatprep.mubr.bf16.mxu1 %v4691_v7  ;;  %v4706_v7 = vld [vmem:[%s5232_s6 + $0x150] ss:$8 sps:$4 sm:$0xff]  }
 0x5b3   : > { %v4315_v11 = vpop.f32.mrb[64].mxu1 }
 0x5b4   : > { %v1727_v13 = vpop.f32.mrb[65].mxu1 }
 0x5b5   : > { %v4316_v14 = vpop.f32.mrb[66].mxu1 }
 0x5b6   : > { %v1855_v15 = vpack.c.bf16 %v4316_v14, %v4315_v11  ;;  %v1730_v16 = vpop.f32.mrb[67].mxu1  ;;  %v4707_v11 = vld [vmem:[%s5232_s6 + $0x164] ss:$8 sps:$4 sm:$0xff]   ;;  %v4710_v14 = vld [vmem:[%s5232_s6 + $0x174] ss:$8 sps:$4 sm:$0xff]  }
 0x5b7   : > { %v1854_v17 = vpack.c.bf16 %v1730_v16, %v1727_v13  ;;  %v4709_v13 = vld [vmem:[%s5232_s6 + $0x160] ss:$8 sps:$4 sm:$0xff]   ;;  %v4713_v16 = vld [vmem:[%s5232_s6 + $0x184] ss:$8 sps:$4 sm:$0xff]  }
 0x5c3   : > { %v4319_v18 = vpop.f32.mrb[68].mxu1 }
 0x5c4   : > { %v1743_v20 = vpop.f32.mrb[69].mxu1 }
 0x5c5   : > { %v4320_v21 = vpop.f32.mrb[70].mxu1 }
 0x5c6   : > { %v1857_v22 = vpack.c.bf16 %v4320_v21, %v4319_v18  ;;  %v1746_v23 = vpop.f32.mrb[71].mxu1  ;;  %v4716_v18 = vld [vmem:[%s5232_s6 + $0x194] ss:$8 sps:$4 sm:$0xff]   ;;  %v4719_v21 = vld [vmem:[%s5232_s6 + $0x1a4] ss:$8 sps:$4 sm:$0xff]  }
 0x5c7   : > { %v1856_v25 = vpack.c.bf16 %v1746_v23, %v1743_v20  ;;  %v4718_v20 = vld [vmem:[%s5232_s6 + $0x190] ss:$8 sps:$4 sm:$0xff]   ;;  %v4722_v23 = vld [vmem:[%s5232_s6 + $0x1b4] ss:$8 sps:$4 sm:$0xff]  }
 0x5d3   : > { %v4323_v26 = vpop.f32.mrb[72].mxu1 }
 0x5d4   : > { %v1759_v19 = vpop.f32.mrb[73].mxu1 }
 0x5d5   : > { %v4324_v27 = vpop.f32.mrb[74].mxu1 }
 0x5d6   : > { %v1859_v28 = vpack.c.bf16 %v4324_v27, %v4323_v26  ;;  %v1762_v29 = vpop.f32.mrb[75].mxu1  ;;  %v4724_v26 = vld [vmem:[%s5232_s6 + $0x1b0] ss:$8 sps:$4 sm:$0xff]  }
 0x5d7   : > { %v1858_v30 = vpack.c.bf16 %v1762_v29, %v1759_v19  ;;  %v4725_v19 = vld [vmem:[%s5232_s6 + $0x1c4] ss:$8 sps:$4 sm:$0xff]   ;;  %v4727_v29 = vld [vmem:[%s5232_s6 + $0x1c0] ss:$8 sps:$4 sm:$0xff]  }
 0x5d8   : > { %v4741_v27 = vld [vmem:[#allocation2 + $0xe0] sm:$0xff]  }
 0x5e3   : > { %v4327_v31 = vpop.f32.mrb[76].mxu1 }
 0x5e4   : > { %v1775_v32 = vpop.f32.mrb[77].mxu1 }
 0x5e5   : > { %v4328_v33 = vpop.f32.mrb[78].mxu1 }
 0x5e6   : > { %v1861_v34 = vpack.c.bf16 %v4328_v33, %v4327_v31  ;;  %v1778_v36 = vpop.f32.mrb[79].mxu1  ;;  %v4743_v31 = vld [vmem:[#allocation2 + $0xf0] sm:$0xff]  }
 0x5e7   : > { %v1860_v37 = vpack.c.bf16 %v1778_v36, %v1775_v32  ;;  %v4744_v32 = vld [vmem:[#allocation2 + $0xf8] sm:$0xff]  }
 0x5e8   : > { %v4730_v33 = vld [vmem:[%s5232_s6 + $0x1d0] ss:$8 sps:$4 sm:$0xff]   ;;  %v4733_v36 = vld [vmem:[%s5232_s6 + $0x1e0] ss:$8 sps:$4 sm:$0xff]  }
 0x5f3   : > { %v4331_v40 = vpop.f32.mrb[80].mxu1 }
 0x5f4   : > { %v1791_v41 = vpop.f32.mrb[81].mxu1 }
 0x5f5   : > { %v4332_v44 = vpop.f32.mrb[82].mxu1 }
 0x5f6   : > { %v1863_v45 = vpack.c.bf16 %v4332_v44, %v4331_v40  ;;  %v1794_v46 = vpop.f32.mrb[83].mxu1  ;;  %v4736_v40 = vld [vmem:[%s5232_s6 + $0x1f0] ss:$8 sps:$4 sm:$0xff]  }
 0x5f7   : > { %v1862_v47 = vpack.c.bf16 %v1794_v46, %v1791_v41  ;;  %v1872_v41 = vsub.s32 2, %v5383_v50 }
 0x5f9   : > { %3853 = vmatprep.subr.bf16.mxu1 %v1862_v47 }
 0x5fa   : > { %3854 = vmatpush3.bf16.msra.mxu1 %v1854_v17  ;;  %v4715_v17 = vld [vmem:[%s5232_s6 + $0x180] ss:$8 sps:$4 sm:$0xff]  }
 0x5fb   : > { %3855 = vmatprep.subr.bf16.mxu1 %v1863_v45  ;;  %v5524_v45 = vld [vmem:[#allocation7] sm:$0xff] }
 0x5fc   : > { %v5527_v46 = vrot.slane %v5524_v45, %v1872_v41 }
 0x5fe   : > { %3856 = vmatpush3.bf16.msra.mxu1 %v1855_v15  ;;  %v4712_v15 = vld [vmem:[%s5232_s6 + $0x170] ss:$8 sps:$4 sm:$0xff]  }
 0x603   : > { %v4335_v48 = vpop.f32.mrb[84].mxu1 }
 0x604   : > { %v1807_v52 = vpop.f32.mrb[85].mxu1 }
 0x605   : > { %v4336_v35 = vpop.f32.mrb[86].mxu1 }
 0x606   : > { %v1865_v39 = vpack.c.bf16 %v4336_v35, %v4335_v48  ;;  %v1810_v51 = vpop.f32.mrb[87].mxu1 }
 0x607   : > { %v1864_v55 = vpack.c.bf16 %v1810_v51, %v1807_v52 }
 0x609   : > { %3857 = vmatprep.subr.bf16.mxu1 %v1864_v55 }
 0x60a   : > { %3858 = vmatpush3.bf16.msra.mxu1 %v1856_v25  ;;  %v4740_v25 = vld [vmem:[#allocation2 + $0xd8] sm:$0xff]  }
 0x60b   : > { %3859 = vmatprep.subr.bf16.mxu1 %v1865_v39  ;;  %4351 = vmatprep.subr.bf16.mxu0 %v4740_v25 }
 0x60c   : > { %4352 = vmatpush3.bf16.msra.mxu0 %v4740_v25 }
 0x60d   : > { %4353 = vmatprep.subr.bf16.mxu0 %v4741_v27 }
 0x60e   : > { %3860 = vmatpush3.bf16.msra.mxu1 %v1857_v22  ;;  %v4721_v22 = vld [vmem:[%s5232_s6 + $0x1a0] ss:$8 sps:$4 sm:$0xff]  }
 0x610   : > { %4354 = vmatpush3.bf16.msra.mxu0 %v4741_v27 }
 0x613   : > { %v4339_v57 = vpop.f32.mrb[88].mxu1 }
 0x614   : > { %v1823_v58 = vpop.f32.mrb[89].mxu1 }
 0x615   : > { %v4340_v59 = vpop.f32.mrb[90].mxu1 }
 0x616   : > { %v1867_v60 = vpack.c.bf16 %v4340_v59, %v4339_v57  ;;  %v1826_v61 = vpop.f32.mrb[91].mxu1 }
 0x617   : > { %v1866_v62 = vpack.c.bf16 %v1826_v61, %v1823_v58 }
 0x619   : > { %3861 = vmatprep.subr.bf16.mxu1 %v1866_v62 }
 0x61a   : > { %3862 = vmatpush3.bf16.msra.mxu1 %v1858_v30  ;;  %v4728_v30 = vld [vmem:[%s5232_s6 + $0x1d4] ss:$8 sps:$4 sm:$0xff]  }
 0x61b   : > { %3863 = vmatprep.subr.bf16.mxu1 %v1867_v60 }
 0x61e   : > { %3864 = vmatpush3.bf16.msra.mxu1 %v1859_v28  ;;  %v4742_v28 = vld [vmem:[#allocation2 + $0xe8] sm:$0xff]  }
 0x61f   : > { %4355 = vmatprep.subr.bf16.mxu0 %v4742_v28 }
 0x620   : > { %4356 = vmatpush3.bf16.msra.mxu0 %v4742_v28 }
 0x621   : > { %4357 = vmatprep.subr.bf16.mxu0 %v4743_v31 }
 0x623   : > { %v4343_v63 = vpop.f32.mrb[92].mxu1 }
 0x624   : > { %v1839_v0 = vpop.f32.mrb[93].mxu1  ;;  %4358 = vmatpush3.bf16.msra.mxu0 %v4743_v31 }
 0x625   : > { %v4344_v2 = vpop.f32.mrb[94].mxu1  ;;  %4359 = vmatprep.subr.bf16.mxu0 %v4744_v32 }
 0x626   : > { %v1869_v4 = vpack.c.bf16 %v4344_v2, %v4343_v63  ;;  %v1842_v5 = vpop.f32.mrb[95].mxu1 }
 0x627   : > { %v1868_v6 = vpack.c.bf16 %v1842_v5, %v1839_v0 }
 0x628   : > { %4360 = vmatpush3.bf16.msra.mxu0 %v4744_v32 }
 0x629   : > { %3865 = vmatprep.subr.bf16.mxu1 %v1868_v6 }
 0x62a   : > { %3866 = vmatpush3.bf16.msra.mxu1 %v1860_v37  ;;  %v4734_v37 = vld [vmem:[%s5232_s6 + $0x1f4] ss:$8 sps:$4 sm:$0xff]  }
 0x62b   : > { %3867 = vmatprep.subr.bf16.mxu1 %v1869_v4 }
 0x62e   : > { %3868 = vmatpush3.bf16.msra.mxu1 %v1861_v34  ;;  %v4731_v34 = vld [vmem:[%s5232_s6 + $0x1e4] ss:$8 sps:$4 sm:$0xff]  }
 0x631   : > { %2067 = vmatmul.mubr.bf16.vlgmr.msra.gmra.mrb[96].mxu1 %v4689_v54 }
 0x632   : > { %2074 = vmatprep.mubr.bf16.mxu1 %v4692_v38 }
 0x639   : > { %2075 = vmatmul.mubr.bf16.gmra.mrb[100].mxu1 %v4694_v1 }
 0x63a   : > { %2082 = vmatprep.mubr.bf16.mxu1 %v4695_v3 }
 0x641   : > { %2083 = vmatmul.mubr.bf16.gmra.mrb[104].mxu1 %v4697_v42 }
 0x642   : > { %2090 = vmatprep.mubr.bf16.mxu1 %v4698_v24 }
 0x649   : > { %2091 = vmatmul.mubr.bf16.gmra.mrb[108].mxu1 %v4700_v43 }
 0x64a   : > { %2098 = vmatprep.mubr.bf16.mxu1 %v4701_v53 }
 0x651   : > { %2099 = vmatmul.mubr.bf16.gmra.mrb[112].mxu1 %v4703_v9 }
 0x652   : > { %2106 = vmatprep.mubr.bf16.mxu1 %v4704_v56 }
 0x659   : > { %2107 = vmatmul.mubr.bf16.gmra.mrb[116].mxu1 %v4706_v7 }
 0x65a   : > { %2114 = vmatprep.mubr.bf16.mxu1 %v4707_v11 }
 0x661   : > { %2115 = vmatmul.mubr.bf16.gmra.mrb[120].mxu1 %v4709_v13 }
 0x662   : > { %2122 = vmatprep.mubr.bf16.mxu1 %v4710_v14 }
 0x669   : > { %2123 = vmatmul.mubr.bf16.gmra.mrb[124].mxu1 %v4712_v15 }
 0x66a   : > { %2130 = vmatprep.mubr.bf16.mxu1 %v4713_v16 }
 0x671   : > { %2131 = vmatmul.mubr.bf16.gmra.mrb[128].mxu1 %v4715_v17 }
 0x672   : > { %2138 = vmatprep.mubr.bf16.mxu1 %v4716_v18 }
 0x679   : > { %2139 = vmatmul.mubr.bf16.gmra.mrb[132].mxu1 %v4718_v20 }
 0x67a   : > { %2146 = vmatprep.mubr.bf16.mxu1 %v4719_v21 }
 0x681   : > { %2147 = vmatmul.mubr.bf16.gmra.mrb[136].mxu1 %v4721_v22 }
 0x682   : > { %2154 = vmatprep.mubr.bf16.mxu1 %v4722_v23 }
 0x689   : > { %2155 = vmatmul.mubr.bf16.gmra.mrb[140].mxu1 %v4724_v26 }
 0x68a   : > { %2162 = vmatprep.mubr.bf16.mxu1 %v4725_v19 }
 0x691   : > { %2163 = vmatmul.mubr.bf16.gmra.mrb[144].mxu1 %v4727_v29 }
 0x692   : > { %2170 = vmatprep.mubr.bf16.mxu1 %v4728_v30 }
 0x699   : > { %2171 = vmatmul.mubr.bf16.gmra.mrb[148].mxu1 %v4730_v33 }
 0x69a   : > { %2178 = vmatprep.mubr.bf16.mxu1 %v4731_v34 }
 0x6a1   : > { %2179 = vmatmul.mubr.bf16.gmra.mrb[152].mxu1 %v4733_v36 }
 0x6a2   : > { %2186 = vmatprep.mubr.bf16.mxu1 %v4734_v37 }
 0x6a9   : > { %2187 = vmatmul.mubr.bf16.gmra.mrb[156].mxu1 %v4736_v40 }
 0x704   : > { %v3869_v44 = vpop.f32.mrb[96].mxu1 }
 0x705   : > { %v3870_v47 = vpop.f32.mrb[97].mxu1 }
 0x706   : > { %v3871_v48 = vadd.f32 %v3870_v47, %v3869_v44  ;;  %v3872_v52 = vpop.f32.mrb[98].mxu1 }
 0x707   : > { %v3873_v35 = vpop.f32.mrb[99].mxu1 }
 0x708   : > { %v2069_v39 = vadd.f32 %v3871_v48, %v5527_v46  ;;  %v3874_v51 = vadd.f32 %v3873_v35, %v3872_v52 }
 0x70a   : > { %v2072_v55 = vadd.f32 %v3874_v51, %v5527_v46  ;;  %v2195_v57 = vmax.f32 %v2069_v39, 0.0 }
 0x70c   : > { %v2196_v58 = vmax.f32 %v2072_v55, 0.0  ;;  %v3875_v59 = vpop.f32.mrb[100].mxu1 }
 0x70d   : > { %v3876_v60 = vpop.f32.mrb[101].mxu1 }
 0x70e   : > { %v3877_v61 = vadd.f32 %v3876_v60, %v3875_v59  ;;  %v3878_v62 = vpop.f32.mrb[102].mxu1  ;;  %v2227_v63 = vpack.c.bf16 %v2196_v58, %v2195_v57 }
 0x70f   : > { %v3879_v0 = vpop.f32.mrb[103].mxu1 }
 0x710   : > { %v2077_v2 = vadd.f32 %v3877_v61, %v5527_v46  ;;  %v3880_v4 = vadd.f32 %v3879_v0, %v3878_v62  ;;  %4361 = vmatprep.mubr.bf16.mxu0 %v2227_v63 }
 0x712   : > { %v2080_v5 = vadd.f32 %v3880_v4, %v5527_v46  ;;  %v2197_v6 = vmax.f32 %v2077_v2, 0.0 }
 0x714   : > { %v2198_v8 = vmax.f32 %v2080_v5, 0.0  ;;  %v3881_v10 = vpop.f32.mrb[104].mxu1 }
 0x715   : > { %v3882_v54 = vpop.f32.mrb[105].mxu1 }
 0x716   : > { %v2228_v12 = vpack.c.bf16 %v2198_v8, %v2197_v6  ;;  %v3883_v38 = vadd.f32 %v3882_v54, %v3881_v10  ;;  %v3884_v1 = vpop.f32.mrb[106].mxu1 }
 0x717   : > { %v3885_v3 = vpop.f32.mrb[107].mxu1 }
 0x718   : > { %v2085_v42 = vadd.f32 %v3883_v38, %v5527_v46  ;;  %v3886_v24 = vadd.f32 %v3885_v3, %v3884_v1  ;;  %4362 = vmatmul.mubr.bf16.vlgmr.msra.gmra.mrb[128].mxu0 %v2228_v12 }
 0x71a   : > { %v2088_v43 = vadd.f32 %v3886_v24, %v5527_v46  ;;  %v2199_v53 = vmax.f32 %v2085_v42, 0.0 }
 0x71c   : > { %v2200_v9 = vmax.f32 %v2088_v43, 0.0  ;;  %v3887_v56 = vpop.f32.mrb[108].mxu1 }
 0x71d   : > { %v3888_v7 = vpop.f32.mrb[109].mxu1 }
 0x71e   : > { %v3889_v11 = vadd.f32 %v3888_v7, %v3887_v56  ;;  %v3890_v13 = vpop.f32.mrb[110].mxu1  ;;  %v2229_v14 = vpack.c.bf16 %v2200_v9, %v2199_v53 }
 0x71f   : > { %v3891_v15 = vpop.f32.mrb[111].mxu1 }
 0x720   : > { %v2093_v16 = vadd.f32 %v3889_v11, %v5527_v46  ;;  %v3892_v17 = vadd.f32 %v3891_v15, %v3890_v13  ;;  %4365 = vmatprep.mubr.bf16.mxu0 %v2229_v14 }
 0x722   : > { %v2096_v18 = vadd.f32 %v3892_v17, %v5527_v46  ;;  %v2201_v20 = vmax.f32 %v2093_v16, 0.0 }
 0x724   : > { %v2202_v21 = vmax.f32 %v2096_v18, 0.0  ;;  %v3893_v22 = vpop.f32.mrb[112].mxu1 }
 0x725   : > { %v3894_v23 = vpop.f32.mrb[113].mxu1 }
 0x726   : > { %v3895_v25 = vadd.f32 %v3894_v23, %v3893_v22  ;;  %v3896_v26 = vpop.f32.mrb[114].mxu1  ;;  %v2230_v19 = vpack.c.bf16 %v2202_v21, %v2201_v20 }
 0x727   : > { %v3897_v27 = vpop.f32.mrb[115].mxu1 }
 0x728   : > { %v2101_v28 = vadd.f32 %v3895_v25, %v5527_v46  ;;  %v3898_v29 = vadd.f32 %v3897_v27, %v3896_v26  ;;  %4366 = vmatmul.mubr.bf16.gmra.mrb[132].mxu0 %v2230_v19 }
 0x72a   : > { %v2104_v30 = vadd.f32 %v3898_v29, %v5527_v46  ;;  %v2203_v31 = vmax.f32 %v2101_v28, 0.0 }
 0x72c   : > { %v2204_v32 = vmax.f32 %v2104_v30, 0.0  ;;  %v3899_v33 = vpop.f32.mrb[116].mxu1 }
 0x72d   : > { %v3900_v34 = vpop.f32.mrb[117].mxu1 }
 0x72e   : > { %v3901_v36 = vadd.f32 %v3900_v34, %v3899_v33  ;;  %v3902_v37 = vpop.f32.mrb[118].mxu1  ;;  %v2231_v40 = vpack.c.bf16 %v2204_v32, %v2203_v31 }
 0x72f   : > { %v3903_v41 = vpop.f32.mrb[119].mxu1 }
 0x730   : > { %v2109_v44 = vadd.f32 %v3901_v36, %v5527_v46  ;;  %v3904_v47 = vadd.f32 %v3903_v41, %v3902_v37  ;;  %4369 = vmatprep.mubr.bf16.mxu0 %v2231_v40 }
 0x732   : > { %v2112_v48 = vadd.f32 %v3904_v47, %v5527_v46  ;;  %v2205_v52 = vmax.f32 %v2109_v44, 0.0 }
 0x734   : > { %v2206_v35 = vmax.f32 %v2112_v48, 0.0  ;;  %v3905_v39 = vpop.f32.mrb[120].mxu1 }
 0x735   : > { %v3906_v51 = vpop.f32.mrb[121].mxu1 }
 0x736   : > { %v3907_v55 = vadd.f32 %v3906_v51, %v3905_v39  ;;  %v3908_v57 = vpop.f32.mrb[122].mxu1  ;;  %v2232_v58 = vpack.c.bf16 %v2206_v35, %v2205_v52 }
 0x737   : > { %v3909_v59 = vpop.f32.mrb[123].mxu1 }
 0x738   : > { %v2117_v60 = vadd.f32 %v3907_v55, %v5527_v46  ;;  %v3910_v61 = vadd.f32 %v3909_v59, %v3908_v57  ;;  %4370 = vmatmul.mubr.bf16.gmra.mrb[136].mxu0 %v2232_v58 }
 0x73a   : > { %v2120_v62 = vadd.f32 %v3910_v61, %v5527_v46  ;;  %v2207_v63 = vmax.f32 %v2117_v60, 0.0 }
 0x73c   : > { %v2208_v0 = vmax.f32 %v2120_v62, 0.0  ;;  %v3911_v2 = vpop.f32.mrb[124].mxu1 }
 0x73d   : > { %v3912_v4 = vpop.f32.mrb[125].mxu1 }
 0x73e   : > { %v3913_v5 = vadd.f32 %v3912_v4, %v3911_v2  ;;  %v3914_v6 = vpop.f32.mrb[126].mxu1  ;;  %v2233_v8 = vpack.c.bf16 %v2208_v0, %v2207_v63 }
 0x73f   : > { %v3915_v10 = vpop.f32.mrb[127].mxu1 }
 0x740   : > { %v2125_v54 = vadd.f32 %v3913_v5, %v5527_v46  ;;  %v3916_v12 = vadd.f32 %v3915_v10, %v3914_v6  ;;  %4373 = vmatprep.mubr.bf16.mxu0 %v2233_v8 }
 0x742   : > { %v2128_v38 = vadd.f32 %v3916_v12, %v5527_v46  ;;  %v2209_v1 = vmax.f32 %v2125_v54, 0.0 }
 0x744   : > { %v2210_v3 = vmax.f32 %v2128_v38, 0.0  ;;  %v3917_v42 = vpop.f32.mrb[128].mxu1 }
 0x745   : > { %v3918_v24 = vpop.f32.mrb[129].mxu1 }
 0x746   : > { %v3919_v43 = vadd.f32 %v3918_v24, %v3917_v42  ;;  %v3920_v53 = vpop.f32.mrb[130].mxu1  ;;  %v2234_v9 = vpack.c.bf16 %v2210_v3, %v2209_v1 }
 0x747   : > { %v3921_v56 = vpop.f32.mrb[131].mxu1 }
 0x748   : > { %v2133_v7 = vadd.f32 %v3919_v43, %v5527_v46  ;;  %v3922_v11 = vadd.f32 %v3921_v56, %v3920_v53  ;;  %4374 = vmatmul.mubr.bf16.gmra.mrb[140].mxu0 %v2234_v9 }
 0x74a   : > { %v2136_v13 = vadd.f32 %v3922_v11, %v5527_v46  ;;  %v2211_v14 = vmax.f32 %v2133_v7, 0.0 }
 0x74c   : > { %v2212_v15 = vmax.f32 %v2136_v13, 0.0  ;;  %v3923_v16 = vpop.f32.mrb[132].mxu1 }
 0x74d   : > { %v3924_v17 = vpop.f32.mrb[133].mxu1 }
 0x74e   : > { %v3925_v18 = vadd.f32 %v3924_v17, %v3923_v16  ;;  %v3926_v20 = vpop.f32.mrb[134].mxu1  ;;  %v2235_v21 = vpack.c.bf16 %v2212_v15, %v2211_v14 }
 0x74f   : > { %v3927_v22 = vpop.f32.mrb[135].mxu1 }
 0x750   : > { %v2141_v23 = vadd.f32 %v3925_v18, %v5527_v46  ;;  %v3928_v25 = vadd.f32 %v3927_v22, %v3926_v20  ;;  %4377 = vmatprep.mubr.bf16.mxu0 %v2235_v21 }
 0x752   : > { %v2144_v26 = vadd.f32 %v3928_v25, %v5527_v46  ;;  %v2213_v19 = vmax.f32 %v2141_v23, 0.0 }
 0x754   : > { %v2214_v27 = vmax.f32 %v2144_v26, 0.0  ;;  %v3929_v28 = vpop.f32.mrb[136].mxu1 }
 0x755   : > { %v3930_v29 = vpop.f32.mrb[137].mxu1 }
 0x756   : > { %v3931_v30 = vadd.f32 %v3930_v29, %v3929_v28  ;;  %v3932_v31 = vpop.f32.mrb[138].mxu1  ;;  %v2236_v32 = vpack.c.bf16 %v2214_v27, %v2213_v19 }
 0x757   : > { %v3933_v33 = vpop.f32.mrb[139].mxu1 }
 0x758   : > { %v2149_v34 = vadd.f32 %v3931_v30, %v5527_v46  ;;  %v3934_v36 = vadd.f32 %v3933_v33, %v3932_v31  ;;  %4378 = vmatmul.mubr.bf16.gmra.mrb[144].mxu0 %v2236_v32 }
 0x75a   : > { %v2152_v37 = vadd.f32 %v3934_v36, %v5527_v46  ;;  %v2215_v40 = vmax.f32 %v2149_v34, 0.0  ;;  %v4762_v36 = vld [vmem:[%s5232_s6 + $0x4] ss:$8 sps:$4 sm:$0xff]  }
 0x75c   : > { %v2216_v41 = vmax.f32 %v2152_v37, 0.0  ;;  %v3935_v44 = vpop.f32.mrb[140].mxu1 }
 0x75d   : > { %v3936_v47 = vpop.f32.mrb[141].mxu1 }
 0x75e   : > { %v3937_v48 = vadd.f32 %v3936_v47, %v3935_v44  ;;  %v3938_v52 = vpop.f32.mrb[142].mxu1  ;;  %v2237_v35 = vpack.c.bf16 %v2216_v41, %v2215_v40 }
 0x75f   : > { %v3939_v39 = vpop.f32.mrb[143].mxu1 }
 0x760   : > { %v2157_v51 = vadd.f32 %v3937_v48, %v5527_v46  ;;  %v3940_v55 = vadd.f32 %v3939_v39, %v3938_v52  ;;  %4381 = vmatprep.mubr.bf16.mxu0 %v2237_v35 }
 0x762   : > { %v2160_v57 = vadd.f32 %v3940_v55, %v5527_v46  ;;  %v2217_v58 = vmax.f32 %v2157_v51, 0.0 }
 0x764   : > { %v2218_v59 = vmax.f32 %v2160_v57, 0.0  ;;  %v3941_v60 = vpop.f32.mrb[144].mxu1 }
 0x765   : > { %v3942_v61 = vpop.f32.mrb[145].mxu1 }
 0x766   : > { %v3943_v62 = vadd.f32 %v3942_v61, %v3941_v60  ;;  %v3944_v63 = vpop.f32.mrb[146].mxu1  ;;  %v2238_v0 = vpack.c.bf16 %v2218_v59, %v2217_v58 }
 0x767   : > { %v3945_v2 = vpop.f32.mrb[147].mxu1 }
 0x768   : > { %v2165_v4 = vadd.f32 %v3943_v62, %v5527_v46  ;;  %v3946_v5 = vadd.f32 %v3945_v2, %v3944_v63  ;;  %4382 = vmatmul.mubr.bf16.gmra.mrb[148].mxu0 %v2238_v0 }
 0x76a   : > { %v2168_v6 = vadd.f32 %v3946_v5, %v5527_v46  ;;  %v2219_v8 = vmax.f32 %v2165_v4, 0.0 }
 0x76c   : > { %v2220_v10 = vmax.f32 %v2168_v6, 0.0  ;;  %v3947_v54 = vpop.f32.mrb[148].mxu1 }
 0x76d   : > { %v3948_v12 = vpop.f32.mrb[149].mxu1 }
 0x76e   : > { %v3949_v38 = vadd.f32 %v3948_v12, %v3947_v54  ;;  %v3950_v1 = vpop.f32.mrb[150].mxu1  ;;  %v2239_v3 = vpack.c.bf16 %v2220_v10, %v2219_v8 }
 0x76f   : > { %v3951_v42 = vpop.f32.mrb[151].mxu1 }
 0x770   : > { %v2173_v24 = vadd.f32 %v3949_v38, %v5527_v46  ;;  %v3952_v43 = vadd.f32 %v3951_v42, %v3950_v1  ;;  %4385 = vmatprep.mubr.bf16.mxu0 %v2239_v3 }
 0x772   : > { %v2176_v53 = vadd.f32 %v3952_v43, %v5527_v46  ;;  %v2221_v9 = vmax.f32 %v2173_v24, 0.0 }
 0x774   : > { %v2222_v56 = vmax.f32 %v2176_v53, 0.0  ;;  %v3953_v7 = vpop.f32.mrb[152].mxu1 }
 0x775   : > { %v3954_v11 = vpop.f32.mrb[153].mxu1 }
 0x776   : > { %v3955_v13 = vadd.f32 %v3954_v11, %v3953_v7  ;;  %v3956_v14 = vpop.f32.mrb[154].mxu1  ;;  %v2240_v15 = vpack.c.bf16 %v2222_v56, %v2221_v9 }
 0x777   : > { %v3957_v16 = vpop.f32.mrb[155].mxu1 }
 0x778   : > { %v2181_v17 = vadd.f32 %v3955_v13, %v5527_v46  ;;  %v3958_v18 = vadd.f32 %v3957_v16, %v3956_v14  ;;  %4386 = vmatmul.mubr.bf16.gmra.mrb[152].mxu0 %v2240_v15 }
 0x77a   : > { %v2184_v20 = vadd.f32 %v3958_v18, %v5527_v46  ;;  %v2223_v21 = vmax.f32 %v2181_v17, 0.0 }
 0x77c   : > { %v2224_v22 = vmax.f32 %v2184_v20, 0.0  ;;  %v3959_v23 = vpop.f32.mrb[156].mxu1 }
 0x77d   : > { %v3960_v25 = vpop.f32.mrb[157].mxu1 }
 0x77e   : > { %v3961_v26 = vadd.f32 %v3960_v25, %v3959_v23  ;;  %v3962_v19 = vpop.f32.mrb[158].mxu1  ;;  %v2241_v27 = vpack.c.bf16 %v2224_v22, %v2223_v21  ;;  %v4745_v23 = vld [vmem:[#allocation2 + $0x100] sm:$0xff]   ;;  %v4746_v25 = vld [vmem:[#allocation2 + $0x108] sm:$0xff]  }
 0x77f   : > { %v3963_v28 = vpop.f32.mrb[159].mxu1  ;;  %4393 = vmatprep.subr.bf16.mxu1 %v4745_v23 }
 0x780   : > { %v2189_v29 = vadd.f32 %v3961_v26, %v5527_v46  ;;  %v3964_v30 = vadd.f32 %v3963_v28, %v3962_v19  ;;  %4389 = vmatprep.mubr.bf16.mxu0 %v2241_v27  ;;  %4394 = vmatpush3.bf16.msra.mxu1 %v4745_v23  ;;  %v4747_v26 = vld [vmem:[#allocation2 + $0x110] sm:$0xff]   ;;  %v4748_v27 = vld [vmem:[#allocation2 + $0x118] sm:$0xff]  }
 0x781   : > { %4395 = vmatprep.subr.bf16.mxu1 %v4746_v25  ;;  %v4763_v19 = vld [vmem:[%s5232_s6] ss:$8 sps:$4 sm:$0xff]   ;;  %v4764_v28 = vld [vmem:[%s5232_s6 + $0x14] ss:$8 sps:$4 sm:$0xff]  }
 0x782   : > { %v2192_v31 = vadd.f32 %v3964_v30, %v5527_v46  ;;  %v2225_v32 = vmax.f32 %v2189_v29, 0.0  ;;  %v4765_v29 = vld [vmem:[%s5232_s6 + $0x10] ss:$8 sps:$4 sm:$0xff]   ;;  %v4766_v30 = vld [vmem:[%s5232_s6 + $0x24] ss:$8 sps:$4 sm:$0xff]  }
 0x784   : > { %v2226_v33 = vmax.f32 %v2192_v31, 0.0  ;;  %4396 = vmatpush3.bf16.msra.mxu1 %v4746_v25  ;;  %v4767_v31 = vld [vmem:[%s5232_s6 + $0x20] ss:$8 sps:$4 sm:$0xff]  }
 0x785   : > { %4397 = vmatprep.subr.bf16.mxu1 %v4747_v26 }
 0x786   : > { %v2242_v34 = vpack.c.bf16 %v2226_v33, %v2225_v32  ;;  %v4768_v32 = vld [vmem:[%s5232_s6 + $0x34] ss:$8 sps:$4 sm:$0xff]   ;;  %v4769_v33 = vld [vmem:[%s5232_s6 + $0x30] ss:$8 sps:$4 sm:$0xff]  }
 0x788   : > { %4390 = vmatmul.mubr.bf16.gmra.mrb[156].mxu0 %v2242_v34  ;;  %4398 = vmatpush3.bf16.msra.mxu1 %v4747_v26  ;;  %v4770_v34 = vld [vmem:[%s5232_s6 + $0x44] ss:$8 sps:$4 sm:$0xff]  }
 0x789   : > { %2504 = vmatprep.mubr.bf16.mxu0 %v4762_v36  ;;  %4399 = vmatprep.subr.bf16.mxu1 %v4748_v27  ;;  %v4771_v36 = vld [vmem:[%s5232_s6 + $0x40] ss:$8 sps:$4 sm:$0xff]  }
 0x78c   : > { %4400 = vmatpush3.bf16.msra.mxu1 %v4748_v27 }
 0x7eb   : > { %v4363_v37 = vpop.f32.mrb[128].mxu0 }
 0x7ec   : > { %v2325_v40 = vpop.f32.mrb[129].mxu0 }
 0x7ed   : > { %v4364_v41 = vpop.f32.mrb[130].mxu0 }
 0x7ee   : > { %v2453_v44 = vpack.c.bf16 %v4364_v41, %v4363_v37  ;;  %v2328_v47 = vpop.f32.mrb[131].mxu0  ;;  %v4772_v37 = vld [vmem:[%s5232_s6 + $0x54] ss:$8 sps:$4 sm:$0xff]   ;;  %v4774_v41 = vld [vmem:[%s5232_s6 + $0x64] ss:$8 sps:$4 sm:$0xff]  }
 0x7ef   : > { %v2452_v48 = vpack.c.bf16 %v2328_v47, %v2325_v40  ;;  %v4773_v40 = vld [vmem:[%s5232_s6 + $0x50] ss:$8 sps:$4 sm:$0xff]   ;;  %v4776_v47 = vld [vmem:[%s5232_s6 + $0x74] ss:$8 sps:$4 sm:$0xff]  }
 0x7fb   : > { %v4367_v52 = vpop.f32.mrb[132].mxu0 }
 0x7fc   : > { %v2341_v35 = vpop.f32.mrb[133].mxu0 }
 0x7fd   : > { %v4368_v39 = vpop.f32.mrb[134].mxu0 }
 0x7fe   : > { %v2455_v51 = vpack.c.bf16 %v4368_v39, %v4367_v52  ;;  %v2344_v55 = vpop.f32.mrb[135].mxu0  ;;  %v4778_v52 = vld [vmem:[%s5232_s6 + $0x84] ss:$8 sps:$4 sm:$0xff]   ;;  %v4780_v39 = vld [vmem:[%s5232_s6 + $0x94] ss:$8 sps:$4 sm:$0xff]  }
 0x7ff   : > { %v2454_v57 = vpack.c.bf16 %v2344_v55, %v2341_v35  ;;  %v4779_v35 = vld [vmem:[%s5232_s6 + $0x80] ss:$8 sps:$4 sm:$0xff]   ;;  %v4782_v55 = vld [vmem:[%s5232_s6 + $0xa4] ss:$8 sps:$4 sm:$0xff]  }
 0x80b   : > { %v4371_v58 = vpop.f32.mrb[136].mxu0 }
 0x80c   : > { %v2357_v46 = vpop.f32.mrb[137].mxu0 }
 0x80d   : > { %v4372_v59 = vpop.f32.mrb[138].mxu0 }
 0x80e   : > { %v2457_v60 = vpack.c.bf16 %v4372_v59, %v4371_v58  ;;  %v2360_v61 = vpop.f32.mrb[139].mxu0  ;;  %v4784_v58 = vld [vmem:[%s5232_s6 + $0xb4] ss:$8 sps:$4 sm:$0xff]   ;;  %v4785_v59 = vld [vmem:[%s5232_s6 + $0xb0] ss:$8 sps:$4 sm:$0xff]  }
 0x80f   : > { %v2456_v62 = vpack.c.bf16 %v2360_v61, %v2357_v46  ;;  %v4749_v46 = vld [vmem:[#allocation2 + $0x120] sm:$0xff]   ;;  %v4750_v61 = vld [vmem:[#allocation2 + $0x128] sm:$0xff]  }
 0x810   : > { %4401 = vmatprep.subr.bf16.mxu1 %v4749_v46 }
 0x811   : > { %4402 = vmatpush3.bf16.msra.mxu1 %v4749_v46 }
 0x812   : > { %4403 = vmatprep.subr.bf16.mxu1 %v4750_v61 }
 0x815   : > { %4404 = vmatpush3.bf16.msra.mxu1 %v4750_v61 }
 0x81b   : > { %v4375_v63 = vpop.f32.mrb[140].mxu0 }
 0x81c   : > { %v2373_v0 = vpop.f32.mrb[141].mxu0 }
 0x81d   : > { %v4376_v2 = vpop.f32.mrb[142].mxu0 }
 0x81e   : > { %v2459_v4 = vpack.c.bf16 %v4376_v2, %v4375_v63  ;;  %v2376_v5 = vpop.f32.mrb[143].mxu0  ;;  %v4787_v63 = vld [vmem:[%s5232_s6 + $0xc0] ss:$8 sps:$4 sm:$0xff]  }
 0x81f   : > { %v2458_v6 = vpack.c.bf16 %v2376_v5, %v2373_v0  ;;  %v4788_v0 = vld [vmem:[%s5232_s6 + $0xd4] ss:$8 sps:$4 sm:$0xff]   ;;  %v4790_v5 = vld [vmem:[%s5232_s6 + $0xe4] ss:$8 sps:$4 sm:$0xff]  }
 0x820   : > { %v4752_v2 = vld [vmem:[#allocation2 + $0x138] sm:$0xff]  }
 0x82b   : > { %v4379_v8 = vpop.f32.mrb[144].mxu0 }
 0x82c   : > { %v2389_v10 = vpop.f32.mrb[145].mxu0 }
 0x82d   : > { %v4380_v54 = vpop.f32.mrb[146].mxu0 }
 0x82e   : > { %v2461_v12 = vpack.c.bf16 %v4380_v54, %v4379_v8  ;;  %v2392_v38 = vpop.f32.mrb[147].mxu0  ;;  %v4792_v8 = vld [vmem:[%s5232_s6 + $0xf4] ss:$8 sps:$4 sm:$0xff]   ;;  %v2470_v54 = vsub.s32 3, %v5383_v50 }
 0x82f   : > { %v2460_v1 = vpack.c.bf16 %v2392_v38, %v2389_v10  ;;  %v4793_v10 = vld [vmem:[%s5232_s6 + $0xf0] ss:$8 sps:$4 sm:$0xff]  }
 0x830   : > { %v5595_v38 = vrot.slane %v5524_v45, %v2470_v54 }
 0x831   : > { %3989 = vmatprep.subr.bf16.mxu0 %v2460_v1 }
 0x832   : > { %3990 = vmatpush3.bf16.msra.mxu0 %v2452_v48  ;;  %v4777_v48 = vld [vmem:[%s5232_s6 + $0x70] ss:$8 sps:$4 sm:$0xff]  }
 0x833   : > { %3991 = vmatprep.subr.bf16.mxu0 %v2461_v12 }
 0x836   : > { %3992 = vmatpush3.bf16.msra.mxu0 %v2453_v44  ;;  %v4775_v44 = vld [vmem:[%s5232_s6 + $0x60] ss:$8 sps:$4 sm:$0xff]  }
 0x83b   : > { %v4383_v3 = vpop.f32.mrb[148].mxu0 }
 0x83c   : > { %v2405_v42 = vpop.f32.mrb[149].mxu0 }
 0x83d   : > { %v4384_v24 = vpop.f32.mrb[150].mxu0 }
 0x83e   : > { %v2463_v43 = vpack.c.bf16 %v4384_v24, %v4383_v3  ;;  %v2408_v53 = vpop.f32.mrb[151].mxu0 }
 0x83f   : > { %v2462_v9 = vpack.c.bf16 %v2408_v53, %v2405_v42 }
 0x841   : > { %3993 = vmatprep.subr.bf16.mxu0 %v2462_v9  ;;  %v4993_v9 = vmov 0  }
 0x842   : > { %3994 = vmatpush3.bf16.msra.mxu0 %v2454_v57  ;;  %v4783_v57 = vld [vmem:[%s5232_s6 + $0xa0] ss:$8 sps:$4 sm:$0xff]   ;;  %4595 = vset.pattern.permute.xlu0 %v4993_v9 }
 0x843   : > { %3995 = vmatprep.subr.bf16.mxu0 %v2463_v43  ;;  %4596 = vset.pattern.permute.xlu1 %v4993_v9 }
 0x846   : > { %3996 = vmatpush3.bf16.msra.mxu0 %v2455_v51  ;;  %v4781_v51 = vld [vmem:[%s5232_s6 + $0x90] ss:$8 sps:$4 sm:$0xff]  }
 0x84b   : > { %v4387_v56 = vpop.f32.mrb[152].mxu0 }
 0x84c   : > { %v2421_v7 = vpop.f32.mrb[153].mxu0 }
 0x84d   : > { %v4388_v11 = vpop.f32.mrb[154].mxu0 }
 0x84e   : > { %v2465_v13 = vpack.c.bf16 %v4388_v11, %v4387_v56  ;;  %v2424_v14 = vpop.f32.mrb[155].mxu0 }
 0x84f   : > { %v2464_v15 = vpack.c.bf16 %v2424_v14, %v2421_v7 }
 0x851   : > { %3997 = vmatprep.subr.bf16.mxu0 %v2464_v15 }
 0x852   : > { %3998 = vmatpush3.bf16.msra.mxu0 %v2456_v62  ;;  %v4751_v62 = vld [vmem:[#allocation2 + $0x130] sm:$0xff]  }
 0x853   : > { %3999 = vmatprep.subr.bf16.mxu0 %v2465_v13  ;;  %4405 = vmatprep.subr.bf16.mxu1 %v4751_v62 }
 0x854   : > { %4406 = vmatpush3.bf16.msra.mxu1 %v4751_v62 }
 0x855   : > { %4407 = vmatprep.subr.bf16.mxu1 %v4752_v2 }
 0x856   : > { %4000 = vmatpush3.bf16.msra.mxu0 %v2457_v60  ;;  %v4786_v60 = vld [vmem:[%s5232_s6 + $0xc4] ss:$8 sps:$4 sm:$0xff]  }
 0x858   : > { %4408 = vmatpush3.bf16.msra.mxu1 %v4752_v2 }
 0x85b   : > { %v4391_v16 = vpop.f32.mrb[156].mxu0 }
 0x85c   : > { %v2437_v17 = vpop.f32.mrb[157].mxu0 }
 0x85d   : > { %v4392_v18 = vpop.f32.mrb[158].mxu0 }
 0x85e   : > { %v2467_v20 = vpack.c.bf16 %v4392_v18, %v4391_v16  ;;  %v2440_v21 = vpop.f32.mrb[159].mxu0 }
 0x85f   : > { %v2466_v22 = vpack.c.bf16 %v2440_v21, %v2437_v17 }
 0x861   : > { %4001 = vmatprep.subr.bf16.mxu0 %v2466_v22 }
 0x862   : > { %4002 = vmatpush3.bf16.msra.mxu0 %v2458_v6  ;;  %v4791_v6 = vld [vmem:[%s5232_s6 + $0xe0] ss:$8 sps:$4 sm:$0xff]  }
 0x863   : > { %4003 = vmatprep.subr.bf16.mxu0 %v2467_v20 }
 0x866   : > { %4004 = vmatpush3.bf16.msra.mxu0 %v2459_v4  ;;  %v4789_v4 = vld [vmem:[%s5232_s6 + $0xd0] ss:$8 sps:$4 sm:$0xff]  }
 0x869   : > { %2505 = vmatmul.mubr.bf16.vlgmr.msra.gmra.mrb[160].mxu0 %v4763_v19 }
 0x86a   : > { %2512 = vmatprep.mubr.bf16.mxu0 %v4764_v28 }
 0x871   : > { %2513 = vmatmul.mubr.bf16.gmra.mrb[164].mxu0 %v4765_v29 }
 0x872   : > { %2520 = vmatprep.mubr.bf16.mxu0 %v4766_v30 }
 0x879   : > { %2521 = vmatmul.mubr.bf16.gmra.mrb[168].mxu0 %v4767_v31 }
 0x87a   : > { %2528 = vmatprep.mubr.bf16.mxu0 %v4768_v32 }
 0x881   : > { %2529 = vmatmul.mubr.bf16.gmra.mrb[172].mxu0 %v4769_v33 }
 0x882   : > { %2536 = vmatprep.mubr.bf16.mxu0 %v4770_v34 }
 0x889   : > { %2537 = vmatmul.mubr.bf16.gmra.mrb[176].mxu0 %v4771_v36 }
 0x88a   : > { %2544 = vmatprep.mubr.bf16.mxu0 %v4772_v37 }
 0x891   : > { %2545 = vmatmul.mubr.bf16.gmra.mrb[180].mxu0 %v4773_v40 }
 0x892   : > { %2552 = vmatprep.mubr.bf16.mxu0 %v4774_v41 }
 0x899   : > { %2553 = vmatmul.mubr.bf16.gmra.mrb[184].mxu0 %v4775_v44 }
 0x89a   : > { %2560 = vmatprep.mubr.bf16.mxu0 %v4776_v47 }
 0x8a1   : > { %2561 = vmatmul.mubr.bf16.gmra.mrb[188].mxu0 %v4777_v48 }
 0x8a2   : > { %2568 = vmatprep.mubr.bf16.mxu0 %v4778_v52 }
 0x8a9   : > { %2569 = vmatmul.mubr.bf16.gmra.mrb[192].mxu0 %v4779_v35 }
 0x8aa   : > { %2576 = vmatprep.mubr.bf16.mxu0 %v4780_v39 }
 0x8b1   : > { %2577 = vmatmul.mubr.bf16.gmra.mrb[196].mxu0 %v4781_v51 }
 0x8b2   : > { %2584 = vmatprep.mubr.bf16.mxu0 %v4782_v55 }
 0x8b9   : > { %2585 = vmatmul.mubr.bf16.gmra.mrb[200].mxu0 %v4783_v57 }
 0x8ba   : > { %2592 = vmatprep.mubr.bf16.mxu0 %v4784_v58 }
 0x8c1   : > { %2593 = vmatmul.mubr.bf16.gmra.mrb[204].mxu0 %v4785_v59 }
 0x8c2   : > { %2600 = vmatprep.mubr.bf16.mxu0 %v4786_v60 }
 0x8c9   : > { %2601 = vmatmul.mubr.bf16.gmra.mrb[208].mxu0 %v4787_v63 }
 0x8ca   : > { %2608 = vmatprep.mubr.bf16.mxu0 %v4788_v0 }
 0x8d1   : > { %2609 = vmatmul.mubr.bf16.gmra.mrb[212].mxu0 %v4789_v4 }
 0x8d2   : > { %2616 = vmatprep.mubr.bf16.mxu0 %v4790_v5 }
 0x8d9   : > { %2617 = vmatmul.mubr.bf16.gmra.mrb[216].mxu0 %v4791_v6 }
 0x8da   : > { %2624 = vmatprep.mubr.bf16.mxu0 %v4792_v8 }
 0x8e1   : > { %2625 = vmatmul.mubr.bf16.gmra.mrb[220].mxu0 %v4793_v10 }
 0x93c   : > { %v4005_v12 = vpop.f32.mrb[160].mxu0 }
 0x93d   : > { %v4006_v1 = vpop.f32.mrb[161].mxu0 }
 0x93e   : > { %v4007_v3 = vadd.f32 %v4006_v1, %v4005_v12  ;;  %v4008_v42 = vpop.f32.mrb[162].mxu0 }
 0x93f   : > { %v4009_v24 = vpop.f32.mrb[163].mxu0 }
 0x940   : > { %v2507_v43 = vadd.f32 %v4007_v3, %v5595_v38  ;;  %v4010_v53 = vadd.f32 %v4009_v24, %v4008_v42 }
 0x942   : > { %v2510_v56 = vadd.f32 %v4010_v53, %v5595_v38  ;;  %v2633_v7 = vmax.f32 %v2507_v43, 0.0 }
 0x944   : > { %v2634_v11 = vmax.f32 %v2510_v56, 0.0  ;;  %v4011_v13 = vpop.f32.mrb[164].mxu0 }
 0x945   : > { %v4012_v14 = vpop.f32.mrb[165].mxu0 }
 0x946   : > { %v4013_v15 = vadd.f32 %v4012_v14, %v4011_v13  ;;  %v4014_v16 = vpop.f32.mrb[166].mxu0  ;;  %v2665_v45 = vpack.c.bf16 %v2634_v11, %v2633_v7 }
 0x947   : > { %v4015_v17 = vpop.f32.mrb[167].mxu0 }
 0x948   : > { %v2515_v18 = vadd.f32 %v4013_v15, %v5595_v38  ;;  %v4016_v20 = vadd.f32 %v4015_v17, %v4014_v16  ;;  %4409 = vmatprep.mubr.bf16.mxu1 %v2665_v45 }
 0x94a   : > { %v2518_v21 = vadd.f32 %v4016_v20, %v5595_v38  ;;  %v2635_v22 = vmax.f32 %v2515_v18, 0.0 }
 0x94c   : > { %v2636_v23 = vmax.f32 %v2518_v21, 0.0  ;;  %v4017_v25 = vpop.f32.mrb[168].mxu0 }
 0x94d   : > { %v4018_v26 = vpop.f32.mrb[169].mxu0 }
 0x94e   : > { %v2666_v19 = vpack.c.bf16 %v2636_v23, %v2635_v22  ;;  %v4019_v27 = vadd.f32 %v4018_v26, %v4017_v25  ;;  %v4020_v28 = vpop.f32.mrb[170].mxu0 }
 0x94f   : > { %v4021_v29 = vpop.f32.mrb[171].mxu0 }
 0x950   : > { %v2523_v30 = vadd.f32 %v4019_v27, %v5595_v38  ;;  %v4022_v31 = vadd.f32 %v4021_v29, %v4020_v28  ;;  %4410 = vmatmul.mubr.bf16.vlgmr.msra.gmra.mrb[160].mxu1 %v2666_v19 }
 0x952   : > { %v2526_v32 = vadd.f32 %v4022_v31, %v5595_v38  ;;  %v2637_v33 = vmax.f32 %v2523_v30, 0.0 }
 0x954   : > { %v2638_v34 = vmax.f32 %v2526_v32, 0.0  ;;  %v4023_v36 = vpop.f32.mrb[172].mxu0 }
 0x955   : > { %v4024_v37 = vpop.f32.mrb[173].mxu0 }
 0x956   : > { %v4025_v40 = vadd.f32 %v4024_v37, %v4023_v36  ;;  %v4026_v41 = vpop.f32.mrb[174].mxu0  ;;  %v2667_v44 = vpack.c.bf16 %v2638_v34, %v2637_v33 }
 0x957   : > { %v4027_v47 = vpop.f32.mrb[175].mxu0 }
 0x958   : > { %v2531_v48 = vadd.f32 %v4025_v40, %v5595_v38  ;;  %v4028_v52 = vadd.f32 %v4027_v47, %v4026_v41  ;;  %4413 = vmatprep.mubr.bf16.mxu1 %v2667_v44 }
 0x95a   : > { %v2534_v35 = vadd.f32 %v4028_v52, %v5595_v38  ;;  %v2639_v39 = vmax.f32 %v2531_v48, 0.0 }
 0x95c   : > { %v2640_v51 = vmax.f32 %v2534_v35, 0.0  ;;  %v4029_v55 = vpop.f32.mrb[176].mxu0 }
 0x95d   : > { %v4030_v57 = vpop.f32.mrb[177].mxu0 }
 0x95e   : > { %v4031_v58 = vadd.f32 %v4030_v57, %v4029_v55  ;;  %v4032_v46 = vpop.f32.mrb[178].mxu0  ;;  %v2668_v59 = vpack.c.bf16 %v2640_v51, %v2639_v39 }
 0x95f   : > { %v4033_v60 = vpop.f32.mrb[179].mxu0 }
 0x960   : > { %v2539_v61 = vadd.f32 %v4031_v58, %v5595_v38  ;;  %v4034_v62 = vadd.f32 %v4033_v60, %v4032_v46  ;;  %4414 = vmatmul.mubr.bf16.gmra.mrb[164].mxu1 %v2668_v59 }
 0x962   : > { %v2542_v63 = vadd.f32 %v4034_v62, %v5595_v38  ;;  %v2641_v0 = vmax.f32 %v2539_v61, 0.0 }
 0x964   : > { %v2642_v2 = vmax.f32 %v2542_v63, 0.0  ;;  %v4035_v4 = vpop.f32.mrb[180].mxu0 }
 0x965   : > { %v4036_v5 = vpop.f32.mrb[181].mxu0 }
 0x966   : > { %v4037_v6 = vadd.f32 %v4036_v5, %v4035_v4  ;;  %v4038_v8 = vpop.f32.mrb[182].mxu0  ;;  %v2669_v10 = vpack.c.bf16 %v2642_v2, %v2641_v0 }
 0x967   : > { %v4039_v54 = vpop.f32.mrb[183].mxu0 }
 0x968   : > { %v2547_v12 = vadd.f32 %v4037_v6, %v5595_v38  ;;  %v4040_v1 = vadd.f32 %v4039_v54, %v4038_v8  ;;  %4417 = vmatprep.mubr.bf16.mxu1 %v2669_v10 }
 0x96a   : > { %v2550_v3 = vadd.f32 %v4040_v1, %v5595_v38  ;;  %v2643_v42 = vmax.f32 %v2547_v12, 0.0 }
 0x96c   : > { %v2644_v24 = vmax.f32 %v2550_v3, 0.0  ;;  %v4041_v43 = vpop.f32.mrb[184].mxu0 }
 0x96d   : > { %v4042_v53 = vpop.f32.mrb[185].mxu0 }
 0x96e   : > { %v4043_v9 = vadd.f32 %v4042_v53, %v4041_v43  ;;  %v4044_v56 = vpop.f32.mrb[186].mxu0  ;;  %v2670_v7 = vpack.c.bf16 %v2644_v24, %v2643_v42 }
 0x96f   : > { %v4045_v11 = vpop.f32.mrb[187].mxu0 }
 0x970   : > { %v2555_v13 = vadd.f32 %v4043_v9, %v5595_v38  ;;  %v4046_v14 = vadd.f32 %v4045_v11, %v4044_v56  ;;  %4418 = vmatmul.mubr.bf16.gmra.mrb[168].mxu1 %v2670_v7 }
 0x972   : > { %v2558_v15 = vadd.f32 %v4046_v14, %v5595_v38  ;;  %v2645_v16 = vmax.f32 %v2555_v13, 0.0 }
 0x974   : > { %v2646_v45 = vmax.f32 %v2558_v15, 0.0  ;;  %v4047_v17 = vpop.f32.mrb[188].mxu0 }
 0x975   : > { %v4048_v18 = vpop.f32.mrb[189].mxu0 }
 0x976   : > { %v4049_v20 = vadd.f32 %v4048_v18, %v4047_v17  ;;  %v4050_v21 = vpop.f32.mrb[190].mxu0  ;;  %v2671_v22 = vpack.c.bf16 %v2646_v45, %v2645_v16 }
 0x977   : > { %v4051_v23 = vpop.f32.mrb[191].mxu0 }
 0x978   : > { %v2563_v25 = vadd.f32 %v4049_v20, %v5595_v38  ;;  %v4052_v26 = vadd.f32 %v4051_v23, %v4050_v21  ;;  %4421 = vmatprep.mubr.bf16.mxu1 %v2671_v22 }
 0x97a   : > { %v2566_v19 = vadd.f32 %v4052_v26, %v5595_v38  ;;  %v2647_v27 = vmax.f32 %v2563_v25, 0.0 }
 0x97c   : > { %v2648_v28 = vmax.f32 %v2566_v19, 0.0  ;;  %v4053_v29 = vpop.f32.mrb[192].mxu0 }
 0x97d   : > { %v4054_v30 = vpop.f32.mrb[193].mxu0 }
 0x97e   : > { %v4055_v31 = vadd.f32 %v4054_v30, %v4053_v29  ;;  %v4056_v32 = vpop.f32.mrb[194].mxu0  ;;  %v2672_v33 = vpack.c.bf16 %v2648_v28, %v2647_v27 }
 0x97f   : > { %v4057_v34 = vpop.f32.mrb[195].mxu0 }
 0x980   : > { %v2571_v36 = vadd.f32 %v4055_v31, %v5595_v38  ;;  %v4058_v37 = vadd.f32 %v4057_v34, %v4056_v32  ;;  %4422 = vmatmul.mubr.bf16.gmra.mrb[172].mxu1 %v2672_v33 }
 0x982   : > { %v2574_v40 = vadd.f32 %v4058_v37, %v5595_v38  ;;  %v2649_v41 = vmax.f32 %v2571_v36, 0.0 }
 0x984   : > { %v2650_v44 = vmax.f32 %v2574_v40, 0.0  ;;  %v4059_v47 = vpop.f32.mrb[196].mxu0 }
 0x985   : > { %v4060_v48 = vpop.f32.mrb[197].mxu0 }
 0x986   : > { %v4061_v52 = vadd.f32 %v4060_v48, %v4059_v47  ;;  %v4062_v35 = vpop.f32.mrb[198].mxu0  ;;  %v2673_v39 = vpack.c.bf16 %v2650_v44, %v2649_v41 }
 0x987   : > { %v4063_v51 = vpop.f32.mrb[199].mxu0 }
 0x988   : > { %v2579_v55 = vadd.f32 %v4061_v52, %v5595_v38  ;;  %v4064_v57 = vadd.f32 %v4063_v51, %v4062_v35  ;;  %4425 = vmatprep.mubr.bf16.mxu1 %v2673_v39 }
 0x98a   : > { %v2582_v58 = vadd.f32 %v4064_v57, %v5595_v38  ;;  %v2651_v46 = vmax.f32 %v2579_v55, 0.0 }
 0x98c   : > { %v2652_v59 = vmax.f32 %v2582_v58, 0.0  ;;  %v4065_v60 = vpop.f32.mrb[200].mxu0 }
 0x98d   : > { %v4066_v61 = vpop.f32.mrb[201].mxu0 }
 0x98e   : > { %v4067_v62 = vadd.f32 %v4066_v61, %v4065_v60  ;;  %v4068_v63 = vpop.f32.mrb[202].mxu0  ;;  %v2674_v0 = vpack.c.bf16 %v2652_v59, %v2651_v46 }
 0x98f   : > { %v4069_v2 = vpop.f32.mrb[203].mxu0 }
 0x990   : > { %v2587_v4 = vadd.f32 %v4067_v62, %v5595_v38  ;;  %v4070_v5 = vadd.f32 %v4069_v2, %v4068_v63  ;;  %4426 = vmatmul.mubr.bf16.gmra.mrb[176].mxu1 %v2674_v0 }
 0x992   : > { %v2590_v6 = vadd.f32 %v4070_v5, %v5595_v38  ;;  %v2653_v8 = vmax.f32 %v2587_v4, 0.0  ;;  %v5629_v4 = vld [vmem:[#allocation5] sm:$0xff] }
 0x993   : > { %v345_v5 = vunpack.c.h.bf16 %v5629_v4 }
 0x994   : > { %v2654_v10 = vmax.f32 %v2590_v6, 0.0  ;;  %v4071_v54 = vpop.f32.mrb[204].mxu0 }
 0x995   : > { %v4072_v12 = vpop.f32.mrb[205].mxu0 }
 0x996   : > { %v4073_v1 = vadd.f32 %v4072_v12, %v4071_v54  ;;  %v4074_v3 = vpop.f32.mrb[206].mxu0  ;;  %v2675_v42 = vpack.c.bf16 %v2654_v10, %v2653_v8 }
 0x997   : > { %v4075_v24 = vpop.f32.mrb[207].mxu0 }
 0x998   : > { %v2595_v43 = vadd.f32 %v4073_v1, %v5595_v38  ;;  %v4076_v53 = vadd.f32 %v4075_v24, %v4074_v3  ;;  %4429 = vmatprep.mubr.bf16.mxu1 %v2675_v42 }
 0x99a   : > { %v2598_v9 = vadd.f32 %v4076_v53, %v5595_v38  ;;  %v2655_v56 = vmax.f32 %v2595_v43, 0.0 }
 0x99c   : > { %v2656_v7 = vmax.f32 %v2598_v9, 0.0  ;;  %v4077_v11 = vpop.f32.mrb[208].mxu0 }
 0x99d   : > { %v4078_v13 = vpop.f32.mrb[209].mxu0 }
 0x99e   : > { %v4079_v14 = vadd.f32 %v4078_v13, %v4077_v11  ;;  %v4080_v15 = vpop.f32.mrb[210].mxu0  ;;  %v2676_v16 = vpack.c.bf16 %v2656_v7, %v2655_v56 }
 0x99f   : > { %v4081_v45 = vpop.f32.mrb[211].mxu0 }
 0x9a0   : > { %v2603_v17 = vadd.f32 %v4079_v14, %v5595_v38  ;;  %v4082_v18 = vadd.f32 %v4081_v45, %v4080_v15  ;;  %4430 = vmatmul.mubr.bf16.gmra.mrb[180].mxu1 %v2676_v16 }
 0x9a2   : > { %v2606_v20 = vadd.f32 %v4082_v18, %v5595_v38  ;;  %v2657_v21 = vmax.f32 %v2603_v17, 0.0 }
 0x9a4   : > { %v2658_v22 = vmax.f32 %v2606_v20, 0.0  ;;  %v4083_v23 = vpop.f32.mrb[212].mxu0 }
 0x9a5   : > { %v4084_v25 = vpop.f32.mrb[213].mxu0 }
 0x9a6   : > { %v4085_v26 = vadd.f32 %v4084_v25, %v4083_v23  ;;  %v4086_v19 = vpop.f32.mrb[214].mxu0  ;;  %v2677_v27 = vpack.c.bf16 %v2658_v22, %v2657_v21 }
 0x9a7   : > { %v4087_v28 = vpop.f32.mrb[215].mxu0 }
 0x9a8   : > { %v2611_v29 = vadd.f32 %v4085_v26, %v5595_v38  ;;  %v4088_v30 = vadd.f32 %v4087_v28, %v4086_v19  ;;  %4433 = vmatprep.mubr.bf16.mxu1 %v2677_v27 }
 0x9aa   : > { %v2614_v31 = vadd.f32 %v4088_v30, %v5595_v38  ;;  %v2659_v32 = vmax.f32 %v2611_v29, 0.0 }
 0x9ac   : > { %v2660_v33 = vmax.f32 %v2614_v31, 0.0  ;;  %v4089_v34 = vpop.f32.mrb[216].mxu0 }
 0x9ad   : > { %v4090_v36 = vpop.f32.mrb[217].mxu0 }
 0x9ae   : > { %v4091_v37 = vadd.f32 %v4090_v36, %v4089_v34  ;;  %v4092_v40 = vpop.f32.mrb[218].mxu0  ;;  %v2678_v41 = vpack.c.bf16 %v2660_v33, %v2659_v32 }
 0x9af   : > { %v4093_v44 = vpop.f32.mrb[219].mxu0 }
 0x9b0   : > { %v2619_v47 = vadd.f32 %v4091_v37, %v5595_v38  ;;  %v4094_v48 = vadd.f32 %v4093_v44, %v4092_v40  ;;  %4434 = vmatmul.mubr.bf16.gmra.mrb[184].mxu1 %v2678_v41 }
 0x9b2   : > { %v2622_v52 = vadd.f32 %v4094_v48, %v5595_v38  ;;  %v2661_v35 = vmax.f32 %v2619_v47, 0.0 }
 0x9b4   : > { %v2662_v39 = vmax.f32 %v2622_v52, 0.0  ;;  %v4095_v51 = vpop.f32.mrb[220].mxu0 }
 0x9b5   : > { %v4096_v55 = vpop.f32.mrb[221].mxu0 }
 0x9b6   : > { %v4097_v57 = vadd.f32 %v4096_v55, %v4095_v51  ;;  %v4098_v58 = vpop.f32.mrb[222].mxu0  ;;  %v2679_v46 = vpack.c.bf16 %v2662_v39, %v2661_v35  ;;  %v5640_v51 = vld [vmem:[#allocation5 + $0x8] sm:$0xff]  ;;  %v344_v55 = vunpack.c.l.bf16 %v5629_v4 }
 0x9b7   : > { %v4099_v59 = vpop.f32.mrb[223].mxu0 }
 0x9b8   : > { %v2627_v60 = vadd.f32 %v4097_v57, %v5595_v38  ;;  %v4100_v61 = vadd.f32 %v4099_v59, %v4098_v58  ;;  %4437 = vmatprep.mubr.bf16.mxu1 %v2679_v46  ;;  %v347_v57 = vunpack.c.h.bf16 %v5640_v51  ;;  %v346_v58 = vunpack.c.l.bf16 %v5640_v51 }
 0x9b9   : > { %v5699_v51 = vand.u32 127, %v834_v49 }
 0x9ba   : > { %v2630_v62 = vadd.f32 %v4100_v61, %v5595_v38  ;;  %v2663_v63 = vmax.f32 %v2627_v60, 0.0 }
 0x9bb   : > { %vm3247_vm0 = vcmp.eq.s32.totalorder %v5699_v51, 16  ;;  %vm3284_vm3 = vcmp.eq.s32.totalorder %v5699_v51, 17 }
 0x9bc   : > { %v2664_v0 = vmax.f32 %v2630_v62, 0.0 }
 0x9be   : > { %v2680_v2 = vpack.c.bf16 %v2664_v0, %v2663_v63 }
 0x9c0   : > { %4438 = vmatmul.mubr.bf16.gmra.mrb[188].mxu1 %v2680_v2 }
 0x9c1   : > { %2954 = vmatprep.mubr.f32.mxu1 %v345_v5 }
 0xa23   : > { %v4411_v6 = vpop.f32.mrb[160].mxu1 }
 0xa24   : > { %2979 = vperm.xlu0 %4595, %v4411_v6   ;;  %v2763_v8 = vpop.f32.mrb[161].mxu1 }
 0xa25   : > { %2969 = vperm.xlu1 %4596, %v2763_v8   ;;  %v4412_v10 = vpop.f32.mrb[162].mxu1 }
 0xa26   : > { %v4447_v54 = vpack.c.bf16 %v4412_v10, %v4411_v6  ;;  %v2766_v12 = vpop.f32.mrb[163].mxu1 }
 0xa27   : > { %v4443_v1 = vpack.c.bf16 %v2766_v12, %v2763_v8 }
 0xa29   : > { %2984 = vperm.xlu1 %4596, %v4412_v10  }
 0xa2d   : > { %2974 = vperm.xlu1 %4596, %v2766_v12  }
 0xa33   : > { %v4415_v38 = vpop.f32.mrb[164].mxu1 }
 0xa34   : > { %2999 = vperm.xlu0 %4595, %v4415_v38   ;;  %v2779_v3 = vpop.f32.mrb[165].mxu1 }
 0xa35   : > { %v4416_v42 = vpop.f32.mrb[166].mxu1 }
 0xa36   : > { %v4455_v24 = vpack.c.bf16 %v4416_v42, %v4415_v38  ;;  %3004 = vperm.xlu1 %4596, %v4416_v42   ;;  %v2782_v43 = vpop.f32.mrb[167].mxu1  ;;  %v448_v38 = vld [vmem:[%s5232_s6 + $0x20c] ss:$16 sps:$4 sm:$0xff]  }
 0xa37   : > { %v4451_v53 = vpack.c.bf16 %v2782_v43, %v2779_v3  ;;  %v463_v42 = vld [vmem:[%s5232_s6 + $0x294] ss:$8 sps:$4 sm:$0xff]  }
 0xa38   : > { %2989 = vperm.xlu0 %4595, %v2779_v3   ;;  %v478_v3 = vunpack.c.l.bf16 %v448_v38 }
 0xa3a   : > { %2994 = vperm.xlu1 %4596, %v2782_v43   ;;  %v496_v43 = vunpack.c.h.bf16 %v463_v42 }
 0xa43   : > { %v4419_v9 = vpop.f32.mrb[168].mxu1 }
 0xa44   : > { %3019 = vperm.xlu0 %4595, %v4419_v9   ;;  %v2795_v56 = vpop.f32.mrb[169].mxu1 }
 0xa45   : > { %v4420_v7 = vpop.f32.mrb[170].mxu1 }
 0xa46   : > { %v4463_v11 = vpack.c.bf16 %v4420_v7, %v4419_v9  ;;  %3024 = vperm.xlu1 %4596, %v4420_v7   ;;  %v2798_v13 = vpop.f32.mrb[171].mxu1 }
 0xa47   : > { %v4459_v14 = vpack.c.bf16 %v2798_v13, %v2795_v56 }
 0xa48   : > { %3009 = vperm.xlu0 %4595, %v2795_v56  }
 0xa4a   : > { %3014 = vperm.xlu1 %4596, %v2798_v13   ;;  %v480_v13 = vunpack.c.h.bf16 %v448_v38 }
 0xa53   : > { %v5634_v15 = vpop.f32.mrb[172].mxu1 }
 0xa54   : > { %v2811_v16 = vpop.f32.mrb[173].mxu1 }
 0xa55   : > { %v5636_v45 = vpop.f32.mrb[174].mxu1 }
 0xa56   : > { %v4471_v17 = vpack.c.bf16 %v5636_v45, %v5634_v15  ;;  %v2814_v18 = vpop.f32.mrb[175].mxu1 }
 0xa57   : > { %v4467_v20 = vpack.c.bf16 %v2814_v18, %v2811_v16 }
 0xa63   : > { %v4427_v21 = vpop.f32.mrb[176].mxu1 }
 0xa64   : > { %3059 = vperm.xlu0 %4595, %v4427_v21   ;;  %v2827_v22 = vpop.f32.mrb[177].mxu1 }
 0xa65   : > { %v4428_v23 = vpop.f32.mrb[178].mxu1 }
 0xa66   : > { %v4445_v25 = vpack.c.bf16 %v4428_v23, %v4427_v21  ;;  %3064 = vperm.xlu1 %4596, %v4428_v23   ;;  %v2830_v26 = vpop.f32.mrb[179].mxu1 }
 0xa67   : > { %v4441_v19 = vpack.c.bf16 %v2830_v26, %v2827_v22 }
 0xa68   : > { %3049 = vperm.xlu0 %4595, %v2827_v22  }
 0xa69   : > { %4442 = vmatprep.subr.bf16.mxu1 %v4441_v19 }
 0xa6a   : > { %4444 = vmatpush3.bf16.msra.mxu1 %v4443_v1  ;;  %v447_v1 = vld [vmem:[%s5232_s6 + $0x204] ss:$16 sps:$4 sm:$0xff]  }
 0xa6b   : > { %4446 = vmatprep.subr.bf16.mxu1 %v4445_v25  ;;  %v477_v56 = vunpack.c.l.bf16 %v447_v1 }
 0xa6c   : > { %3054 = vperm.xlu0 %4595, %v2830_v26  }
 0xa6e   : > { %4448 = vmatpush3.bf16.msra.mxu1 %v4447_v54 }
 0xa73   : > { %v4431_v27 = vpop.f32.mrb[180].mxu1 }
 0xa74   : > { %3079 = vperm.xlu0 %4595, %v4431_v27   ;;  %v2843_v28 = vpop.f32.mrb[181].mxu1 }
 0xa75   : > { %v4432_v29 = vpop.f32.mrb[182].mxu1 }
 0xa76   : > { %v4453_v30 = vpack.c.bf16 %v4432_v29, %v4431_v27  ;;  %3084 = vperm.xlu1 %4596, %v4432_v29   ;;  %v2846_v31 = vpop.f32.mrb[183].mxu1  ;;  %v465_v29 = vld [vmem:[%s5232_s6 + $0x2a4] ss:$8 sps:$4 sm:$0xff]  }
 0xa77   : > { %v4449_v32 = vpack.c.bf16 %v2846_v31, %v2843_v28 }
 0xa78   : > { %3069 = vperm.xlu0 %4595, %v2843_v28  }
 0xa79   : > { %4450 = vmatprep.subr.bf16.mxu1 %v4449_v32  ;;  %v467_v32 = vld [vmem:[%s5232_s6 + $0x2b4] ss:$8 sps:$4 sm:$0xff]  }
 0xa7a   : > { %3074 = vperm.xlu1 %4596, %v2846_v31   ;;  %4452 = vmatpush3.bf16.msra.mxu1 %v4451_v53 }
 0xa7b   : > { %4454 = vmatprep.subr.bf16.mxu1 %v4453_v30  ;;  %v449_v30 = vld [vmem:[%s5232_s6 + $0x224] ss:$8 sps:$4 sm:$0xff]  }
 0xa7c   : > { %v482_v31 = vunpack.c.h.bf16 %v449_v30 }
 0xa7e   : > { %4456 = vmatpush3.bf16.msra.mxu1 %v4455_v24 }
 0xa83   : > { %v4435_v33 = vpop.f32.mrb[184].mxu1 }
 0xa84   : > { %3099 = vperm.xlu0 %4595, %v4435_v33   ;;  %v2859_v34 = vpop.f32.mrb[185].mxu1 }
 0xa85   : > { %v4436_v36 = vpop.f32.mrb[186].mxu1 }
 0xa86   : > { %v4461_v37 = vpack.c.bf16 %v4436_v36, %v4435_v33  ;;  %3104 = vperm.xlu1 %4596, %v4436_v36   ;;  %v2862_v40 = vpop.f32.mrb[187].mxu1  ;;  %v497_v36 = vunpack.c.l.bf16 %v465_v29 }
 0xa87   : > { %v4457_v41 = vpack.c.bf16 %v2862_v40, %v2859_v34 }
 0xa88   : > { %3089 = vperm.xlu0 %4595, %v2859_v34   ;;  %v500_v34 = vunpack.c.h.bf16 %v467_v32 }
 0xa89   : > { %4458 = vmatprep.subr.bf16.mxu1 %v4457_v41 }
 0xa8a   : > { %3094 = vperm.xlu1 %4596, %v2862_v40   ;;  %4460 = vmatpush3.bf16.msra.mxu1 %v4459_v14  ;;  %v481_v40 = vunpack.c.l.bf16 %v449_v30 }
 0xa8b   : > { %4462 = vmatprep.subr.bf16.mxu1 %v4461_v37  ;;  %v498_v37 = vunpack.c.h.bf16 %v465_v29 }
 0xa8c   : > { %3029 = vperm.xlu0 %4595, %v2811_v16  }
 0xa8e   : > { %3034 = vperm.xlu1 %4596, %v2814_v18   ;;  %4464 = vmatpush3.bf16.msra.mxu1 %v4463_v11  ;;  %v495_v11 = vunpack.c.l.bf16 %v463_v42  ;;  %v479_v18 = vunpack.c.h.bf16 %v447_v1 }
 0xa93   : > { %v4439_v44 = vpop.f32.mrb[188].mxu1 }
 0xa94   : > { %v2875_v47 = vpop.f32.mrb[189].mxu1 }
 0xa95   : > { %3109 = vperm.xlu0 %4595, %v2875_v47   ;;  %v4440_v48 = vpop.f32.mrb[190].mxu1 }
 0xa96   : > { %v4469_v52 = vpack.c.bf16 %v4440_v48, %v4439_v44  ;;  %v2878_v35 = vpop.f32.mrb[191].mxu1 }
 0xa97   : > { %v4465_v39 = vpack.c.bf16 %v2878_v35, %v2875_v47  ;;  %3114 = vperm.xlu1 %4596, %v2878_v35   ;;  %v499_v47 = vunpack.c.l.bf16 %v467_v32 }
 0xa99   : > { %3119 = vperm.xlu0 %4595, %v4439_v44   ;;  %4466 = vmatprep.subr.bf16.mxu1 %v4465_v39  ;;  %v451_v44 = vld [vmem:[%s5232_s6 + $0x234] ss:$8 sps:$4 sm:$0xff]  }
 0xa9a   : > { %4468 = vmatpush3.bf16.msra.mxu1 %v4467_v20 }
 0xa9b   : > { %3124 = vperm.xlu1 %4596, %v4440_v48   ;;  %4470 = vmatprep.subr.bf16.mxu1 %v4469_v52  ;;  %v484_v48 = vunpack.c.h.bf16 %v451_v44 }
 0xa9d   : > { %3039 = vperm.xlu0 %4595, %v5634_v15  }
 0xa9e   : > { %4472 = vmatpush3.bf16.msra.mxu1 %v4471_v17 }
 0xa9f   : > { %3044 = vperm.xlu1 %4596, %v5636_v45  }
 0xaa1   : > { %2955 = vmatmul.mubr.f32.vlgmr.msra.gmra.mrb[192].mxu1 %v344_v55 }
 0xaa2   : > { %2959 = vmatprep.mubr.f32.mxu1 %v347_v57 }
 0xaa3   : > { %v2980_v59 = vpop.permute.xlu0 %2979 }
 0xaa4   : > { %v2970_v46 = vpop.permute.xlu1 %2969  ;;  %v3129_v19 = vmul.f32 %v2980_v59, %v479_v18 }
 0xaa5   : > { %2960 = vmatmul.mubr.f32.gmra.mrb[194].mxu1 %v346_v58  ;;  %v3127_v20 = vmul.f32 %v2970_v46, %v477_v56 }
 0xaa6   : > { %3228 = vmatprep.mubr.f32.mxu1 %v345_v5  ;;  %v461_v5 = vld [vmem:[%s5232_s6 + $0x284] ss:$8 sps:$4 sm:$0xff]  }
 0xaa7   : > { %v493_v53 = vunpack.c.l.bf16 %v461_v5  ;;  %v494_v9 = vunpack.c.h.bf16 %v461_v5 }
 0xaa8   : > { %v2985_v60 = vpop.permute.xlu1 %2984 }
 0xaa9   : > { %v3130_v23 = vmul.f32 %v2985_v60, %v480_v13  ;;  %v483_v60 = vunpack.c.l.bf16 %v451_v44 }
 0xaab   : > { %v4479_v27 = vpack.c.bf16 %v3130_v23, %v3129_v19 }
 0xaac   : > { %v2975_v62 = vpop.permute.xlu1 %2974 }
 0xaad   : > { %v3128_v14 = vmul.f32 %v2975_v62, %v478_v3  ;;  %v4994_v3 = vmov 2  }
 0xaae   : > { %4597 = vset.pattern.permute.xlu0 %v4994_v3  ;;  %4598 = vset.pattern.permute.xlu1 %v4994_v3 }
 0xaaf   : > { %v4475_v25 = vpack.c.bf16 %v3128_v14, %v3127_v20 }
 0xab3   : > { %v5655_v61 = vpop.permute.xlu0 %2999 }
 0xab5   : > { %v3005_v63 = vpop.permute.xlu1 %3004 }
 0xab6   : > { %v3134_v1 = vmul.f32 %v3005_v63, %v484_v48 }
 0xab7   : > { %v2990_v0 = vpop.permute.xlu0 %2989 }
 0xab8   : > { %v3131_v62 = vmul.f32 %v2990_v0, %v481_v40 }
 0xab9   : > { %v2995_v6 = vpop.permute.xlu1 %2994 }
 0xaba   : > { %v3132_v52 = vmul.f32 %v2995_v6, %v482_v31  ;;  %v3133_v6 = vmul.f32 %v5655_v61, %v483_v60 }
 0xabc   : > { %v4483_v38 = vpack.c.bf16 %v3132_v52, %v3131_v62  ;;  %v459_v62 = vld [vmem:[%s5232_s6 + $0x274] ss:$8 sps:$4 sm:$0xff]  }
 0xac3   : > { %v5657_v2 = vpop.permute.xlu0 %3019 }
 0xac5   : > { %v5659_v8 = vpop.permute.xlu1 %3024 }
 0xac7   : > { %v5661_v10 = vpop.permute.xlu0 %3009 }
 0xac9   : > { %v5663_v12 = vpop.permute.xlu1 %3014 }
 0xae3   : > { %v3060_v54 = vpop.permute.xlu0 %3059 }
 0xae4   : > { %v3145_v21 = vmul.f32 %v3060_v54, %v495_v11 }
 0xae5   : > { %v3065_v7 = vpop.permute.xlu1 %3064 }
 0xae6   : > { %v3146_v16 = vmul.f32 %v3065_v7, %v496_v43  ;;  %v4487_v43 = vpack.c.bf16 %v3134_v1, %v3133_v6  ;;  %v471_v7 = vld [vmem:[%s5232_s6 + $0x2d4] ss:$8 sps:$4 sm:$0xff]   ;;  %v492_v6 = vunpack.c.h.bf16 %v459_v62 }
 0xae7   : > { %v3050_v24 = vpop.permute.xlu0 %3049  ;;  %v504_v13 = vunpack.c.h.bf16 %v471_v7 }
 0xae8   : > { %v3143_v45 = vmul.f32 %v3050_v24, %v493_v53  ;;  %v4477_v26 = vpack.c.bf16 %v3146_v16, %v3145_v21  ;;  %v5674_v24 = vld [vmem:[#allocation7] sm:$0xff] }
 0xae9   : > { %v3160_v0 = vrot.slane %v5674_v24, 4  ;;  %v469_v53 = vld [vmem:[%s5232_s6 + $0x2c4] ss:$8 sps:$4 sm:$0xff]  }
 0xaea   : > { %v501_v14 = vunpack.c.l.bf16 %v469_v53 }
 0xaeb   : > { %v3055_v15 = vpop.permute.xlu0 %3054  ;;  %4507 = vpush %v3160_v0 }
 0xaec   : > { %v3144_v17 = vmul.f32 %v3055_v15, %v494_v9  ;;  %v453_v9 = vld [vmem:[%s5232_s6 + $0x244] ss:$8 sps:$4 sm:$0xff]   ;;  %v502_v15 = vunpack.c.h.bf16 %v469_v53 }
 0xaed   : > { %v486_v56 = vunpack.c.h.bf16 %v453_v9  ;;  %v485_v61 = vunpack.c.l.bf16 %v453_v9 }
 0xaee   : > { %v4473_v22 = vpack.c.bf16 %v3144_v17, %v3143_v45  ;;  %v455_v45 = vld [vmem:[%s5232_s6 + $0x254] ss:$8 sps:$4 sm:$0xff]   ;;  %v503_v17 = vunpack.c.l.bf16 %v471_v7  ;;  %v3241_v7 = vsub.s32 4, %v5383_v50 }
 0xaef   : > { %v488_v18 = vunpack.c.h.bf16 %v455_v45  ;;  %v3136_v20 = vmul.f32 %v5663_v12, %v486_v56  ;;  %v3135_v19 = vmul.f32 %v5661_v10, %v485_v61 }
 0xaf0   : > { %4474 = vmatprep.subr.bf16.mxu1 %v4473_v22 }
 0xaf1   : > { %4476 = vmatpush3.bf16.msra.mxu1 %v4475_v25  ;;  %v3138_v29 = vmul.f32 %v5659_v8, %v488_v18  ;;  %v4491_v30 = vpack.c.bf16 %v3136_v20, %v3135_v19 }
 0xaf2   : > { %4478 = vmatprep.subr.bf16.mxu1 %v4477_v26  ;;  %v487_v26 = vunpack.c.l.bf16 %v455_v45 }
 0xaf3   : > { %v3080_v28 = vpop.permute.xlu0 %3079 }
 0xaf4   : > { %v3149_v54 = vmul.f32 %v3080_v28, %v499_v47  ;;  %v3137_v32 = vmul.f32 %v5657_v2, %v487_v26  ;;  %v475_v47 = vld [vmem:[%s5232_s6 + $0x2f4] ss:$8 sps:$4 sm:$0xff]  }
 0xaf5   : > { %v3085_v33 = vpop.permute.xlu1 %3084  ;;  %4480 = vmatpush3.bf16.msra.mxu1 %v4479_v27  ;;  %v507_v2 = vunpack.c.l.bf16 %v475_v47 }
 0xaf6   : > { %v3150_v39 = vmul.f32 %v3085_v33, %v500_v34  ;;  %v473_v33 = vld [vmem:[%s5232_s6 + $0x2e4] ss:$8 sps:$4 sm:$0xff]   ;;  %v4495_v34 = vpack.c.bf16 %v3138_v29, %v3137_v32 }
 0xaf7   : > { %v3070_v41 = vpop.permute.xlu0 %3069  ;;  %v505_v10 = vunpack.c.l.bf16 %v473_v33 }
 0xaf8   : > { %v3147_v46 = vmul.f32 %v3070_v41, %v497_v36  ;;  %v4485_v42 = vpack.c.bf16 %v3150_v39, %v3149_v54  ;;  %v457_v36 = vld [vmem:[%s5232_s6 + $0x264] ss:$8 sps:$4 sm:$0xff]   ;;  %v506_v41 = vunpack.c.h.bf16 %v473_v33 }
 0xaf9   : > { %v3075_v35 = vpop.permute.xlu1 %3074  ;;  %v489_v44 = vunpack.c.l.bf16 %v457_v36 }
 0xafa   : > { %v3148_v59 = vmul.f32 %v3075_v35, %v498_v37  ;;  %v490_v37 = vunpack.c.h.bf16 %v457_v36 }
 0xafc   : > { %v4481_v5 = vpack.c.bf16 %v3148_v59, %v3147_v46  ;;  %v508_v46 = vunpack.c.h.bf16 %v475_v47 }
 0xafe   : > { %4482 = vmatprep.subr.bf16.mxu1 %v4481_v5 }
 0xaff   : > { %4484 = vmatpush3.bf16.msra.mxu1 %v4483_v38 }
 0xb00   : > { %4486 = vmatprep.subr.bf16.mxu1 %v4485_v42  ;;  %v491_v42 = vunpack.c.l.bf16 %v459_v62 }
 0xb03   : > { %v3100_v63 = vpop.permute.xlu0 %3099  ;;  %4488 = vmatpush3.bf16.msra.mxu1 %v4487_v43 }
 0xb04   : > { %v3153_v27 = vmul.f32 %v3100_v63, %v503_v17 }
 0xb05   : > { %v3105_v11 = vpop.permute.xlu1 %3104 }
 0xb06   : > { %v3154_v22 = vmul.f32 %v3105_v11, %v504_v13 }
 0xb07   : > { %v3090_v16 = vpop.permute.xlu0 %3089 }
 0xb08   : > { %v3151_v23 = vmul.f32 %v3090_v16, %v501_v14  ;;  %v4493_v31 = vpack.c.bf16 %v3154_v22, %v3153_v27 }
 0xb09   : > { %v3095_v21 = vpop.permute.xlu1 %3094 }
 0xb0a   : > { %v3152_v25 = vmul.f32 %v3095_v21, %v502_v15  ;;  %v3242_v15 = vrot.slane %v5674_v24, %v3241_v7 }
 0xb0b   : > { %v3030_v12 = vpop.permute.xlu0 %3029 }
 0xb0c   : > { %v4489_v28 = vpack.c.bf16 %v3152_v25, %v3151_v23  ;;  %v3139_v59 = vmul.f32 %v3030_v12, %v489_v44 }
 0xb0d   : > { %v3035_v40 = vpop.permute.xlu1 %3034 }
 0xb0e   : > { %4490 = vmatprep.subr.bf16.mxu1 %v4489_v28  ;;  %v3140_v48 = vmul.f32 %v3035_v40, %v490_v37 }
 0xb0f   : > { %4492 = vmatpush3.bf16.msra.mxu1 %v4491_v30 }
 0xb10   : > { %4494 = vmatprep.subr.bf16.mxu1 %v4493_v31  ;;  %v4499_v5 = vpack.c.bf16 %v3140_v48, %v3139_v59 }
 0xb13   : > { %4496 = vmatpush3.bf16.msra.mxu1 %v4495_v34  ;;  %v4995_v34 = vmov 1  }
 0xb14   : > { %v3110_v8 = vpop.permute.xlu0 %3109 }
 0xb15   : > { %v3155_v35 = vmul.f32 %v3110_v8, %v505_v10 }
 0xb16   : > { %v3115_v52 = vpop.permute.xlu1 %3114 }
 0xb17   : > { %v3156_v39 = vmul.f32 %v3115_v52, %v506_v41 }
 0xb18   : > { %v3120_v60 = vpop.permute.xlu0 %3119 }
 0xb19   : > { %v4497_v54 = vpack.c.bf16 %v3156_v39, %v3155_v35  ;;  %v3157_v38 = vmul.f32 %v3120_v60, %v507_v2 }
 0xb1a   : > { %v3125_v1 = vpop.permute.xlu1 %3124 }
 0xb1b   : > { %v3158_v3 = vmul.f32 %v3125_v1, %v508_v46  ;;  %4498 = vmatprep.subr.bf16.mxu1 %v4497_v54 }
 0xb1c   : > { %v3040_v0 = vpop.permute.xlu0 %3039  ;;  %4500 = vmatpush3.bf16.msra.mxu1 %v4499_v5  ;;  %s4508_s21 = spop %4507 }
 0xb1d   : > { %v4501_v43 = vpack.c.bf16 %v3158_v3, %v3157_v38  ;;  %v3141_v53 = vmul.f32 %v3040_v0, %v491_v42  ;;  %v3162_v21 = vstv %s4508_s21 }
 0xb1e   : > { %v3045_v63 = vpop.permute.xlu1 %3044 }
 0xb1f   : > { %v3142_v9 = vmul.f32 %v3045_v63, %v492_v6  ;;  %4502 = vmatprep.subr.bf16.mxu1 %v4501_v43 }
 0xb21   : > { %v4503_v56 = vpack.c.bf16 %v3142_v9, %v3141_v53 }
 0xb23   : > { %4504 = vmatpush3.bf16.msra.mxu1 %v4503_v56 }
 0xb26   : > { %3229 = vmatmul.mubr.f32.vlgmr.msra.gmra.mrb[196].mxu1 %v344_v55 }
 0xb27   : > { %3233 = vmatprep.mubr.f32.mxu1 %v347_v57  ;;  %v509_v57 = vld [vmem:[%s5232_s6 + $0x300] ss:$8 sps:$4 sm:$0xff]  }
 0xb28   : > { %v512_v19 = vunpack.c.h.bf16 %v509_v57 }
 0xb2a   : > { %3234 = vmatmul.mubr.f32.gmra.mrb[198].mxu1 %v346_v58  ;;  %v511_v58 = vunpack.c.l.bf16 %v509_v57  ;;  %vm5708_vm2 = vcmp.gt.f32.partialorder %v512_v19, 0.5 }
 0xb2c   : > { %vm5702_vm1 = vcmp.gt.f32.partialorder %v511_v58, 0.5 }
 0xb74   : > { %v4157_v11 = vpop.f32.mrb[192].mxu1 }
 0xb75   : > { %v4158_v13 = vpop.f32.mrb[193].mxu1 }
 0xb76   : > { %v4159_v14 = vadd.f32 %v4158_v13, %v4157_v11 }
 0xb78   : > { %v2965_v61 = vmul.f32 0.0625, %v4159_v14  ;;  %v4160_v16 = vpop.f32.mrb[194].mxu1 }
 0xb79   : > { %v4161_v45 = vpop.f32.mrb[195].mxu1 }
 0xb7a   : > { %v3243_v17 = vadd.f32 %v3242_v15, %v2965_v61  ;;  %v4162_v4 = vadd.f32 %v4161_v45, %v4160_v16 }
 0xb7c   : > { %v2966_v55 = vmul.f32 0.0625, %v4162_v4  ;;  %3250 = vperm.xlu0 %4597, %v3243_v17  }
 0xb7e   : > { %v3244_v18 = vadd.f32 %v3242_v15, %v2966_v55 }
 0xb80   : > { %3255 = vperm.xlu1 %4598, %v3244_v18   ;;  %4599 = vset.pattern.permute.xlu0 %v4995_v34 }
 0xb84   : > { %4600 = vset.pattern.permute.xlu1 %v4995_v34 }
 0xbf9   : > { %v4195_v50 = vpop.f32.mrb[196].mxu1 }
 0xbfa   : > { %v4196_v20 = vpop.f32.mrb[197].mxu1 }
 0xbfb   : > { %v4197_v22 = vadd.f32 %v4196_v20, %v4195_v50  ;;  %v3251_v24 = vpop.permute.xlu0 %3250 }
 0xbfd   : > { %v3231_v23 = vadd.f32 %v4197_v22, %v3162_v21  ;;  %v4198_v25 = vpop.f32.mrb[198].mxu1 }
 0xbfe   : > { %v4199_v27 = vpop.f32.mrb[199].mxu1 }
 0xbff   : > { %v4200_v28 = vadd.f32 %v4199_v27, %v4198_v25  ;;  %v3258_v29 = vsel %vm3247_vm0, %v3251_v24, %v3231_v23  ;;  %v3256_v30 = vpop.permute.xlu1 %3255 }
 0xc00   : > { %v3262_v49 = vsel %vm5702_vm1, %v3258_v29, -1e+30 }
 0xc01   : > { %v3236_v31 = vadd.f32 %v4200_v28, %v3162_v21  ;;  %3264 = vmax.xlane.f32.xlu1 %v3262_v49 }
 0xc03   : > { %v3259_v12 = vsel %vm3247_vm0, %v3256_v30, %v3236_v31 }
 0xc04   : > { %v3263_v33 = vsel %vm5708_vm2, %v3259_v12, -1e+30 }
 0xc05   : > { %3266 = vmax.xlane.f32.xlu0 %v3263_v33 }
 0xc8e   : > { %v3265_v36 = vpop.xlane.xlu1 %3264 }
 0xc8f   : > { %v3268_v37 = vsub.f32 %v3262_v49, %v3265_v36 }
 0xc91   : > { %v3270_v40 = vmul.f32 1.442695, %v3268_v37 }
 0xc92   : > { %v3267_v10 = vpop.xlane.xlu0 %3266 }
 0xc93   : > { %4753 = vpow2.f32 %v3270_v40  ;;  %v3269_v41 = vsub.f32 %v3263_v33, %v3267_v10 }
 0xc95   : > { %v3272_v44 = vmul.f32 1.442695, %v3269_v41 }
 0xc97   : > { %4755 = vpow2.f32 %v3272_v44 }
 0xc9d   : > { %v4754_v8 = vpop.eup %4753 }
 0xc9e   : > { %v3274_v47 = vsel %vm5702_vm1, %v4754_v8, 0.0 }
 0xc9f   : > { %3276 = vadd.xlane.f32.xlu0 %v3274_v47 }
 0xca1   : > { %v4756_v48 = vpop.eup %4755 }
 0xca2   : > { %v3275_v52 = vsel %vm5708_vm2, %v4756_v48, 0.0 }
 0xca3   : > { %3278 = vadd.xlane.f32.xlu1 %v3275_v52 }
 0xcb4   : > { %3290 = vperm.xlu1 %4600, %v3244_v18  }
 0xcb5   : > { %3286 = vperm.xlu0 %4599, %v3243_v17  }
 0xd2c   : > { %v3277_v35 = vpop.xlane.xlu0 %3276 }
 0xd2d   : > { %4757 = vrcp.f32 %v3277_v35 }
 0xd30   : > { %v3279_v39 = vpop.xlane.xlu1 %3278 }
 0xd31   : > { %4759 = vrcp.f32 %v3279_v39 }
 0xd34   : > { %v3287_v59 = vpop.permute.xlu0 %3286  ;;  %v3291_v5 = vpop.permute.xlu1 %3290 }
 0xd37   : > { %v4758_v2 = vpop.eup %4757 }
 0xd38   : > { %v3282_v46 = vmul.f32 %v4758_v2, %v3274_v47 }
 0xd3a   : > { %v3293_v60 = vsel %vm3284_vm3, %v3287_v59, %v3282_v46 }
 0xd3b   : > { %v4760_v62 = vpop.eup %4759  ;;  %3295 = vst [vmem:[%s258_s28] sm:$0xff] %v3293_v60 }
 0xd3c   : > { %v3283_v54 = vmul.f32 %v4760_v62, %v3275_v52 }
 0xd3e   : > { %v3294_v1 = vsel %vm3284_vm3, %v3291_v5, %v3283_v54 }
 0xd3f   : > { %3296 = vst [vmem:[%s258_s28 + $0x8] sm:$0xff] %v3294_v1 }
 0xd40   : > { %4922 = shalt.err (!%p4919_p4)
}
 0xd41   : > { %s4923_s9 = scalar_lea.hbm %s5726_s24, 256  ;;  %s4927_s6 = scalar_lea.hbm %s5774_s4, 512 }
 0xd42   : > { %p4924_p9 = scmp.ne.s32.totalorder %s5726_s24, %s4923_s9  ;;  %p4928_p13 = scmp.lt.u32.totalorder %s5726_s24, %s5774_s4 }
 0xd43   : > { %p4929_p6 = scmp.lt.u32.totalorder %s4927_s6, %s4923_s9  ;;  %p4931_p10 = scmp.lt.u32.totalorder %s4923_s9, %s5726_s24 }
 0xd44   : > { %p4925_p0 = pnand %p4924_p9, %p5169_p5 }
 0xd45   : > { %p4930_p7 = por %p4929_p6, %p4928_p13 }
 0xd46   : > { %p4926_p8 = pneg %p4925_p0 }
 0xd47   : > { %p4932_p3 = por %p4931_p10, %p4930_p7 }
 0xd49   : > { %p4933_p11 = pnand %p4932_p3, %p4926_p8 }
 0xd4b   : > { %4936 = shalt.err (!%p4933_p11)
}
 0xd4c   : > { %s4997_s28 = smov 128   ;;  %s4998_s8 = smov 8  }
 0xd4d   : > { %4523 = dma.vmem_to_hbm [thread:$0]  (%p5169_p5), %s5721_s10, 256, %s5726_s24, %s3298_s14, %s4997_s28, %s4997_s28, %s4998_s8  }
 0xd4e PF: > { %s3326_s12 = sand.u32 1, %s4971_s15   ;;  %p5798_p12 = scmp.ne.s32.totalorder %s5780_s22, 0 }
 0xd4f   : > { %p5799_p1 = scmp.ge.s32.totalorder %s4983_s18, 2  ;;  %s3327_s20 = scalar_lea.sflag [#allocation4], %s3326_s12 }
 0xd51   : > { %p4540_p2 = pnand %p5799_p1, %p5798_p12 }
 0xd53   : > { %4966 = dma.done.wait (!%p4540_p2), %s3327_s20, 256  }
 0xd54   : > { %4968 = vsyncadd (!%p4540_p2), %s3327_s20, 4294967040  ;;  %p19_p4 = scmp.ge.s32.totalorder %s5137_s27, 4   ;;  %s5800_s15 = smov %s4975_s16 }
 0xd55   : > { %s5801_s16 = smov %s4979_s17  ;;  %s5802_s17 = smov %s5165_s26 }
 0xd56   : > { %s5803_s18 = smov %s5137_s27  ;;  %21 = sbr.rel (!%p19_p4) target bundleno = 7 (0x7), region = 94 }
 0xd5d   :  { %3332 = vsyncpa [#allocation3], 1 }
 0xd5e   :  { %3334 = vsyncpa [#allocation3 + $0x1], 1 }
 0xd5f   :  { %3335 = vsyncpa [#allocation6], 1 }
 0xd60   :  { %3336 = vsyncpa [#allocation9], 1 }
 0xd61   :  { %3338 = vsyncpa [#allocation9 + $0x1], 1 }
 0xd62   :  { %3339 = vsyncpa [#allocation4], 1 }
 0xd63   :  { %3341 = vsyncpa [#allocation4 + $0x1], 1 }

</bundles_post_ra>
